<compile_context>
chip_gen: v7x
topology: tpu7x:2x2x1
jax: 0.10.0
libtpu: 0.0.40
codegen_flags: <defaults>
</compile_context>

<pallas_src>
import functools

import jax
import jax.numpy as jnp
from jax.experimental import pallas as pl
from jax.experimental.pallas import tpu as pltpu


_VMEM_BUDGET_BYTES = 24 * 2**20   # target working set (fits v5e/v6e/v7x comfortably)
_VMEM_LIMIT_BYTES = 48 * 2**20    # raised scoped-VMEM cap (still <= v7x's 64 MiB)


def _spe_filter_kernel(*refs, gated: bool):
    """One grid step: Tl sequence positions, all heads, full key_dim / realizations."""
    if gated:
        (q_ref, k_ref, qbar_ref, kbar_ref, ga_ref, gn_ref, qhat_ref, khat_ref) = refs
    else:
        (q_ref, k_ref, qbar_ref, kbar_ref, qhat_ref, khat_ref) = refs

    # Code blocks: (Tl, H, D, R).  Upcast once (codes may be streamed as bf16).
    cq = qbar_ref[...].astype(jnp.float32)
    ck = kbar_ref[...].astype(jnp.float32)

    if gated:
        ga = ga_ref[...][None]        # (1, H, D, R) = sqrt(1 - sigmoid(gate))
        gn = gn_ref[...][None]        # (1, H, D, R) = sqrt(sigmoid(gate)) * noise
        cq = ga * cq + gn
        ck = ga * ck + gn

    q = q_ref[...].astype(jnp.float32)    # (B, Tl, H, D)
    k = k_ref[...].astype(jnp.float32)

    # (code * x[..., None]).sum(axis=-2) on the VPU; B is tiny -> static unroll.
    for b in range(q.shape[0]):
        qhat_ref[b] = jnp.sum(q[b][..., None] * cq, axis=2).astype(qhat_ref.dtype)
        khat_ref[b] = jnp.sum(k[b][..., None] * ck, axis=2).astype(khat_ref.dtype)


def _round_up(n, m):
    return ((n + m - 1) // m) * m


def _pick_seq_block(L, H, B, D, R, code_isz, io_isz, out_isz,
                    budget=_VMEM_BUDGET_BYTES):
    """Largest sequence tile Tl (divisor of L) whose double-buffered working set fits
    the VMEM budget; prefers >= 2 grid steps so both v7x TensorCores get work."""
    Rp = _round_up(R, 128)
    sub_code = 16 if code_isz == 2 else 8
    row_code = H * _round_up(D, sub_code) * Rp * code_isz          # one l of one code
    row_io = B * _round_up(H, 8) * _round_up(D, 128) * io_isz      # one l of q or k
    row_out = B * _round_up(H, 8) * Rp * out_isz                   # one l of one output
    row_tmp = H * _round_up(D, 8) * Rp * 4                         # f32 in-kernel temps
    resident = 2 * H * _round_up(D, 8) * Rp * 4                    # gate / gated noise
    fitting = []
    for tl in range(L, 0, -1):
        if L % tl:
            continue
        est = (2 * 2 * tl * row_code       # qbar, kbar blocks (double-buffered)
               + 2 * 2 * tl * row_io       # q, k blocks
               + 2 * 2 * tl * row_out      # qhat, khat blocks
               + 3 * tl * row_tmp          # gated codes + broadcast product
               + resident)
        if est <= budget:
            fitting.append(tl)
    if not fitting:
        return 1
    multi = [tl for tl in fitting if L // tl >= 2]
    return multi[0] if multi else fitting[0]


@functools.partial(jax.jit, static_argnames=("gated", "code_dtype"))
def spe_filter_forward(queries, keys, qbar, kbar, gate, gating_noise,
                       gated=True, code_dtype=None):
    """Pallas implementation of SPEFilter.forward.

    queries, keys : (B, L, H, D)
    qbar, kbar    : (1, Lc, H, D, R) with Lc >= L
    gate          : (H, D)            (only used when gated=True)
    gating_noise  : (H, D, R)         (pre-sampled; PyTorch samples it in forward)
    code_dtype    : optional storage dtype for the streamed codes (e.g. bf16); math is f32.
    returns       : qhat, khat of shape (B, L, H, R)
    """
    B, L, H, D = queries.shape
    R = qbar.shape[-1]
    out_dtype = queries.dtype

    # Slice the code to the actual sequence length (mirrors the indices loop).
    qbar_s = qbar[0, :L]          # (L, H, D, R)
    kbar_s = kbar[0, :L]
    if code_dtype is not None:
        qbar_s = qbar_s.astype(code_dtype)
        kbar_s = kbar_s.astype(code_dtype)

    code_isz = jnp.dtype(qbar_s.dtype).itemsize
    io_isz = jnp.dtype(queries.dtype).itemsize
    out_isz = jnp.dtype(out_dtype).itemsize
    Tl = _pick_seq_block(L, H, B, D, R, code_isz, io_isz, out_isz)
    grid = (L // Tl,)

    in_specs = [
        pl.BlockSpec((B, Tl, H, D), lambda i: (0, i, 0, 0)),   # queries
        pl.BlockSpec((B, Tl, H, D), lambda i: (0, i, 0, 0)),   # keys
        pl.BlockSpec((Tl, H, D, R), lambda i: (i, 0, 0, 0)),   # qbar slab (dominant stream)
        pl.BlockSpec((Tl, H, D, R), lambda i: (i, 0, 0, 0)),   # kbar slab
    ]
    args = [queries, keys, qbar_s, kbar_s]

    if gated:
        g = jax.nn.sigmoid(gate.astype(jnp.float32))                       # (H, D)
        ga = jnp.broadcast_to(jnp.sqrt(1.0 - g)[..., None], (H, D, R))     # (H, D, R)
        gn = jnp.sqrt(g)[..., None] * gating_noise.astype(jnp.float32)     # (H, D, R)
        # Constant index_map -> loaded once, stays resident in VMEM across the grid.
        in_specs += [
            pl.BlockSpec((H, D, R), lambda i: (0, 0, 0)),
            pl.BlockSpec((H, D, R), lambda i: (0, 0, 0)),
        ]
        args += [ga, gn]

    out_specs = [
        pl.BlockSpec((B, Tl, H, R), lambda i: (0, i, 0, 0)),   # qhat (final layout)
        pl.BlockSpec((B, Tl, H, R), lambda i: (0, i, 0, 0)),   # khat
    ]
    out_shape = (jax.ShapeDtypeStruct((B, L, H, R), out_dtype),
                 jax.ShapeDtypeStruct((B, L, H, R), out_dtype))

    flops = 4 * B * L * H * D * R + (4 * L * H * D * R if gated else 0)
    bytes_accessed = (2 * L * H * D * R * code_isz          # codes (dominant traffic)
                      + 2 * B * L * H * D * io_isz          # queries / keys
                      + 2 * B * L * H * R * out_isz         # outputs
                      + (2 * H * D * R * 4 if gated else 0))

    qhat, khat = pl.pallas_call(
        functools.partial(_spe_filter_kernel, gated=gated),
        out_shape=out_shape,
        grid=grid,
        in_specs=in_specs,
        out_specs=out_specs,
        compiler_params=pltpu.CompilerParams(
            dimension_semantics=("parallel",),
            vmem_limit_bytes=_VMEM_LIMIT_BYTES),
        cost_estimate=pl.CostEstimate(flops=int(flops), transcendentals=0,
                                      bytes_accessed=int(bytes_accessed)),
    )(*args)
    return qhat, khat


def spe_filter_reference(queries, keys, qbar, kbar, gate, gating_noise, gated=True):
    """Pure-JAX port of the PyTorch forward (with the noise passed in, not sampled)."""
    L = queries.shape[1]
    qbar = qbar[:, :L]
    kbar = kbar[:, :L]
    if gated:
        g = jax.nn.sigmoid(gate)[..., None]                  # (H, D, 1)
        qbar = jnp.sqrt(1.0 - g) * qbar + jnp.sqrt(g) * gating_noise
        kbar = jnp.sqrt(1.0 - g) * kbar + jnp.sqrt(g) * gating_noise
    qhat = (qbar * queries[..., None]).sum(axis=-2)
    khat = (kbar * keys[..., None]).sum(axis=-2)
    return qhat, khat


if __name__ == "__main__":
    # Lc > L exercises the code-length slicing; R = 128 keeps outputs/codes lane-dense.
    B, L, Lc, H, D, R = 2, 8, 12, 4, 32, 128
    key = jax.random.PRNGKey(0)
    kq, kk, kqb, kkb, kg, kn = jax.random.split(key, 6)

    queries = jax.random.normal(kq, (B, L, H, D), jnp.float32)
    keys = jax.random.normal(kk, (B, L, H, D), jnp.float32)
    qbar = jax.random.normal(kqb, (1, Lc, H, D, R), jnp.float32)
    kbar = jax.random.normal(kkb, (1, Lc, H, D, R), jnp.float32)
    gate = jax.random.normal(kg, (H, D), jnp.float32)            # nn.Parameter init
    gating_noise = jax.random.normal(kn, (H, D, R), jnp.float32) / (D * R) ** 0.25

    # Gated path, f32 codes.
    qhat, khat = spe_filter_forward(queries, keys, qbar, kbar, gate, gating_noise,
                                    gated=True)
    jax.block_until_ready((qhat, khat))
    qhat_r, khat_r = spe_filter_reference(queries, keys, qbar, kbar, gate,
                                          gating_noise, gated=True)
    assert qhat.shape == (B, L, H, R) and khat.shape == (B, L, H, R)
    assert jnp.allclose(qhat, qhat_r, atol=1e-4, rtol=1e-4)
    assert jnp.allclose(khat, khat_r, atol=1e-4, rtol=1e-4)

    # Non-gated path (gate / noise unused).
    qh_ng, kh_ng = spe_filter_forward(queries, keys, qbar, kbar, gate, gating_noise,
                                      gated=False)
    qr_ng, kr_ng = spe_filter_reference(queries, keys, qbar, kbar, gate, gating_noise,
                                        gated=False)
    assert jnp.allclose(qh_ng, qr_ng, atol=1e-4, rtol=1e-4)
    assert jnp.allclose(kh_ng, kr_ng, atol=1e-4, rtol=1e-4)

    # bf16 streaming of the dominant qbar/kbar traffic (math stays in f32).
    qh_bf, kh_bf = spe_filter_forward(queries, keys, qbar, kbar, gate, gating_noise,
                                      gated=True, code_dtype=jnp.bfloat16)
    jax.block_until_ready((qh_bf, kh_bf))
    qr_bf, kr_bf = spe_filter_reference(
        queries, keys,
        qbar.astype(jnp.bfloat16).astype(jnp.float32),
        kbar.astype(jnp.bfloat16).astype(jnp.float32),
        gate, gating_noise, gated=True)
    assert jnp.allclose(qh_bf, qr_bf, atol=1e-3, rtol=1e-3)
    assert jnp.allclose(kh_bf, kr_bf, atol=1e-3, rtol=1e-3)

    print("KERNEL_OK")
</pallas_src>

<mosaic_0001>
module attributes {stable_mosaic.version = 11 : i64} {
  func.func @_spe_filter_kernel(%arg0: i32, %arg1: memref<2x4x4x32xf32, #tpu.memory_space<vmem>>, %arg2: memref<2x4x4x32xf32, #tpu.memory_space<vmem>>, %arg3: memref<4x4x32x128xf32, #tpu.memory_space<vmem>>, %arg4: memref<4x4x32x128xf32, #tpu.memory_space<vmem>>, %arg5: memref<4x32x128xf32, #tpu.memory_space<vmem>>, %arg6: memref<4x32x128xf32, #tpu.memory_space<vmem>>, %arg7: memref<2x4x4x128xf32, #tpu.memory_space<vmem>>, %arg8: memref<2x4x4x128xf32, #tpu.memory_space<vmem>>) attributes {dimension_semantics = [#tpu.dimension_semantics<parallel>], iteration_bounds = array<i64: 2>, scalar_prefetch = 0 : i64, scratch_operands = 0 : i64, tpu.core_type = #tpu.core_type<tc>, window_params = [{transform_indices = @transform_0, window_bounds = array<i64: 2, 4, 4, 32>}, {transform_indices = @transform_1, window_bounds = array<i64: 2, 4, 4, 32>}, {transform_indices = @transform_2, window_bounds = array<i64: 4, 4, 32, 128>}, {transform_indices = @transform_3, window_bounds = array<i64: 4, 4, 32, 128>}, {pipeline_mode = #tpu.pipeline_mode<synchronous>, transform_indices = @transform_4, window_bounds = array<i64: 4, 32, 128>}, {pipeline_mode = #tpu.pipeline_mode<synchronous>, transform_indices = @transform_5, window_bounds = array<i64: 4, 32, 128>}, {transform_indices = @transform_6, window_bounds = array<i64: 2, 4, 4, 128>}, {transform_indices = @transform_7, window_bounds = array<i64: 2, 4, 4, 128>}]} {
    %c0 = arith.constant 0 : index
    %c0_0 = arith.constant 0 : index
    %c0_1 = arith.constant 0 : index
    %c0_2 = arith.constant 0 : index
    %0 = vector.load %arg3[%c0, %c0_0, %c0_1, %c0_2] : memref<4x4x32x128xf32, #tpu.memory_space<vmem>>, vector<4x4x32x128xf32>
    %c0_3 = arith.constant 0 : index
    %c0_4 = arith.constant 0 : index
    %c0_5 = arith.constant 0 : index
    %c0_6 = arith.constant 0 : index
    %1 = vector.load %arg4[%c0_3, %c0_4, %c0_5, %c0_6] : memref<4x4x32x128xf32, #tpu.memory_space<vmem>>, vector<4x4x32x128xf32>
    %c0_7 = arith.constant 0 : index
    %c0_8 = arith.constant 0 : index
    %c0_9 = arith.constant 0 : index
    %2 = vector.load %arg5[%c0_7, %c0_8, %c0_9] : memref<4x32x128xf32, #tpu.memory_space<vmem>>, vector<4x32x128xf32>
    %3 = vector.shape_cast %2 : vector<4x32x128xf32> to vector<1x4x32x128xf32>
    %c0_10 = arith.constant 0 : index
    %c0_11 = arith.constant 0 : index
    %c0_12 = arith.constant 0 : index
    %4 = vector.load %arg6[%c0_10, %c0_11, %c0_12] : memref<4x32x128xf32, #tpu.memory_space<vmem>>, vector<4x32x128xf32>
    %5 = vector.shape_cast %4 : vector<4x32x128xf32> to vector<1x4x32x128xf32>
    %6 = vector.broadcast %3 : vector<1x4x32x128xf32> to vector<4x4x32x128xf32>
    %7 = arith.mulf %6, %0 : vector<4x4x32x128xf32>
    %8 = vector.broadcast %5 : vector<1x4x32x128xf32> to vector<4x4x32x128xf32>
    %9 = arith.addf %7, %8 : vector<4x4x32x128xf32>
    %10 = vector.broadcast %3 : vector<1x4x32x128xf32> to vector<4x4x32x128xf32>
    %11 = arith.mulf %10, %1 : vector<4x4x32x128xf32>
    %12 = vector.broadcast %5 : vector<1x4x32x128xf32> to vector<4x4x32x128xf32>
    %13 = arith.addf %11, %12 : vector<4x4x32x128xf32>
    %c0_13 = arith.constant 0 : index
    %c0_14 = arith.constant 0 : index
    %c0_15 = arith.constant 0 : index
    %c0_16 = arith.constant 0 : index
    %14 = vector.load %arg1[%c0_13, %c0_14, %c0_15, %c0_16] : memref<2x4x4x32xf32, #tpu.memory_space<vmem>>, vector<2x4x4x32xf32>
    %c0_17 = arith.constant 0 : index
    %c0_18 = arith.constant 0 : index
    %c0_19 = arith.constant 0 : index
    %c0_20 = arith.constant 0 : index
    %15 = vector.load %arg2[%c0_17, %c0_18, %c0_19, %c0_20] : memref<2x4x4x32xf32, #tpu.memory_space<vmem>>, vector<2x4x4x32xf32>
    %16 = vector.extract_strided_slice %14 {offsets = [0, 0, 0, 0], sizes = [1, 4, 4, 32], strides = [1, 1, 1, 1]} : vector<2x4x4x32xf32> to vector<1x4x4x32xf32>
    %17 = vector.shape_cast %16 : vector<1x4x4x32xf32> to vector<4x4x32xf32>
    %18 = vector.shape_cast %17 : vector<4x4x32xf32> to vector<4x4x32x1xf32>
    %19 = vector.broadcast %18 : vector<4x4x32x1xf32> to vector<4x4x32x128xf32>
    %20 = arith.mulf %19, %9 : vector<4x4x32x128xf32>
    %cst = arith.constant dense<0.000000e+00> : vector<4x4x128xf32>
    %21 = vector.multi_reduction <add>, %20, %cst [2] : vector<4x4x32x128xf32> to vector<4x4x128xf32>
    %c0_21 = arith.constant 0 : index
    %c0_22 = arith.constant 0 : index
    %c0_23 = arith.constant 0 : index
    %c0_24 = arith.constant 0 : index
    %22 = vector.load %arg7[%c0_21, %c0_22, %c0_23, %c0_24] : memref<2x4x4x128xf32, #tpu.memory_space<vmem>>, vector<1x4x4x128xf32>
    %23 = vector.shape_cast %22 : vector<1x4x4x128xf32> to vector<4x4x128xf32>
    %24 = vector.shape_cast %21 : vector<4x4x128xf32> to vector<1x4x4x128xf32>
    tpu.vector_store %arg7[%c0_21, %c0_22, %c0_23, %c0_24], %24 {strides = array<i32>} : memref<2x4x4x128xf32, #tpu.memory_space<vmem>>, vector<1x4x4x128xf32>,
    %25 = vector.extract_strided_slice %15 {offsets = [0, 0, 0, 0], sizes = [1, 4, 4, 32], strides = [1, 1, 1, 1]} : vector<2x4x4x32xf32> to vector<1x4x4x32xf32>
    %26 = vector.shape_cast %25 : vector<1x4x4x32xf32> to vector<4x4x32xf32>
    %27 = vector.shape_cast %26 : vector<4x4x32xf32> to vector<4x4x32x1xf32>
    %28 = vector.broadcast %27 : vector<4x4x32x1xf32> to vector<4x4x32x128xf32>
    %29 = arith.mulf %28, %13 : vector<4x4x32x128xf32>
    %cst_25 = arith.constant dense<0.000000e+00> : vector<4x4x128xf32>
    %30 = vector.multi_reduction <add>, %29, %cst_25 [2] : vector<4x4x32x128xf32> to vector<4x4x128xf32>
    %c0_26 = arith.constant 0 : index
    %c0_27 = arith.constant 0 : index
    %c0_28 = arith.constant 0 : index
    %c0_29 = arith.constant 0 : index
    %31 = vector.load %arg8[%c0_26, %c0_27, %c0_28, %c0_29] : memref<2x4x4x128xf32, #tpu.memory_space<vmem>>, vector<1x4x4x128xf32>
    %32 = vector.shape_cast %31 : vector<1x4x4x128xf32> to vector<4x4x128xf32>
    %33 = vector.shape_cast %30 : vector<4x4x128xf32> to vector<1x4x4x128xf32>
    tpu.vector_store %arg8[%c0_26, %c0_27, %c0_28, %c0_29], %33 {strides = array<i32>} : memref<2x4x4x128xf32, #tpu.memory_space<vmem>>, vector<1x4x4x128xf32>,
    %34 = vector.extract_strided_slice %14 {offsets = [1, 0, 0, 0], sizes = [1, 4, 4, 32], strides = [1, 1, 1, 1]} : vector<2x4x4x32xf32> to vector<1x4x4x32xf32>
    %35 = vector.shape_cast %34 : vector<1x4x4x32xf32> to vector<4x4x32xf32>
    %36 = vector.shape_cast %35 : vector<4x4x32xf32> to vector<4x4x32x1xf32>
    %37 = vector.broadcast %36 : vector<4x4x32x1xf32> to vector<4x4x32x128xf32>
    %38 = arith.mulf %37, %9 : vector<4x4x32x128xf32>
    %cst_30 = arith.constant dense<0.000000e+00> : vector<4x4x128xf32>
    %39 = vector.multi_reduction <add>, %38, %cst_30 [2] : vector<4x4x32x128xf32> to vector<4x4x128xf32>
    %c1 = arith.constant 1 : index
    %c0_31 = arith.constant 0 : index
    %c0_32 = arith.constant 0 : index
    %c0_33 = arith.constant 0 : index
    %40 = vector.load %arg7[%c1, %c0_31, %c0_32, %c0_33] : memref<2x4x4x128xf32, #tpu.memory_space<vmem>>, vector<1x4x4x128xf32>
    %41 = vector.shape_cast %40 : vector<1x4x4x128xf32> to vector<4x4x128xf32>
    %42 = vector.shape_cast %39 : vector<4x4x128xf32> to vector<1x4x4x128xf32>
    tpu.vector_store %arg7[%c1, %c0_31, %c0_32, %c0_33], %42 {strides = array<i32>} : memref<2x4x4x128xf32, #tpu.memory_space<vmem>>, vector<1x4x4x128xf32>,
    %43 = vector.extract_strided_slice %15 {offsets = [1, 0, 0, 0], sizes = [1, 4, 4, 32], strides = [1, 1, 1, 1]} : vector<2x4x4x32xf32> to vector<1x4x4x32xf32>
    %44 = vector.shape_cast %43 : vector<1x4x4x32xf32> to vector<4x4x32xf32>
    %45 = vector.shape_cast %44 : vector<4x4x32xf32> to vector<4x4x32x1xf32>
    %46 = vector.broadcast %45 : vector<4x4x32x1xf32> to vector<4x4x32x128xf32>
    %47 = arith.mulf %46, %13 : vector<4x4x32x128xf32>
    %cst_34 = arith.constant dense<0.000000e+00> : vector<4x4x128xf32>
    %48 = vector.multi_reduction <add>, %47, %cst_34 [2] : vector<4x4x32x128xf32> to vector<4x4x128xf32>
    %c1_35 = arith.constant 1 : index
    %c0_36 = arith.constant 0 : index
    %c0_37 = arith.constant 0 : index
    %c0_38 = arith.constant 0 : index
    %49 = vector.load %arg8[%c1_35, %c0_36, %c0_37, %c0_38] : memref<2x4x4x128xf32, #tpu.memory_space<vmem>>, vector<1x4x4x128xf32>
    %50 = vector.shape_cast %49 : vector<1x4x4x128xf32> to vector<4x4x128xf32>
    %51 = vector.shape_cast %48 : vector<4x4x128xf32> to vector<1x4x4x128xf32>
    tpu.vector_store %arg8[%c1_35, %c0_36, %c0_37, %c0_38], %51 {strides = array<i32>} : memref<2x4x4x128xf32, #tpu.memory_space<vmem>>, vector<1x4x4x128xf32>,
    return
  }
  func.func @transform_0(%arg0: i32) -> (i32, i32, i32, i32) {
    %c0_i32 = arith.constant 0 : i32
    %c0_i32_0 = arith.constant 0 : i32
    %c0_i32_1 = arith.constant 0 : i32
    %c0_i32_2 = arith.constant 0 : i32
    return %c0_i32, %arg0, %c0_i32_0, %c0_i32_1 : i32, i32, i32, i32
  }
  func.func @transform_1(%arg0: i32) -> (i32, i32, i32, i32) {
    %c0_i32 = arith.constant 0 : i32
    %c0_i32_0 = arith.constant 0 : i32
    %c0_i32_1 = arith.constant 0 : i32
    %c0_i32_2 = arith.constant 0 : i32
    return %c0_i32, %arg0, %c0_i32_0, %c0_i32_1 : i32, i32, i32, i32
  }
  func.func @transform_2(%arg0: i32) -> (i32, i32, i32, i32) {
    %c0_i32 = arith.constant 0 : i32
    %c0_i32_0 = arith.constant 0 : i32
    %c0_i32_1 = arith.constant 0 : i32
    %c0_i32_2 = arith.constant 0 : i32
    return %arg0, %c0_i32, %c0_i32_0, %c0_i32_1 : i32, i32, i32, i32
  }
  func.func @transform_3(%arg0: i32) -> (i32, i32, i32, i32) {
    %c0_i32 = arith.constant 0 : i32
    %c0_i32_0 = arith.constant 0 : i32
    %c0_i32_1 = arith.constant 0 : i32
    %c0_i32_2 = arith.constant 0 : i32
    return %arg0, %c0_i32, %c0_i32_0, %c0_i32_1 : i32, i32, i32, i32
  }
  func.func @transform_4(%arg0: i32) -> (i32, i32, i32) {
    %c0_i32 = arith.constant 0 : i32
    %c0_i32_0 = arith.constant 0 : i32
    %c0_i32_1 = arith.constant 0 : i32
    %c0_i32_2 = arith.constant 0 : i32
    return %c0_i32, %c0_i32_0, %c0_i32_1 : i32, i32, i32
  }
  func.func @transform_5(%arg0: i32) -> (i32, i32, i32) {
    %c0_i32 = arith.constant 0 : i32
    %c0_i32_0 = arith.constant 0 : i32
    %c0_i32_1 = arith.constant 0 : i32
    %c0_i32_2 = arith.constant 0 : i32
    return %c0_i32, %c0_i32_0, %c0_i32_1 : i32, i32, i32
  }
  func.func @transform_6(%arg0: i32) -> (i32, i32, i32, i32) {
    %c0_i32 = arith.constant 0 : i32
    %c0_i32_0 = arith.constant 0 : i32
    %c0_i32_1 = arith.constant 0 : i32
    %c0_i32_2 = arith.constant 0 : i32
    return %c0_i32, %arg0, %c0_i32_0, %c0_i32_1 : i32, i32, i32, i32
  }
  func.func @transform_7(%arg0: i32) -> (i32, i32, i32, i32) {
    %c0_i32 = arith.constant 0 : i32
    %c0_i32_0 = arith.constant 0 : i32
    %c0_i32_1 = arith.constant 0 : i32
    %c0_i32_2 = arith.constant 0 : i32
    return %c0_i32, %arg0, %c0_i32_0, %c0_i32_1 : i32, i32, i32, i32
  }
}

</mosaic_0001>

<bundles_post_ra>
// kernel: spe_filter_forward.1
= control target key start
LH: loop header
LB: loop body
LE: loop exit
PB: predicated region body
PF: predicated region fallthrough
CT: control target
= control target key end

     0   :  { %13 = vsyncpa [#allocation5], 0  ;;  %s5292_s0 = inlined_call_operand.vmem [shape: f32[2,8,4,32], index: 0, kind: input, shape index: {}]   ;;  %s5293_s1 = inlined_call_operand.vmem [shape: f32[2,8,4,32], index: 1, kind: input, shape index: {}]   ;;  %s5294_s2 = inlined_call_operand.vmem [shape: f32[8,4,32,128], index: 2, kind: input, shape index: {}]   ;;  %s5295_s3 = inlined_call_operand.vmem [shape: f32[8,4,32,128], index: 3, kind: input, shape index: {}]   ;;  %s5296_s4 = inlined_call_operand.vmem [shape: f32[4,32,128], index: 4, kind: input, shape index: {}]   ;;  %s5297_s5 = inlined_call_operand.vmem [shape: f32[4,32,128], index: 5, kind: input, shape index: {}]   ;;  %s5298_s6 = inlined_call_operand.hbm [shape: f32[2,8,4,128], index: 6, kind: output, shape index: {0}]   ;;  %s5299_s7 = inlined_call_operand.hbm [shape: f32[2,8,4,128], index: 7, kind: output, shape index: {1}]  }
   0x1   :  { %15 = vsyncpa [#allocation5 + $0x1], 0 }
   0x2   :  { %16 = vsyncpa [#allocation7], 0 }
   0x3   :  { %18 = vsyncpa [#allocation7 + $0x1], 0  ;;  %s3600_s24 = smov 0   ;;  %s3602_s25 = smov 0  }
   0x4   :  { %s3604_s26 = smov 0   ;;  %s3606_s27 = smov 0  }
   0x5 LB: > { %s3621_s28 = sadd.s32 4294967295, %s3546_s27   ;;  %s3366_s29 = sadd.s32 4294967294, %s3546_s27   ;;  %s3546_s27 = sphi %s3606_s27, %s5722_s27   ;;  %s3542_s26 = sphi %s3604_s26, %s5721_s26   ;;  %s3538_s25 = sphi %s3602_s25, %s5720_s25   ;;  %s3534_s24 = sphi %s3600_s24, %s5719_s24  }
   0x6   : > { %s3625_s30 = sadd.s32 1, %s3546_s27   ;;  %s31_s8 = sadd.s32 1, %s3542_s26 }
   0x7   : > { %s28_s9 = ssub.s32 %s3546_s27, %s3625_s30  ;;  %p38_p0 = scmp.ne.s32.totalorder %s3542_s26, %s3538_s25 }
   0x8   : > { %p29_p1 = scmp.eq.s32.totalorder %s28_s9, 0  ;;  %p39_p2 = scmp.eq.s32.totalorder %s3546_s27, 0 }
   0x9   : > { %p188_p3 = scmp.eq.s32.totalorder %s3621_s28, 1  ;;  %p193_p4 = scmp.ne.s32.totalorder %s3538_s25, %s3534_s24 }
   0xa   : > { %s3637_s10 = scalar_select %p29_p1, %s3542_s26, %s31_s8  }
   0xb   : > { %p3639_p5 = por %p39_p2, %p38_p0  ;;  %p3643_p6 = por %p188_p3, %p38_p0 }
   0xc   : > { %p194_p7 = scmp.eq.s32.totalorder %s3366_s29, 1  ;;  %p3368_p9 = scmp.ge.s32.totalorder %s3546_s27, 2 }
   0xe   : > { %p3647_p8 = por %p194_p7, %p193_p4  ;;  %242 = sbr.rel (%p3368_p9) target bundleno = 35 (0x23), region = 24 }
  0x15   : > { %245 = sbr.rel (!%p3639_p5) target bundleno = 28 (0x1c), region = 28  ;;  %s247_s14 = sand.u32 (%p3639_p5), 1, %s3542_s26  }
  0x16   : > { %s3402_s15 = sshll.u32 (%p3639_p5), %s3546_s27, 4  ;;  %s3369_s16 = sshll.u32 (%p3639_p5), %s247_s14, 5 }
  0x17   : > { %s252_s19 = scalar_lea.vmem (%p3639_p5), %s5292_s0, %s3402_s15  ;;  %s249_s20 = scalar_lea.vmem (%p3639_p5), [#allocation2], %s3369_s16 }
  0x18   : > { %v268_v0 = vld [vmem:[%s252_s19] sm:$0xff] (%p3639_p5)   ;;  %v272_v1 = vld [vmem:[%s252_s19 + $0x8] sm:$0xff] (%p3639_p5)  }
  0x19   : > { %v276_v2 = vld [vmem:[%s252_s19 + $0x20] sm:$0xff] (%p3639_p5)   ;;  %269 = vst [vmem:[%s249_s20] sm:$0xff] (%p3639_p5), %v268_v0   ;;  %273 = vst [vmem:[%s249_s20 + $0x8] sm:$0xff] (%p3639_p5), %v272_v1   ;;  %v280_v3 = vld [vmem:[%s252_s19 + $0x28] sm:$0xff] (%p3639_p5)  }
  0x1a   : > { %277 = vst [vmem:[%s249_s20 + $0x10] sm:$0xff] (%p3639_p5), %v276_v2   ;;  %281 = vst [vmem:[%s249_s20 + $0x18] sm:$0xff] (%p3639_p5), %v280_v3  }
  0x1c PF: > { %322 = sbr.rel (!%p3639_p5) target bundleno = 35 (0x23), region = 69  ;;  %s324_s21 = sand.u32 (%p3639_p5), 1, %s3542_s26  }
  0x1d   : > { %s3403_s22 = sshll.u32 (%p3639_p5), %s3546_s27, 4  ;;  %s3372_s23 = sshll.u32 (%p3639_p5), %s324_s21, 5 }
  0x1e   : > { %s329_s9 = scalar_lea.vmem (%p3639_p5), %s5293_s1, %s3403_s22  ;;  %s326_s14 = scalar_lea.vmem (%p3639_p5), [#allocation3], %s3372_s23 }
  0x1f   : > { %v345_v4 = vld [vmem:[%s329_s9] sm:$0xff] (%p3639_p5)   ;;  %v349_v5 = vld [vmem:[%s329_s9 + $0x8] sm:$0xff] (%p3639_p5)  }
  0x20   : > { %v353_v6 = vld [vmem:[%s329_s9 + $0x20] sm:$0xff] (%p3639_p5)   ;;  %346 = vst [vmem:[%s326_s14] sm:$0xff] (%p3639_p5), %v345_v4   ;;  %350 = vst [vmem:[%s326_s14 + $0x8] sm:$0xff] (%p3639_p5), %v349_v5   ;;  %v357_v7 = vld [vmem:[%s329_s9 + $0x28] sm:$0xff] (%p3639_p5)  }
  0x21   : > { %354 = vst [vmem:[%s326_s14 + $0x10] sm:$0xff] (%p3639_p5), %v353_v6   ;;  %358 = vst [vmem:[%s326_s14 + $0x18] sm:$0xff] (%p3639_p5), %v357_v7  }
  0x23 PF: > { %p3375_p10 = scmp.ge.s32.totalorder %s3546_s27, 1  ;;  %p418_p11 = scmp.lt.s32.totalorder %s3546_s27, 3 }
  0x25   : > { %p419_p12 = pnand %p3375_p10, %p418_p11 }
  0x27   : > { %422 = sbr.rel (%p419_p12) target bundleno = 713 (0x2c9), region = 118 }
  0x2e   : > { %s3671_s11 = sand.u32 1, %s3538_s25   ;;  %v934_v8 = vlaneseq  ;;  %s3380_s17 = sshll.u32 %s3621_s28, 2  ;;  %v3721_v34 = vld [vmem:[%s5296_s4 + $0x8] sm:$0xff]  ;;  %v3726_v35 = vld [vmem:[%s5296_s4] sm:$0xff]  ;;  %v3745_v42 = vld [vmem:[%s5296_s4 + $0x10] sm:$0xff]  ;;  %vm1462_vm0 = vcmask 1041409  }
  0x2f   : > { %s3674_s15 = sshll.u32 %s3671_s11, 5  ;;  %p487_p13 = scmp.lt.s32.totalorder %s3380_s17, 7  ;;  %v3731_v36 = vld [vmem:[%s5296_s4 + $0x28] sm:$0xff]  ;;  %v3736_v37 = vld [vmem:[%s5296_s4 + $0x20] sm:$0xff]  ;;  %v3778_v55 = vld [vmem:[%s5296_s4 + $0x30] sm:$0xff]  ;;  %vm1464_vm1 = vcmask 1042434  }
  0x30   : > { %v935_v9 = vshrl.u32 %v934_v8, 7  ;;  %s3677_s16 = scalar_lea.vmem [#allocation2], %s3674_s15  ;;  %v3752_v45 = vld [vmem:[%s5297_s5 + $0x8] sm:$0xff]  ;;  %v3758_v47 = vld [vmem:[%s5297_s5] sm:$0xff]  ;;  %v3783_v56 = vld [vmem:[%s5297_s5 + $0x10] sm:$0xff]  ;;  %s3833_s22 = scalar_lea.vmem [#allocation3], %s3674_s15 }
  0x31   : > { %v918_v10 = vld [vmem:[%s3677_s16] sm:$0xf]  ;;  %v919_v19 = vld [vmem:[%s3677_s16 + $0x4] sm:$0xf]  ;;  %v920_v24 = vld [vmem:[%s3677_s16 + $0x8] sm:$0xf] }
  0x32   : > { %v3680_v11 = vsub.s32 0, %v935_v9  ;;  %v3683_v13 = vsub.s32 1, %v935_v9  ;;  %v3686_v15 = vsub.s32 2, %v935_v9  ;;  %v3689_v17 = vsub.s32 3, %v935_v9  ;;  %v921_v29 = vld [vmem:[%s3677_s16 + $0xc] sm:$0xf] }
  0x33   : > { %s5724_s17 = smov (!%p487_p13, %s3380_s17), 7  ;;  %5450 = vst [vmem:[#allocation15_spill] sm:$0xff] %v3752_v45  ;;  %5451 = vst [vmem:[#allocation16_spill] sm:$0xff] %v3758_v47  ;;  %v3764_v49 = vld [vmem:[%s5297_s5 + $0x28] sm:$0xff]  ;;  %v3772_v53 = vld [vmem:[%s5297_s5 + $0x20] sm:$0xff]  ;;  %vm1466_vm2 = vcmask 1043459  }
  0x34   : > { %v937_v12 = vrot.slane %v918_v10, %v3680_v11  ;;  %v956_v14 = vrot.slane %v918_v10, %v3683_v13  ;;  %5449 = vst [vmem:[#allocation14_spill] sm:$0xff] %v3686_v15  ;;  %v975_v16 = vrot.slane %v918_v10, %v3686_v15  ;;  %v994_v18 = vrot.slane %v918_v10, %v3689_v17  ;;  %s3404_s18 = sshll.u32 %s5724_s17, 7  ;;  %v3788_v57 = vld [vmem:[%s5296_s4 + $0x18] sm:$0xff]  ;;  %v3805_v0 = vld [vmem:[%s5296_s4 + $0x48] sm:$0xff]  ;;  %v3810_v1 = vld [vmem:[%s5296_s4 + $0x40] sm:$0xff]  ;;  %s4068_s14 = scalar_lea.vmem [#allocation4], %s3674_s15 }
  0x35   : > { %v1013_v20 = vrot.slane %v919_v19, %v3680_v11  ;;  %v1032_v21 = vrot.slane %v919_v19, %v3683_v13  ;;  %v1051_v22 = vrot.slane %v919_v19, %v3686_v15  ;;  %v1070_v23 = vrot.slane %v919_v19, %v3689_v17  ;;  %s3715_s21 = scalar_lea.vmem %s5294_s2, %s3404_s18  ;;  %5452 = vst [vmem:[#allocation17_spill] sm:$0xff] %v3764_v49  ;;  %v3796_v59 = vld [vmem:[%s5296_s4 + $0x38] sm:$0xff]  ;;  %v3828_v9 = vld [vmem:[%s5297_s5 + $0x30] sm:$0xff]  ;;  %s4334_s20 = scalar_lea.vmem %s5295_s3, %s3404_s18 }
  0x36   : > { %947 = vbcast.lane.b32.xlu1 %v937_v12, 272  ;;  %939 = vbcast.lane.b32.xlu0 %v937_v12, 256  ;;  %v1089_v25 = vrot.slane %v920_v24, %v3680_v11  ;;  %v1108_v26 = vrot.slane %v920_v24, %v3683_v13  ;;  %v1127_v27 = vrot.slane %v920_v24, %v3686_v15  ;;  %v503_v33 = vld [vmem:[%s3715_s21 + $0x8] sm:$0xff]  ;;  %v502_v38 = vld [vmem:[%s3715_s21] sm:$0xff]  ;;  %v504_v46 = vld [vmem:[%s3715_s21 + $0x10] sm:$0xff]  ;;  %s4689_s17 = scalar_lea.vmem [#allocation6], %s3674_s15 }
  0x37   : > { %v1146_v28 = vrot.slane %v920_v24, %v3689_v17  ;;  %v1165_v30 = vrot.slane %v921_v29, %v3680_v11  ;;  %v1184_v31 = vrot.slane %v921_v29, %v3683_v13  ;;  %v1203_v32 = vrot.slane %v921_v29, %v3686_v15  ;;  %v507_v39 = vld [vmem:[%s3715_s21 + $0x28] sm:$0xff]  ;;  %v506_v40 = vld [vmem:[%s3715_s21 + $0x20] sm:$0xff]  ;;  %5453 = vst [vmem:[#allocation18_spill] sm:$0xff] %v3772_v53  ;;  %v508_v54 = vld [vmem:[%s3715_s21 + $0x30] sm:$0xff]  ;;  %s3132_s15 = scalar_lea.sflag [#allocation5], %s3671_s11 }
  0x38   : > { %v663_v41 = vmul.f32 %v3721_v34, %v503_v33  ;;  %v662_v48 = vmul.f32 %v3726_v35, %v502_v38  ;;  %v667_v50 = vmul.f32 %v3731_v36, %v507_v39  ;;  %v666_v51 = vmul.f32 %v3736_v37, %v506_v40  ;;  %5454 = vst [vmem:[#allocation19_spill] sm:$0xff] %v3783_v56  ;;  %v509_v63 = vld [vmem:[%s3715_s21 + $0x38] sm:$0xff]  ;;  %v511_v7 = vld [vmem:[%s3715_s21 + $0x48] sm:$0xff]  ;;  %v510_v8 = vld [vmem:[%s3715_s21 + $0x40] sm:$0xff] }
  0x39   : > { %v1222_v52 = vrot.slane %v921_v29, %v3689_v17  ;;  %5455 = vst [vmem:[#allocation20_spill] sm:$0xff] %v3788_v57  ;;  %5457 = vst [vmem:[#allocation22_spill] sm:$0xff] %v3796_v59  ;;  %v664_v60 = vmul.f32 %v3745_v42, %v504_v46  ;;  %v505_v3 = vld [vmem:[%s3715_s21 + $0x18] sm:$0xff]  ;;  %v668_v6 = vmul.f32 %v3778_v55, %v508_v54  ;;  %v3863_v29 = vld [vmem:[%s5297_s5 + $0x48] sm:$0xff] }
  0x3a   : > { %951 = vbcast.lane.b32.xlu1 %v937_v12, 280  ;;  %943 = vbcast.lane.b32.xlu0 %v937_v12, 264  ;;  %v3791_v58 = vadd.f32 %v663_v41, %v3752_v45  ;;  %v3813_v2 = vadd.f32 %v662_v48, %v3758_v47  ;;  %v3817_v4 = vadd.f32 %v667_v50, %v3764_v49  ;;  %v3876_v33 = vld [vmem:[%s5297_s5 + $0x40] sm:$0xff]  ;;  %v3884_v40 = vld [vmem:[%s5296_s4 + $0x58] sm:$0xff]  ;;  %v515_v54 = vld [vmem:[%s3715_s21 + $0x68] sm:$0xff] }
  0x3b   : > { %v3820_v5 = vadd.f32 %v666_v51, %v3772_v53  ;;  %5461 = vst [vmem:[#allocation26_spill] sm:$0xff] %v3828_v9  ;;  %v669_v12 = vmul.f32 %v3796_v59, %v509_v63  ;;  %v665_v19 = vmul.f32 %v3788_v57, %v505_v3  ;;  %v670_v24 = vmul.f32 %v3810_v1, %v510_v8  ;;  %v513_v50 = vld [vmem:[%s3715_s21 + $0x58] sm:$0xff]  ;;  %v3896_v51 = vld [vmem:[%s5297_s5 + $0x50] sm:$0xff]  ;;  %v3915_v8 = vld [vmem:[%s5296_s4 + $0x60] sm:$0xff] }
  0x3c   : > { %5456 = vst [vmem:[#allocation21_spill] sm:$0xff] %v3791_v58  ;;  %5458 = vst [vmem:[#allocation23_spill] sm:$0xff] %v3813_v2 }
  0x3d   : > { %5459 = vst [vmem:[#allocation24_spill] sm:$0xff] %v3817_v4  ;;  %5460 = vst [vmem:[#allocation25_spill] sm:$0xff] %v3820_v5  ;;  %v3904_v3 = vadd.f32 %v670_v24, %v3876_v33 }
  0x3e   : > { %962 = vbcast.lane.b32.xlu1 %v956_v14, 264  ;;  %958 = vbcast.lane.b32.xlu0 %v956_v14, 256 }
  0x3f   : > { %5468 = vst [vmem:[#allocation33_spill] sm:$0xff] %v3904_v3 }
  0x42   : > { %970 = vbcast.lane.b32.xlu1 %v956_v14, 280  ;;  %966 = vbcast.lane.b32.xlu0 %v956_v14, 272  ;;  %v3836_v14 = vld [vmem:[%s3833_s22] sm:$0xf] }
  0x46   : > { %981 = vbcast.lane.b32.xlu1 %v975_v16, 264  ;;  %977 = vbcast.lane.b32.xlu0 %v975_v16, 256 }
  0x4a   : > { %989 = vbcast.lane.b32.xlu1 %v975_v16, 280  ;;  %985 = vbcast.lane.b32.xlu0 %v975_v16, 272  ;;  %v3839_v16 = vadd.f32 %v664_v60, %v3783_v56 }
  0x4c   : > { %5462 = vst [vmem:[#allocation27_spill] sm:$0xff] %v3839_v16 }
  0x4e   : > { %1000 = vbcast.lane.b32.xlu1 %v994_v18, 264  ;;  %996 = vbcast.lane.b32.xlu0 %v994_v18, 256 }
  0x52   : > { %1008 = vbcast.lane.b32.xlu1 %v994_v18, 280  ;;  %1004 = vbcast.lane.b32.xlu0 %v994_v18, 272  ;;  %v3844_v18 = vld [vmem:[%s5297_s5 + $0x18] sm:$0xff] }
  0x53   : > { %5463 = vst [vmem:[#allocation28_spill] sm:$0xff] %v3844_v18  ;;  %v3887_v41 = vadd.f32 %v665_v19, %v3844_v18  ;;  %v673_v19 = vmul.f32 %v3884_v40, %v513_v50  ;;  %v516_v50 = vld [vmem:[%s3715_s21 + $0x70] sm:$0xff] }
  0x55   : > { %5466 = vst [vmem:[#allocation31_spill] sm:$0xff] %v3887_v41 }
  0x56   : > { %1019 = vbcast.lane.b32.xlu1 %v1013_v20, 264  ;;  %1015 = vbcast.lane.b32.xlu0 %v1013_v20, 256 }
  0x5a   : > { %1027 = vbcast.lane.b32.xlu1 %v1013_v20, 280  ;;  %1023 = vbcast.lane.b32.xlu0 %v1013_v20, 272 }
  0x5e   : > { %1038 = vbcast.lane.b32.xlu1 %v1032_v21, 264  ;;  %1034 = vbcast.lane.b32.xlu0 %v1032_v21, 256 }
  0x62   : > { %1046 = vbcast.lane.b32.xlu1 %v1032_v21, 280  ;;  %1042 = vbcast.lane.b32.xlu0 %v1032_v21, 272 }
  0x66   : > { %1057 = vbcast.lane.b32.xlu1 %v1051_v22, 264  ;;  %1053 = vbcast.lane.b32.xlu0 %v1051_v22, 256 }
  0x6a   : > { %1065 = vbcast.lane.b32.xlu1 %v1051_v22, 280  ;;  %1061 = vbcast.lane.b32.xlu0 %v1051_v22, 272  ;;  %v3850_v22 = vld [vmem:[%s5297_s5 + $0x38] sm:$0xff] }
  0x6b   : > { %v3879_v39 = vadd.f32 %v669_v12, %v3850_v22 }
  0x6d   : > { %5465 = vst [vmem:[#allocation30_spill] sm:$0xff] %v3879_v39 }
  0x6e   : > { %1076 = vbcast.lane.b32.xlu1 %v1070_v23, 264  ;;  %1072 = vbcast.lane.b32.xlu0 %v1070_v23, 256 }
  0x72   : > { %1084 = vbcast.lane.b32.xlu1 %v1070_v23, 280  ;;  %1080 = vbcast.lane.b32.xlu0 %v1070_v23, 272  ;;  %v671_v23 = vmul.f32 %v3805_v0, %v511_v7  ;;  %v514_v7 = vld [vmem:[%s3715_s21 + $0x60] sm:$0xff] }
  0x74   : > { %v3890_v48 = vadd.f32 %v671_v23, %v3863_v29  ;;  %v3922_v23 = vld [vmem:[%s5297_s5 + $0x58] sm:$0xff] }
  0x76   : > { %1095 = vbcast.lane.b32.xlu1 %v1089_v25, 264  ;;  %1091 = vbcast.lane.b32.xlu0 %v1089_v25, 256  ;;  %5467 = vst [vmem:[#allocation32_spill] sm:$0xff] %v3890_v48 }
  0x7a   : > { %1103 = vbcast.lane.b32.xlu1 %v1089_v25, 280  ;;  %1099 = vbcast.lane.b32.xlu0 %v1089_v25, 272 }
  0x7e   : > { %1114 = vbcast.lane.b32.xlu1 %v1108_v26, 264  ;;  %1110 = vbcast.lane.b32.xlu0 %v1108_v26, 256 }
  0x82   : > { %1122 = vbcast.lane.b32.xlu1 %v1108_v26, 280  ;;  %1118 = vbcast.lane.b32.xlu0 %v1108_v26, 272 }
  0x86   : > { %1133 = vbcast.lane.b32.xlu1 %v1127_v27, 264  ;;  %1129 = vbcast.lane.b32.xlu0 %v1127_v27, 256 }
  0x8a   : > { %1141 = vbcast.lane.b32.xlu1 %v1127_v27, 280  ;;  %1137 = vbcast.lane.b32.xlu0 %v1127_v27, 272 }
  0x8e   : > { %1152 = vbcast.lane.b32.xlu1 %v1146_v28, 264  ;;  %1148 = vbcast.lane.b32.xlu0 %v1146_v28, 256 }
  0x92   : > { %1160 = vbcast.lane.b32.xlu1 %v1146_v28, 280  ;;  %1156 = vbcast.lane.b32.xlu0 %v1146_v28, 272  ;;  %v3858_v28 = vadd.f32 %v668_v6, %v3828_v9  ;;  %v3909_v6 = vld [vmem:[%s5296_s4 + $0x68] sm:$0xff] }
  0x94   : > { %5464 = vst [vmem:[#allocation29_spill] sm:$0xff] %v3858_v28 }
  0x96   : > { %1171 = vbcast.lane.b32.xlu1 %v1165_v30, 264  ;;  %1167 = vbcast.lane.b32.xlu0 %v1165_v30, 256 }
  0x9a   : > { %1179 = vbcast.lane.b32.xlu1 %v1165_v30, 280  ;;  %1175 = vbcast.lane.b32.xlu0 %v1165_v30, 272  ;;  %v512_v30 = vld [vmem:[%s3715_s21 + $0x50] sm:$0xff] }
  0x9e   : > { %1190 = vbcast.lane.b32.xlu1 %v1184_v31, 264  ;;  %1186 = vbcast.lane.b32.xlu0 %v1184_v31, 256 }
  0xa2   : > { %1198 = vbcast.lane.b32.xlu1 %v1184_v31, 280  ;;  %1194 = vbcast.lane.b32.xlu0 %v1184_v31, 272  ;;  %v3869_v31 = vld [vmem:[%s5296_s4 + $0x50] sm:$0xff] }
  0xa6   : > { %1209 = vbcast.lane.b32.xlu1 %v1203_v32, 264  ;;  %1205 = vbcast.lane.b32.xlu0 %v1203_v32, 256 }
  0xa8   : > { %v3747_v43 = vpop.permute.xlu1 %947  ;;  %v940_v44 = vpop.permute.xlu0 %939 }
  0xa9   : > { %v1238_v25 = vmul.f32 %v940_v44, %v3813_v2  ;;  %v1240_v60 = vmul.f32 %v3747_v43, %v3839_v16 }
  0xaa   : > { %1217 = vbcast.lane.b32.xlu1 %v1203_v32, 280  ;;  %1213 = vbcast.lane.b32.xlu0 %v1203_v32, 272  ;;  %v1488_v32 = vrot.slane %v3836_v14, %v3680_v11 }
  0xac   : > { %v3799_v61 = vpop.permute.xlu1 %951  ;;  %v944_v62 = vpop.permute.xlu0 %943 }
  0xad   : > { %v1239_v10 = vmul.f32 %v944_v62, %v3791_v58 }
  0xae   : > { %1228 = vbcast.lane.b32.xlu1 %v1222_v52, 264  ;;  %1224 = vbcast.lane.b32.xlu0 %v1222_v52, 256 }
  0xaf   : > { %v1302_v38 = vadd.f32 %v1239_v10, %v1238_v25  ;;  %v675_v25 = vmul.f32 %v3909_v6, %v515_v54  ;;  %v3949_v54 = vld [vmem:[%s5297_s5 + $0x60] sm:$0xff] }
  0xb0   : > { %v963_v20 = vpop.permute.xlu1 %962  ;;  %v959_v21 = vpop.permute.xlu0 %958 }
  0xb1   : > { %v1243_v26 = vmul.f32 %v963_v20, %v3817_v4  ;;  %v1242_v27 = vmul.f32 %v959_v21, %v3820_v5  ;;  %v1303_v43 = vadd.f32 %v1302_v38, %v1240_v60  ;;  %v520_v4 = vld [vmem:[%s3715_s21 + $0x90] sm:$0xff] }
  0xb2   : > { %1236 = vbcast.lane.b32.xlu1 %v1222_v52, 280  ;;  %1232 = vbcast.lane.b32.xlu0 %v1222_v52, 272  ;;  %v672_v52 = vmul.f32 %v3869_v31, %v512_v30 }
  0xb3   : > { %v1311_v62 = vadd.f32 %v1243_v26, %v1242_v27  ;;  %v674_v26 = vmul.f32 %v3915_v8, %v514_v7  ;;  %v1241_v27 = vmul.f32 %v3799_v61, %v3887_v41  ;;  %v1507_v61 = vrot.slane %v3836_v14, %v3683_v13 }
  0xb4   : > { %v971_v44 = vpop.permute.xlu1 %970  ;;  %v967_v46 = vpop.permute.xlu0 %966  ;;  %v3925_v24 = vadd.f32 %v672_v52, %v3896_v51  ;;  %v3942_v52 = vld [vmem:[%s5296_s4 + $0x70] sm:$0xff] }
  0xb5   : > { %v1244_v63 = vmul.f32 %v967_v46, %v3858_v28  ;;  %v1245_v10 = vmul.f32 %v971_v44, %v3879_v39  ;;  %v3936_v46 = vld [vmem:[%s5297_s5 + $0x68] sm:$0xff]  ;;  %v1304_v60 = vadd.f32 %v1303_v43, %v1241_v27 }
  0xb6   : > { %1494 = vbcast.lane.b32.xlu1 %v1488_v32, 264  ;;  %1490 = vbcast.lane.b32.xlu0 %v1488_v32, 256  ;;  %5469 = vst [vmem:[#allocation34_spill] sm:$0xff] %v3925_v24 }
  0xb7   : > { %v1312_v12 = vadd.f32 %v1311_v62, %v1244_v63  ;;  %v3952_v62 = vadd.f32 %v673_v19, %v3922_v23  ;;  %v3966_v19 = vadd.f32 %v674_v26, %v3949_v54  ;;  %v1305_v27 = vrot.slane %v1304_v60, 4  ;;  %v3978_v26 = vld [vmem:[%s5297_s5 + $0x78] sm:$0xff] }
  0xb8   : > { %v982_v20 = vpop.permute.xlu1 %981  ;;  %v978_v21 = vpop.permute.xlu0 %977  ;;  %5474 = vst [vmem:[#allocation39_spill] sm:$0xff] %v3978_v26 }
  0xb9   : > { %v1313_v30 = vadd.f32 %v1312_v12, %v1245_v10  ;;  %v1247_v38 = vmul.f32 %v982_v20, %v3890_v48  ;;  %v1246_v44 = vmul.f32 %v978_v21, %v3904_v3  ;;  %5470 = vst [vmem:[#allocation35_spill] sm:$0xff] %v3952_v62  ;;  %v3955_v10 = vadd.f32 %v675_v25, %v3936_v46  ;;  %v517_v12 = vld [vmem:[%s3715_s21 + $0x78] sm:$0xff]  ;;  %v3971_v25 = vld [vmem:[%s5297_s5 + $0x70] sm:$0xff] }
  0xba   : > { %1502 = vbcast.lane.b32.xlu1 %v1488_v32, 280  ;;  %1498 = vbcast.lane.b32.xlu0 %v1488_v32, 272  ;;  %v3961_v32 = vld [vmem:[%s5296_s4 + $0x78] sm:$0xff]  ;;  %v676_v20 = vmul.f32 %v3942_v52, %v516_v50  ;;  %5472 = vst [vmem:[#allocation37_spill] sm:$0xff] %v3966_v19  ;;  %5473 = vst [vmem:[#allocation38_spill] sm:$0xff] %v3971_v25 }
  0xbb   : > { %5471 = vst [vmem:[#allocation36_spill] sm:$0xff] %v3955_v10  ;;  %v1314_v21 = vrot.slane %v1313_v30, 4  ;;  %v1320_v3 = vadd.f32 %v1247_v38, %v1246_v44  ;;  %v677_v50 = vmul.f32 %v3961_v32, %v517_v12  ;;  %v1306_v12 = vadd.f32 %v1305_v27, %v1304_v60  ;;  %v522_v60 = vld [vmem:[%s3715_s21 + $0xa0] sm:$0xff] }
  0xbc   : > { %v990_v63 = vpop.permute.xlu1 %989  ;;  %v986_v7 = vpop.permute.xlu0 %985  ;;  %v3981_v44 = vadd.f32 %v676_v20, %v3971_v25 }
  0xbd   : > { %v1248_v43 = vmul.f32 %v986_v7, %v3925_v24  ;;  %v1249_v48 = vmul.f32 %v990_v63, %v3952_v62  ;;  %v1315_v7 = vadd.f32 %v1314_v21, %v1313_v30  ;;  %v1526_v63 = vrot.slane %v3836_v14, %v3686_v15  ;;  %v523_v62 = vld [vmem:[%s3715_s21 + $0xa8] sm:$0xff] }
  0xbe   : > { %1513 = vbcast.lane.b32.xlu1 %v1507_v61, 264  ;;  %1509 = vbcast.lane.b32.xlu0 %v1507_v61, 256  ;;  %5475 = vst [vmem:[#allocation40_spill] sm:$0xff] %v3981_v44  ;;  %v3988_v20 = vadd.f32 %v677_v50, %v3978_v26  ;;  %v1307_v27 = vrot.slane %v1306_v12, 2  ;;  %v683_v26 = vmul.f32 %v3731_v36, %v523_v62 }
  0xbf   : > { %v1321_v41 = vadd.f32 %v1320_v3, %v1248_v43  ;;  %v682_v15 = vmul.f32 %v3736_v37, %v522_v60 }
  0xc0   : > { %v1001_v39 = vpop.permute.xlu1 %1000  ;;  %v997_v38 = vpop.permute.xlu0 %996  ;;  %5476 = vst [vmem:[#allocation41_spill] sm:$0xff] %v3988_v20 }
  0xc1   : > { %v1322_v24 = vadd.f32 %v1321_v41, %v1249_v48  ;;  %v1251_v28 = vmul.f32 %v1001_v39, %v3955_v10  ;;  %v1250_v3 = vmul.f32 %v997_v38, %v3966_v19  ;;  %v1316_v48 = vrot.slane %v1315_v7, 2  ;;  %v519_v19 = vld [vmem:[%s3715_s21 + $0x88] sm:$0xff]  ;;  %v521_v10 = vld [vmem:[%s3715_s21 + $0x98] sm:$0xff] }
  0xc2   : > { %1521 = vbcast.lane.b32.xlu1 %v1507_v61, 280  ;;  %1517 = vbcast.lane.b32.xlu0 %v1507_v61, 272  ;;  %v518_v61 = vld [vmem:[%s3715_s21 + $0x80] sm:$0xff]  ;;  %v679_v2 = vmul.f32 %v3721_v34, %v519_v19  ;;  %v680_v19 = vmul.f32 %v3745_v42, %v520_v4 }
  0xc3   : > { %v1323_v43 = vrot.slane %v1322_v24, 4  ;;  %v1329_v21 = vadd.f32 %v1251_v28, %v1250_v3  ;;  %v678_v28 = vmul.f32 %v3726_v35, %v518_v61  ;;  %v526_v61 = vld [vmem:[%s3715_s21 + $0xc0] sm:$0xff] }
  0xc4   : > { %v1009_v30 = vpop.permute.xlu1 %1008  ;;  %v1005_v41 = vpop.permute.xlu0 %1004 }
  0xc5   : > { %v1324_v39 = vadd.f32 %v1323_v43, %v1322_v24  ;;  %v1252_v38 = vmul.f32 %v1005_v41, %v3981_v44  ;;  %v1253_v50 = vmul.f32 %v1009_v30, %v3988_v20  ;;  %v681_v43 = vmul.f32 %v3788_v57, %v521_v10  ;;  %v524_v41 = vld [vmem:[%s3715_s21 + $0xb0] sm:$0xff] }
  0xc6   : > { %1532 = vbcast.lane.b32.xlu1 %v1526_v63, 264  ;;  %1528 = vbcast.lane.b32.xlu0 %v1526_v63, 256  ;;  %v1317_v44 = vadd.f32 %v1316_v48, %v1315_v7  ;;  %v1545_v30 = vrot.slane %v3836_v14, %v3689_v17  ;;  %v684_v7 = vmul.f32 %v3778_v55, %v524_v41 }
  0xc7   : > { %v1325_v16 = vrot.slane %v1324_v39, 2  ;;  %v1330_v5 = vadd.f32 %v1329_v21, %v1252_v38  ;;  %v1308_v21 = vadd.f32 %v1307_v27, %v1306_v12  ;;  %v4012_v62 = vadd.f32 %v678_v28, %v3758_v47  ;;  %v527_v12 = vld [vmem:[%s3715_s21 + $0xc8] sm:$0xff]  ;;  %v4036_v28 = vld [vmem:[%s3833_s22 + $0x4] sm:$0xf] }
  0xc8   : > { %v1020_v24 = vpop.permute.xlu1 %1019  ;;  %v1016_v3 = vpop.permute.xlu0 %1015  ;;  %v4018_v38 = vadd.f32 %v683_v26, %v3764_v49  ;;  %v4021_v14 = vadd.f32 %v682_v15, %v3772_v53  ;;  %v4026_v60 = vadd.f32 %v681_v43, %v3844_v18  ;;  %v4029_v27 = vadd.f32 %v680_v19, %v3783_v56 }
  0xc9   : > { %v1331_v58 = vadd.f32 %v1330_v5, %v1253_v50  ;;  %v1326_v25 = vadd.f32 %v1325_v16, %v1324_v39  ;;  %v4009_v5 = vadd.f32 %v679_v2, %v3752_v45  ;;  %5478 = vst [vmem:[#allocation43_spill] sm:$0xff] %v4012_v62  ;;  %v1318_v39 = vrot.slane %v1317_v44, 1 }
  0xca   : > { %1540 = vbcast.lane.b32.xlu1 %v1526_v63, 280  ;;  %1536 = vbcast.lane.b32.xlu0 %v1526_v63, 272  ;;  %v525_v63 = vld [vmem:[%s3715_s21 + $0xb8] sm:$0xff]  ;;  %5479 = vst [vmem:[#allocation44_spill] sm:$0xff] %v4018_v38  ;;  %5480 = vst [vmem:[#allocation45_spill] sm:$0xff] %v4021_v14  ;;  %v4033_v15 = vadd.f32 %v684_v7, %v3828_v9  ;;  %v1254_v43 = vmul.f32 %v1016_v3, %v4012_v62  ;;  %v528_v7 = vld [vmem:[%s3715_s21 + $0xd0] sm:$0xff] }
  0xcb   : > { %v1332_v10 = vrot.slane %v1331_v58, 4  ;;  %5477 = vst [vmem:[#allocation42_spill] sm:$0xff] %v4009_v5  ;;  %v1327_v2 = vrot.slane %v1326_v25, 1  ;;  %5481 = vst [vmem:[#allocation46_spill] sm:$0xff] %v4026_v60  ;;  %v685_v26 = vmul.f32 %v3796_v59, %v525_v63  ;;  %v1255_v41 = vmul.f32 %v1020_v24, %v4009_v5 }
  0xcc   : > { %v4014_v16 = vpop.permute.xlu1 %1027  ;;  %v1024_v48 = vpop.permute.xlu0 %1023  ;;  %5482 = vst [vmem:[#allocation47_spill] sm:$0xff] %v4029_v27  ;;  %5483 = vst [vmem:[#allocation48_spill] sm:$0xff] %v4033_v15  ;;  %v687_v19 = vmul.f32 %v3805_v0, %v527_v12  ;;  %v686_v18 = vmul.f32 %v3810_v1, %v526_v61  ;;  %v1319_v56 = vadd.f32 %v1318_v39, %v1317_v44 }
  0xcd   : > { %v1333_v4 = vadd.f32 %v1332_v10, %v1331_v58  ;;  %v1309_v58 = vrot.slane %v1308_v21, 1  ;;  %v1328_v9 = vadd.f32 %v1327_v2, %v1326_v25  ;;  %v1256_v24 = vmul.f32 %v1024_v48, %v4029_v27 }
  0xce   : > { %1551 = vbcast.lane.b32.xlu1 %v1545_v30, 264  ;;  %1547 = vbcast.lane.b32.xlu0 %v1545_v30, 256  ;;  %v1564_v3 = vrot.slane %v4036_v28, %v3680_v11  ;;  %v4049_v39 = vadd.f32 %v685_v26, %v3850_v22  ;;  %v4052_v25 = vadd.f32 %v687_v19, %v3863_v29  ;;  %v530_v19 = vld [vmem:[%s3715_s21 + $0xe0] sm:$0xff] }
  0xcf   : > { %v1334_v50 = vrot.slane %v1333_v4, 2  ;;  %v1310_v12 = vadd.f32 %v1309_v58, %v1308_v21  ;;  %v4055_v48 = vadd.f32 %v686_v18, %v3876_v33  ;;  %v688_v2 = vmul.f32 %v3869_v31, %v528_v7 }
  0xd0   : > { %v1039_v10 = vpop.permute.xlu1 %1038  ;;  %v1035_v20 = vpop.permute.xlu0 %1034  ;;  %5484 = vst [vmem:[#allocation49_spill] sm:$0xff] %v4049_v39  ;;  %5485 = vst [vmem:[#allocation50_spill] sm:$0xff] %v4052_v25 }
  0xd1   : > { %v1335_v57 = vadd.f32 %v1334_v50, %v1333_v4  ;;  %v1259_v53 = vmul.f32 %v1039_v10, %v4018_v38  ;;  %v1258_v63 = vmul.f32 %v1035_v20, %v4021_v14  ;;  %v1338_v4 = vadd.f32 %v1255_v41, %v1254_v43  ;;  %5486 = vst [vmem:[#allocation51_spill] sm:$0xff] %v4055_v48  ;;  %v531_v41 = vld [vmem:[%s3715_s21 + $0xe8] sm:$0xff] }
  0xd2   : > { %1559 = vbcast.lane.b32.xlu1 %v1545_v30, 280  ;;  %1555 = vbcast.lane.b32.xlu0 %v1545_v30, 272  ;;  %v529_v30 = vld [vmem:[%s3715_s21 + $0xd8] sm:$0xff]  ;;  %v1463_v21 = vsel %vm1462_vm0, %v1319_v56, %v1310_v12 }
  0xd3   : > { %v1336_v44 = vrot.slane %v1335_v57, 1  ;;  %v1347_v50 = vadd.f32 %v1259_v53, %v1258_v63  ;;  %v1465_v43 = vsel %vm1464_vm1, %v1328_v9, %v1463_v21  ;;  %v1339_v10 = vadd.f32 %v1338_v4, %v1256_v24 }
  0xd4   : > { %v1047_v20 = vpop.permute.xlu1 %1046  ;;  %v1043_v61 = vpop.permute.xlu0 %1042  ;;  %v689_v7 = vmul.f32 %v3884_v40, %v529_v30  ;;  %v1257_v53 = vmul.f32 %v4014_v16, %v4026_v60  ;;  %v4074_v9 = vadd.f32 %v688_v2, %v3896_v51  ;;  %v691_v63 = vmul.f32 %v3909_v6, %v531_v41 }
  0xd5   : > { %v1337_v58 = vadd.f32 %v1336_v44, %v1335_v57  ;;  %v1260_v26 = vmul.f32 %v1043_v61, %v4033_v15  ;;  %v1261_v27 = vmul.f32 %v1047_v20, %v4049_v39  ;;  %v690_v4 = vmul.f32 %v3915_v8, %v530_v19  ;;  %v532_v61 = vld [vmem:[%s3715_s21 + $0xf0] sm:$0xff] }
  0xd6   : > { %1570 = vbcast.lane.b32.xlu1 %v1564_v3, 264  ;;  %1566 = vbcast.lane.b32.xlu0 %v1564_v3, 256  ;;  %5487 = vst [vmem:[#allocation52_spill] sm:$0xff] %v4074_v9  ;;  %v1340_v20 = vadd.f32 %v1339_v10, %v1257_v53  ;;  %v1583_v16 = vrot.slane %v4036_v28, %v3683_v13 }
  0xd7   : > { %v1467_v18 = vsel %vm1466_vm2, %v1337_v58, %v1465_v43  ;;  %v1348_v14 = vadd.f32 %v1347_v50, %v1260_v26  ;;  %v4084_v30 = vadd.f32 %v689_v7, %v3922_v23  ;;  %v4092_v41 = vadd.f32 %v690_v4, %v3949_v54 }
  0xd8   : > { %1481 = vst [vmem:[%s4068_s14] sm:$0xf] %v1467_v18  ;;  %v1058_v56 = vpop.permute.xlu1 %1057  ;;  %v1054_v57 = vpop.permute.xlu0 %1053  ;;  %v1341_v43 = vrot.slane %v1340_v20, 4 }
  0xd9   : > { %v1349_v24 = vadd.f32 %v1348_v14, %v1261_v27  ;;  %v1263_v12 = vmul.f32 %v1058_v56, %v4052_v25  ;;  %v1262_v44 = vmul.f32 %v1054_v57, %v4055_v48  ;;  %5488 = vst [vmem:[#allocation53_spill] sm:$0xff] %v4084_v30  ;;  %v4087_v14 = vadd.f32 %v691_v63, %v3936_v46  ;;  %v533_v27 = vld [vmem:[%s3715_s21 + $0xf8] sm:$0xff] }
  0xda   : > { %1578 = vbcast.lane.b32.xlu1 %v1564_v3, 280  ;;  %1574 = vbcast.lane.b32.xlu0 %v1564_v3, 272  ;;  %5490 = vst [vmem:[#allocation55_spill] sm:$0xff] %v4092_v41  ;;  %v692_v3 = vmul.f32 %v3942_v52, %v532_v61  ;;  %v693_v18 = vmul.f32 %v3961_v32, %v533_v27 }
  0xdb   : > { %v1350_v2 = vrot.slane %v1349_v24, 4  ;;  %5489 = vst [vmem:[#allocation54_spill] sm:$0xff] %v4087_v14  ;;  %v1356_v50 = vadd.f32 %v1263_v12, %v1262_v44  ;;  %v5491_v44 = vld [vmem:[#allocation38_spill] sm:$0xff]  ;;  %v1342_v61 = vadd.f32 %v1341_v43, %v1340_v20 }
  0xdc   : > { %v1066_v21 = vpop.permute.xlu1 %1065  ;;  %v1062_v58 = vpop.permute.xlu0 %1061  ;;  %v4100_v4 = vadd.f32 %v692_v3, %v5491_v44  ;;  %v535_v3 = vld [vmem:[%s3715_s21 + $0x108] sm:$0xff] }
  0xdd   : > { %v1264_v26 = vmul.f32 %v1062_v58, %v4074_v9  ;;  %v1265_v10 = vmul.f32 %v1066_v21, %v4084_v30  ;;  %v1351_v7 = vadd.f32 %v1350_v2, %v1349_v24  ;;  %v5493_v21 = vld [vmem:[#allocation14_spill] sm:$0xff]  ;;  %v5494_v58 = vld [vmem:[#allocation39_spill] sm:$0xff]  ;;  %v1343_v43 = vrot.slane %v1342_v61, 2 }
  0xde   : > { %1589 = vbcast.lane.b32.xlu1 %v1583_v16, 264  ;;  %1585 = vbcast.lane.b32.xlu0 %v1583_v16, 256  ;;  %5492 = vst [vmem:[#allocation38_spill] sm:$0xff] %v4100_v4  ;;  %v1602_v24 = vrot.slane %v4036_v28, %v5493_v21  ;;  %v4105_v27 = vadd.f32 %v693_v18, %v5494_v58 }
  0xdf   : > { %v1357_v19 = vadd.f32 %v1356_v50, %v1264_v26  ;;  %v1352_v50 = vrot.slane %v1351_v7, 2  ;;  %v1344_v39 = vadd.f32 %v1343_v43, %v1342_v61  ;;  %v541_v61 = vld [vmem:[%s3715_s21 + $0x138] sm:$0xff]  ;;  %v5499_v43 = vld [vmem:[#allocation18_spill] sm:$0xff] }
  0xe0   : > { %v1077_v53 = vpop.permute.xlu1 %1076  ;;  %v1073_v56 = vpop.permute.xlu0 %1072  ;;  %5495 = vst [vmem:[#allocation14_spill] sm:$0xff] %v4105_v27 }
  0xe1   : > { %v1358_v57 = vadd.f32 %v1357_v19, %v1265_v10  ;;  %v1267_v63 = vmul.f32 %v1077_v53, %v4087_v14  ;;  %v1266_v12 = vmul.f32 %v1073_v56, %v4092_v41  ;;  %v539_v56 = vld [vmem:[%s3715_s21 + $0x128] sm:$0xff]  ;;  %v538_v41 = vld [vmem:[%s3715_s21 + $0x120] sm:$0xff]  ;;  %v1353_v9 = vadd.f32 %v1352_v50, %v1351_v7 }
  0xe2   : > { %1597 = vbcast.lane.b32.xlu1 %v1583_v16, 280  ;;  %1593 = vbcast.lane.b32.xlu0 %v1583_v16, 272  ;;  %v534_v16 = vld [vmem:[%s3715_s21 + $0x100] sm:$0xff]  ;;  %v699_v25 = vmul.f32 %v3731_v36, %v539_v56  ;;  %v698_v60 = vmul.f32 %v3736_v37, %v538_v41  ;;  %v1621_v7 = vrot.slane %v4036_v28, %v3689_v17  ;;  %v543_v56 = vld [vmem:[%s3715_s21 + $0x148] sm:$0xff] }
  0xe3   : > { %v1359_v2 = vrot.slane %v1358_v57, 4  ;;  %v1365_v53 = vadd.f32 %v1267_v63, %v1266_v12  ;;  %v694_v48 = vmul.f32 %v3726_v35, %v534_v16 }
  0xe4   : > { %v1085_v26 = vpop.permute.xlu1 %1084  ;;  %v1081_v10 = vpop.permute.xlu0 %1080  ;;  %v4134_v28 = vadd.f32 %v699_v25, %v3764_v49  ;;  %v4137_v16 = vadd.f32 %v698_v60, %v5499_v43  ;;  %v5504_v25 = vld [vmem:[#allocation26_spill] sm:$0xff]  ;;  %v4150_v60 = vld [vmem:[%s3833_s22 + $0x8] sm:$0xf] }
  0xe5   : > { %v1360_v19 = vadd.f32 %v1359_v2, %v1358_v57  ;;  %v1268_v20 = vmul.f32 %v1081_v10, %v4100_v4  ;;  %v1269_v18 = vmul.f32 %v1085_v26, %v4105_v27  ;;  %v695_v57 = vmul.f32 %v3721_v34, %v535_v3  ;;  %v536_v2 = vld [vmem:[%s3715_s21 + $0x110] sm:$0xff]  ;;  %v537_v26 = vld [vmem:[%s3715_s21 + $0x118] sm:$0xff] }
  0xe6   : > { %1608 = vbcast.lane.b32.xlu1 %v1602_v24, 264  ;;  %1604 = vbcast.lane.b32.xlu0 %v1602_v24, 256  ;;  %v540_v10 = vld [vmem:[%s3715_s21 + $0x130] sm:$0xff]  ;;  %5498 = vst [vmem:[#allocation57_spill] sm:$0xff] %v4134_v28  ;;  %5500 = vst [vmem:[#allocation58_spill] sm:$0xff] %v4137_v16 }
  0xe7   : > { %v1361_v14 = vrot.slane %v1360_v19, 2  ;;  %v1366_v30 = vadd.f32 %v1365_v53, %v1268_v20  ;;  %v700_v53 = vmul.f32 %v3778_v55, %v540_v10  ;;  %v1354_v20 = vrot.slane %v1353_v9, 1  ;;  %v5501_v10 = vld [vmem:[#allocation20_spill] sm:$0xff] }
  0xe8   : > { %v1096_v63 = vpop.permute.xlu1 %1095  ;;  %v1092_v12 = vpop.permute.xlu0 %1091  ;;  %v4125_v3 = vadd.f32 %v695_v57, %v3752_v45  ;;  %v697_v27 = vmul.f32 %v5501_v10, %v537_v26  ;;  %v703_v26 = vmul.f32 %v3805_v0, %v543_v56 }
  0xe9   : > { %v1367_v4 = vadd.f32 %v1366_v30, %v1269_v18  ;;  %v1362_v15 = vadd.f32 %v1361_v14, %v1360_v19  ;;  %v696_v30 = vmul.f32 %v3745_v42, %v536_v2  ;;  %v4131_v19 = vadd.f32 %v694_v48, %v3758_v47  ;;  %v542_v18 = vld [vmem:[%s3715_s21 + $0x140] sm:$0xff] }
  0xea   : > { %1616 = vbcast.lane.b32.xlu1 %v1602_v24, 280  ;;  %1612 = vbcast.lane.b32.xlu0 %v1602_v24, 272  ;;  %5496 = vst [vmem:[#allocation39_spill] sm:$0xff] %v4125_v3  ;;  %v1345_v2 = vrot.slane %v1344_v39, 1  ;;  %v701_v48 = vmul.f32 %v3796_v59, %v541_v61  ;;  %v4147_v62 = vadd.f32 %v700_v53, %v5504_v25  ;;  %v544_v25 = vld [vmem:[%s3715_s21 + $0x150] sm:$0xff] }
  0xeb   : > { %v1368_v50 = vrot.slane %v1367_v4, 4  ;;  %5497 = vst [vmem:[#allocation56_spill] sm:$0xff] %v4131_v19  ;;  %v1363_v57 = vrot.slane %v1362_v15, 1  ;;  %v1355_v5 = vadd.f32 %v1354_v20, %v1353_v9  ;;  %v1271_v43 = vmul.f32 %v1096_v63, %v4125_v3  ;;  %v5506_v20 = vld [vmem:[#allocation28_spill] sm:$0xff] }
  0xec   : > { %v4127_v41 = vpop.permute.xlu1 %1103  ;;  %v1100_v14 = vpop.permute.xlu0 %1099  ;;  %5505 = vst [vmem:[#allocation60_spill] sm:$0xff] %v4147_v62  ;;  %v702_v10 = vmul.f32 %v3810_v1, %v542_v18  ;;  %v1346_v59 = vadd.f32 %v1345_v2, %v1344_v39  ;;  %v1640_v9 = vrot.slane %v4150_v60, %v3680_v11  ;;  %v4162_v56 = vadd.f32 %v697_v27, %v5506_v20 }
  0xed   : > { %v1369_v24 = vadd.f32 %v1368_v50, %v1367_v4  ;;  %v5502_v4 = vld [vmem:[#allocation19_spill] sm:$0xff]  ;;  %v704_v27 = vmul.f32 %v3869_v31, %v544_v25 }
  0xee   : > { %1627 = vbcast.lane.b32.xlu1 %v1621_v7, 264  ;;  %1623 = vbcast.lane.b32.xlu0 %v1621_v7, 256  ;;  %v4143_v50 = vadd.f32 %v696_v30, %v5502_v4  ;;  %v1270_v30 = vmul.f32 %v1092_v12, %v4131_v19  ;;  %v1364_v4 = vadd.f32 %v1363_v57, %v1362_v15 }
  0xef   : > { %v1370_v38 = vrot.slane %v1369_v24, 2  ;;  %5507 = vst [vmem:[#allocation28_spill] sm:$0xff] %v4162_v56  ;;  %v1468_v39 = vsel %vm1462_vm0, %v1355_v5, %v1346_v59 }
  0xf0   : > { %5503 = vst [vmem:[#allocation59_spill] sm:$0xff] %v4143_v50  ;;  %v1115_v49 = vpop.permute.xlu1 %1114  ;;  %v1111_v47 = vpop.permute.xlu0 %1110  ;;  %v1374_v2 = vadd.f32 %v1271_v43, %v1270_v30  ;;  %v1469_v59 = vsel %vm1464_vm1, %v1364_v4, %v1468_v39  ;;  %v4186_v30 = vadd.f32 %v704_v27, %v3896_v51  ;;  %v548_v39 = vld [vmem:[%s3715_s21 + $0x170] sm:$0xff] }
  0xf1   : > { %v1371_v45 = vadd.f32 %v1370_v38, %v1369_v24  ;;  %v1275_v61 = vmul.f32 %v1115_v49, %v4134_v28  ;;  %v1274_v53 = vmul.f32 %v1111_v47, %v4137_v16  ;;  %v1272_v38 = vmul.f32 %v1100_v14, %v4143_v50  ;;  %v545_v47 = vld [vmem:[%s3715_s21 + $0x158] sm:$0xff]  ;;  %v546_v50 = vld [vmem:[%s3715_s21 + $0x160] sm:$0xff] }
  0xf2   : > { %1635 = vbcast.lane.b32.xlu1 %v1621_v7, 280  ;;  %1631 = vbcast.lane.b32.xlu0 %v1621_v7, 272  ;;  %v4166_v49 = vadd.f32 %v701_v48, %v3850_v22  ;;  %v4171_v7 = vadd.f32 %v703_v26, %v3863_v29  ;;  %v4174_v24 = vadd.f32 %v702_v10, %v3876_v33  ;;  %v547_v48 = vld [vmem:[%s3715_s21 + $0x168] sm:$0xff] }
  0xf3   : > { %v1372_v63 = vrot.slane %v1371_v45, 1  ;;  %v1383_v14 = vadd.f32 %v1275_v61, %v1274_v53  ;;  %v705_v5 = vmul.f32 %v3884_v40, %v545_v47  ;;  %v1375_v26 = vadd.f32 %v1374_v2, %v1272_v38  ;;  %5511 = vst [vmem:[#allocation64_spill] sm:$0xff] %v4186_v30 }
  0xf4   : > { %5508 = vst [vmem:[#allocation61_spill] sm:$0xff] %v4166_v49  ;;  %v1123_v15 = vpop.permute.xlu1 %1122  ;;  %v1119_v12 = vpop.permute.xlu0 %1118  ;;  %5509 = vst [vmem:[#allocation62_spill] sm:$0xff] %v4171_v7  ;;  %v707_v4 = vmul.f32 %v3909_v6, %v547_v48  ;;  %v706_v61 = vmul.f32 %v3915_v8, %v546_v50  ;;  %v1273_v53 = vmul.f32 %v4127_v41, %v4162_v56  ;;  %v549_v41 = vld [vmem:[%s3715_s21 + $0x178] sm:$0xff] }
  0xf5   : > { %5510 = vst [vmem:[#allocation63_spill] sm:$0xff] %v4174_v24  ;;  %v1373_v18 = vadd.f32 %v1372_v63, %v1371_v45  ;;  %v1276_v57 = vmul.f32 %v1119_v12, %v4147_v62  ;;  %v1277_v16 = vmul.f32 %v1123_v15, %v4166_v49  ;;  %v1659_v15 = vrot.slane %v4150_v60, %v3683_v13  ;;  %v584_v62 = vld [vmem:[%s4334_s20 + $0x90] sm:$0xff] }
  0xf6   : > { %1646 = vbcast.lane.b32.xlu1 %v1640_v9, 264  ;;  %1642 = vbcast.lane.b32.xlu0 %v1640_v9, 256  ;;  %v1376_v12 = vadd.f32 %v1375_v26, %v1273_v53  ;;  %v4198_v27 = vadd.f32 %v705_v5, %v3922_v23  ;;  %v4201_v2 = vadd.f32 %v707_v4, %v3936_v46 }
  0xf7   : > { %v1470_v10 = vsel %vm1466_vm2, %v1373_v18, %v1469_v59  ;;  %v1384_v25 = vadd.f32 %v1383_v14, %v1276_v57  ;;  %v709_v26 = vmul.f32 %v3961_v32, %v549_v41 }
  0xf8   : > { %1482 = vst [vmem:[%s4068_s14 + $0x4] sm:$0xf] %v1470_v10  ;;  %v1134_v45 = vpop.permute.xlu1 %1133  ;;  %v1130_v43 = vpop.permute.xlu0 %1129  ;;  %5512 = vst [vmem:[#allocation65_spill] sm:$0xff] %v4198_v27  ;;  %v1377_v59 = vrot.slane %v1376_v12, 4 }
  0xf9   : > { %v1385_v63 = vadd.f32 %v1384_v25, %v1277_v16  ;;  %v1279_v38 = vmul.f32 %v1134_v45, %v4171_v7  ;;  %v1278_v47 = vmul.f32 %v1130_v43, %v4174_v24  ;;  %5513 = vst [vmem:[#allocation66_spill] sm:$0xff] %v4201_v2  ;;  %v708_v16 = vmul.f32 %v3942_v52, %v548_v39 }
  0xfa   : > { %1654 = vbcast.lane.b32.xlu1 %v1640_v9, 280  ;;  %1650 = vbcast.lane.b32.xlu0 %v1640_v9, 272  ;;  %v4207_v9 = vadd.f32 %v706_v61, %v3949_v54  ;;  %v1378_v39 = vadd.f32 %v1377_v59, %v1376_v12 }
  0xfb   : > { %v1386_v14 = vrot.slane %v1385_v63, 4  ;;  %v1392_v57 = vadd.f32 %v1279_v38, %v1278_v47  ;;  %v4212_v43 = vadd.f32 %v708_v16, %v5491_v44  ;;  %v1678_v47 = vrot.slane %v4150_v60, %v5493_v21 }
  0xfc   : > { %v1142_v18 = vpop.permute.xlu1 %1141  ;;  %v1138_v50 = vpop.permute.xlu0 %1137  ;;  %5514 = vst [vmem:[#allocation67_spill] sm:$0xff] %v4207_v9  ;;  %v1379_v12 = vrot.slane %v1378_v39, 2 }
  0xfd   : > { %v1280_v48 = vmul.f32 %v1138_v50, %v4186_v30  ;;  %v1281_v5 = vmul.f32 %v1142_v18, %v4198_v27  ;;  %5515 = vst [vmem:[#allocation68_spill] sm:$0xff] %v4212_v43  ;;  %v1387_v4 = vadd.f32 %v1386_v14, %v1385_v63  ;;  %v4219_v50 = vadd.f32 %v709_v26, %v5494_v58 }
  0xfe   : > { %1665 = vbcast.lane.b32.xlu1 %v1659_v15, 264  ;;  %1661 = vbcast.lane.b32.xlu0 %v1659_v15, 256 }
  0xff   : > { %v1393_v10 = vadd.f32 %v1392_v57, %v1280_v48  ;;  %5516 = vst [vmem:[#allocation69_spill] sm:$0xff] %v4219_v50  ;;  %v1388_v16 = vrot.slane %v1387_v4, 2 }
 0x100   : > { %v1153_v25 = vpop.permute.xlu1 %1152  ;;  %v1149_v45 = vpop.permute.xlu0 %1148 }
 0x101   : > { %v1394_v53 = vadd.f32 %v1393_v10, %v1281_v5  ;;  %v1283_v61 = vmul.f32 %v1153_v25, %v4201_v2  ;;  %v1282_v38 = vmul.f32 %v1149_v45, %v4207_v9  ;;  %v551_v5 = vld [vmem:[%s3715_s21 + $0x188] sm:$0xff]  ;;  %v554_v25 = vld [vmem:[%s3715_s21 + $0x1a0] sm:$0xff]  ;;  %v552_v9 = vld [vmem:[%s3715_s21 + $0x190] sm:$0xff] }
 0x102   : > { %1673 = vbcast.lane.b32.xlu1 %v1659_v15, 280  ;;  %1669 = vbcast.lane.b32.xlu0 %v1659_v15, 272  ;;  %v550_v15 = vld [vmem:[%s3715_s21 + $0x180] sm:$0xff]  ;;  %v555_v10 = vld [vmem:[%s3715_s21 + $0x1a8] sm:$0xff]  ;;  %v711_v2 = vmul.f32 %v3721_v34, %v551_v5  ;;  %v714_v30 = vmul.f32 %v3736_v37, %v554_v25  ;;  %v1697_v34 = vrot.slane %v4150_v60, %v3689_v17 }
 0x103   : > { %v1395_v18 = vrot.slane %v1394_v53, 4  ;;  %v1401_v57 = vadd.f32 %v1283_v61, %v1282_v38  ;;  %v710_v61 = vmul.f32 %v3726_v35, %v550_v15  ;;  %v715_v27 = vmul.f32 %v3731_v36, %v555_v10  ;;  %v5519_v36 = vld [vmem:[#allocation16_spill] sm:$0xff]  ;;  %v557_v15 = vld [vmem:[%s3715_s21 + $0x1b8] sm:$0xff]  ;;  %v5523_v60 = vld [vmem:[#allocation18_spill] sm:$0xff] }
 0x104   : > { %v1161_v63 = vpop.permute.xlu1 %1160  ;;  %v1157_v41 = vpop.permute.xlu0 %1156  ;;  %v1380_v35 = vadd.f32 %v1379_v12, %v1378_v39  ;;  %v5521_v10 = vld [vmem:[#allocation17_spill] sm:$0xff]  ;;  %v4249_v39 = vadd.f32 %v714_v30, %v5523_v60  ;;  %v559_v12 = vld [vmem:[%s3715_s21 + $0x1c8] sm:$0xff] }
 0x105   : > { %v1396_v14 = vadd.f32 %v1395_v18, %v1394_v53  ;;  %v1284_v48 = vmul.f32 %v1157_v41, %v4212_v43  ;;  %v1285_v26 = vmul.f32 %v1161_v63, %v4219_v50  ;;  %v556_v18 = vld [vmem:[%s3715_s21 + $0x1b0] sm:$0xff]  ;;  %v1389_v41 = vadd.f32 %v1388_v16, %v1387_v4  ;;  %v5517_v16 = vld [vmem:[#allocation15_spill] sm:$0xff] }
 0x106   : > { %1684 = vbcast.lane.b32.xlu1 %v1678_v47, 264  ;;  %1680 = vbcast.lane.b32.xlu0 %v1678_v47, 256  ;;  %v712_v63 = vmul.f32 %v3745_v42, %v552_v9  ;;  %v716_v4 = vmul.f32 %v3778_v55, %v556_v18  ;;  %v4239_v5 = vadd.f32 %v711_v2, %v5517_v16  ;;  %v558_v55 = vld [vmem:[%s3715_s21 + $0x1c0] sm:$0xff]  ;;  %v5525_v2 = vld [vmem:[#allocation20_spill] sm:$0xff]  ;;  %v1381_v18 = vrot.slane %v1380_v35, 1 }
 0x107   : > { %v1397_v59 = vrot.slane %v1396_v14, 2  ;;  %v1402_v45 = vadd.f32 %v1401_v57, %v1284_v48  ;;  %v553_v48 = vld [vmem:[%s3715_s21 + $0x198] sm:$0xff]  ;;  %v4242_v37 = vadd.f32 %v710_v61, %v5519_v36  ;;  %v1390_v42 = vrot.slane %v1389_v41, 1  ;;  %5524 = vst [vmem:[#allocation18_spill] sm:$0xff] %v4249_v39  ;;  %v4262_v30 = vld [vmem:[%s3833_s22 + $0xc] sm:$0xf] }
 0x108   : > { %v1172_v53 = vpop.permute.xlu1 %1171  ;;  %v1168_v38 = vpop.permute.xlu0 %1167  ;;  %5518 = vst [vmem:[#allocation15_spill] sm:$0xff] %v4239_v5  ;;  %v4246_v25 = vadd.f32 %v715_v27, %v5521_v10  ;;  %v5529_v27 = vld [vmem:[#allocation26_spill] sm:$0xff] }
 0x109   : > { %v1403_v43 = vadd.f32 %v1402_v45, %v1285_v26  ;;  %v1398_v24 = vadd.f32 %v1397_v59, %v1396_v14  ;;  %5520 = vst [vmem:[#allocation16_spill] sm:$0xff] %v4242_v37  ;;  %v713_v26 = vmul.f32 %v5525_v2, %v553_v48  ;;  %v5526_v45 = vld [vmem:[#allocation19_spill] sm:$0xff]  ;;  %v4259_v36 = vadd.f32 %v716_v4, %v5529_v27  ;;  %v560_v4 = vld [vmem:[%s3715_s21 + $0x1d0] sm:$0xff] }
 0x10a   : > { %1692 = vbcast.lane.b32.xlu1 %v1678_v47, 280  ;;  %1688 = vbcast.lane.b32.xlu0 %v1678_v47, 272  ;;  %5522 = vst [vmem:[#allocation17_spill] sm:$0xff] %v4246_v25  ;;  %v4255_v61 = vadd.f32 %v712_v63, %v5526_v45  ;;  %v1287_v10 = vmul.f32 %v1172_v53, %v4239_v5 }
 0x10b   : > { %v1404_v57 = vrot.slane %v1403_v43, 4  ;;  %v1399_v59 = vrot.slane %v1398_v24, 1  ;;  %5530 = vst [vmem:[#allocation19_spill] sm:$0xff] %v4259_v36  ;;  %v1286_v60 = vmul.f32 %v1168_v38, %v4242_v37  ;;  %v719_v63 = vmul.f32 %v3805_v0, %v559_v12  ;;  %v561_v12 = vld [vmem:[%s3715_s21 + $0x1d8] sm:$0xff] }
 0x10c   : > { %v1180_v14 = vpop.permute.xlu1 %1179  ;;  %v1176_v47 = vpop.permute.xlu0 %1175  ;;  %5527 = vst [vmem:[#allocation20_spill] sm:$0xff] %v4255_v61  ;;  %v718_v45 = vmul.f32 %v3810_v1, %v558_v55  ;;  %v1391_v50 = vadd.f32 %v1390_v42, %v1389_v41  ;;  %v1716_v53 = vrot.slane %v4262_v30, %v3680_v11  ;;  %v1382_v0 = vadd.f32 %v1381_v18, %v1380_v35 }
 0x10d   : > { %v1405_v9 = vadd.f32 %v1404_v57, %v1403_v43  ;;  %v5528_v43 = vld [vmem:[#allocation22_spill] sm:$0xff]  ;;  %v1288_v27 = vmul.f32 %v1176_v47, %v4255_v61  ;;  %v4275_v1 = vadd.f32 %v713_v26, %v5506_v20  ;;  %v1410_v42 = vadd.f32 %v1287_v10, %v1286_v60  ;;  %v563_v26 = vld [vmem:[%s3715_s21 + $0x1e8] sm:$0xff] }
 0x10e   : > { %1703 = vbcast.lane.b32.xlu1 %v1697_v34, 264  ;;  %1699 = vbcast.lane.b32.xlu0 %v1697_v34, 256  ;;  %v717_v57 = vmul.f32 %v5528_v43, %v557_v15  ;;  %v1400_v43 = vadd.f32 %v1399_v59, %v1398_v24  ;;  %v4281_v47 = vadd.f32 %v719_v63, %v3863_v29  ;;  %v562_v29 = vld [vmem:[%s3715_s21 + $0x1e0] sm:$0xff] }
 0x10f   : > { %v1406_v16 = vrot.slane %v1405_v9, 2  ;;  %5531 = vst [vmem:[#allocation22_spill] sm:$0xff] %v4275_v1  ;;  %v720_v35 = vmul.f32 %v3869_v31, %v560_v4  ;;  %v1471_v20 = vsel %vm1462_vm0, %v1391_v50, %v1382_v0  ;;  %v721_v31 = vmul.f32 %v3884_v40, %v561_v12 }
 0x110   : > { %v1191_v48 = vpop.permute.xlu1 %1190  ;;  %v1187_v2 = vpop.permute.xlu0 %1186  ;;  %v4278_v41 = vadd.f32 %v717_v57, %v3850_v22  ;;  %5533 = vst [vmem:[#allocation70_spill] sm:$0xff] %v4281_v47  ;;  %v1472_v18 = vsel %vm1464_vm1, %v1400_v43, %v1471_v20  ;;  %v1735_v40 = vrot.slane %v4262_v30, %v3683_v13 }
 0x111   : > { %v1407_v7 = vadd.f32 %v1406_v16, %v1405_v9  ;;  %v1291_v56 = vmul.f32 %v1191_v48, %v4246_v25  ;;  %v1290_v15 = vmul.f32 %v1187_v2, %v4249_v39  ;;  %v1411_v16 = vadd.f32 %v1410_v42, %v1288_v27 }
 0x112   : > { %1711 = vbcast.lane.b32.xlu1 %v1697_v34, 280  ;;  %1707 = vbcast.lane.b32.xlu0 %v1697_v34, 272  ;;  %5532 = vst [vmem:[#allocation26_spill] sm:$0xff] %v4278_v41  ;;  %v4284_v34 = vadd.f32 %v718_v45, %v3876_v33  ;;  %v4299_v60 = vadd.f32 %v720_v35, %v3896_v51 }
 0x113   : > { %v1408_v38 = vrot.slane %v1407_v7, 1  ;;  %v1419_v59 = vadd.f32 %v1291_v56, %v1290_v15  ;;  %v1289_v56 = vmul.f32 %v1180_v14, %v4275_v1  ;;  %v723_v48 = vmul.f32 %v3909_v6, %v563_v26  ;;  %v564_v14 = vld [vmem:[%s3715_s21 + $0x1f0] sm:$0xff] }
 0x114   : > { %v1199_v9 = vpop.permute.xlu1 %1198  ;;  %v1195_v24 = vpop.permute.xlu0 %1194  ;;  %5534 = vst [vmem:[#allocation71_spill] sm:$0xff] %v4284_v34  ;;  %5535 = vst [vmem:[#allocation72_spill] sm:$0xff] %v4299_v60  ;;  %v722_v15 = vmul.f32 %v3915_v8, %v562_v29  ;;  %v4309_v51 = vadd.f32 %v721_v31, %v3922_v23 }
 0x115   : > { %v1409_v55 = vadd.f32 %v1408_v38, %v1407_v7  ;;  %v1292_v22 = vmul.f32 %v1195_v24, %v4259_v36  ;;  %v1293_v57 = vmul.f32 %v1199_v9, %v4278_v41  ;;  %v1412_v4 = vadd.f32 %v1411_v16, %v1289_v56  ;;  %v565_v38 = vld [vmem:[%s3715_s21 + $0x1f8] sm:$0xff]  ;;  %v567_v56 = vld [vmem:[%s4334_s20 + $0x8] sm:$0xff] }
 0x116   : > { %1722 = vbcast.lane.b32.xlu1 %v1716_v53, 264  ;;  %1718 = vbcast.lane.b32.xlu0 %v1716_v53, 256  ;;  %5536 = vst [vmem:[#allocation73_spill] sm:$0xff] %v4309_v51  ;;  %v4312_v0 = vadd.f32 %v723_v48, %v3936_v46  ;;  %v4317_v9 = vadd.f32 %v722_v15, %v3949_v54  ;;  %v571_v48 = vld [vmem:[%s4334_s20 + $0x28] sm:$0xff] }
 0x117   : > { %v1473_v33 = vsel %vm1466_vm2, %v1409_v55, %v1472_v18  ;;  %v1420_v10 = vadd.f32 %v1419_v59, %v1292_v22  ;;  %v1413_v24 = vrot.slane %v1412_v4, 4  ;;  %v725_v35 = vmul.f32 %v3961_v32, %v565_v38 }
 0x118   : > { %1483 = vst [vmem:[%s4068_s14 + $0x8] sm:$0xf] %v1473_v33  ;;  %v1210_v7 = vpop.permute.xlu1 %1209  ;;  %v1206_v50 = vpop.permute.xlu0 %1205  ;;  %5537 = vst [vmem:[#allocation74_spill] sm:$0xff] %v4312_v0  ;;  %v1754_v18 = vrot.slane %v4262_v30, %v5493_v21 }
 0x119   : > { %v1421_v2 = vadd.f32 %v1420_v10, %v1293_v57  ;;  %v1295_v63 = vmul.f32 %v1210_v7, %v4281_v47  ;;  %v1294_v45 = vmul.f32 %v1206_v50, %v4284_v34  ;;  %5538 = vst [vmem:[#allocation75_spill] sm:$0xff] %v4317_v9  ;;  %v566_v50 = vld [vmem:[%s4334_s20] sm:$0xff] }
 0x11a   : > { %1730 = vbcast.lane.b32.xlu1 %v1716_v53, 280  ;;  %1726 = vbcast.lane.b32.xlu0 %v1716_v53, 272  ;;  %v724_v53 = vmul.f32 %v3942_v52, %v564_v14  ;;  %v1414_v52 = vadd.f32 %v1413_v24, %v1412_v4  ;;  %v4348_v4 = vld [vmem:[%s5296_s4 + $0x8] sm:$0xff]  ;;  %v4464_v34 = vld [vmem:[%s5296_s4 + $0x40] sm:$0xff] }
 0x11b   : > { %v1422_v43 = vrot.slane %v1421_v2, 4  ;;  %v1428_v42 = vadd.f32 %v1295_v63, %v1294_v45 }
 0x11c   : > { %v1218_v27 = vpop.permute.xlu1 %1217  ;;  %v1214_v6 = vpop.permute.xlu0 %1213  ;;  %v4325_v26 = vadd.f32 %v724_v53, %v5491_v44  ;;  %v4337_v44 = vadd.f32 %v725_v35, %v5494_v58  ;;  %v1415_v7 = vrot.slane %v1414_v52, 2  ;;  %v4362_v53 = vld [vmem:[%s5296_s4 + $0x28] sm:$0xff] }
 0x11d   : > { %v1296_v8 = vmul.f32 %v1214_v6, %v4299_v60  ;;  %v1297_v23 = vmul.f32 %v1218_v27, %v4309_v51  ;;  %v1423_v46 = vadd.f32 %v1422_v43, %v1421_v2  ;;  %v570_v2 = vld [vmem:[%s4334_s20 + $0x20] sm:$0xff]  ;;  %v568_v27 = vld [vmem:[%s4334_s20 + $0x10] sm:$0xff]  ;;  %v795_v24 = vmul.f32 %v4362_v53, %v571_v48 }
 0x11e   : > { %1741 = vbcast.lane.b32.xlu1 %v1735_v40, 264  ;;  %1737 = vbcast.lane.b32.xlu0 %v1735_v40, 256  ;;  %5539 = vst [vmem:[#allocation76_spill] sm:$0xff] %v4325_v26  ;;  %5540 = vst [vmem:[#allocation77_spill] sm:$0xff] %v4337_v44  ;;  %v572_v6 = vld [vmem:[%s4334_s20 + $0x30] sm:$0xff]  ;;  %v1416_v35 = vadd.f32 %v1415_v7, %v1414_v52  ;;  %v4408_v7 = vld [vmem:[%s5297_s5 + $0x28] sm:$0xff] }
 0x11f   : > { %v1429_v12 = vadd.f32 %v1428_v42, %v1296_v8  ;;  %v1424_v16 = vrot.slane %v1423_v46, 2  ;;  %v4356_v42 = vld [vmem:[%s5296_s4] sm:$0xff]  ;;  %v4383_v52 = vld [vmem:[%s5296_s4 + $0x30] sm:$0xff]  ;;  %5546 = vst [vmem:[#allocation83_spill] sm:$0xff] %v4408_v7 }
 0x120   : > { %v1229_v20 = vpop.permute.xlu1 %1228  ;;  %v1225_v55 = vpop.permute.xlu0 %1224  ;;  %v790_v8 = vmul.f32 %v4356_v42, %v566_v50  ;;  %5541 = vst [vmem:[#allocation78_spill] sm:$0xff] %v4383_v52  ;;  %v4411_v50 = vadd.f32 %v4408_v7, %v795_v24  ;;  %v4416_v48 = vld [vmem:[%s5297_s5 + $0x20] sm:$0xff] }
 0x121   : > { %v1430_v59 = vadd.f32 %v1429_v12, %v1297_v23  ;;  %v1299_v22 = vmul.f32 %v1229_v20, %v4312_v0  ;;  %v1298_v54 = vmul.f32 %v1225_v55, %v4317_v9  ;;  %v1425_v15 = vadd.f32 %v1424_v16, %v1423_v46  ;;  %v4368_v23 = vld [vmem:[%s5296_s4 + $0x20] sm:$0xff]  ;;  %5548 = vst [vmem:[#allocation85_spill] sm:$0xff] %v4416_v48 }
 0x122   : > { %1749 = vbcast.lane.b32.xlu1 %v1735_v40, 280  ;;  %1745 = vbcast.lane.b32.xlu0 %v1735_v40, 272  ;;  %v791_v40 = vmul.f32 %v4348_v4, %v567_v56  ;;  %v794_v12 = vmul.f32 %v4368_v23, %v570_v2  ;;  %v1773_v20 = vrot.slane %v4262_v30, %v3689_v17  ;;  %v4389_v30 = vld [vmem:[%s5297_s5 + $0x8] sm:$0xff] }
 0x123   : > { %v1431_v32 = vrot.slane %v1430_v59, 4  ;;  %v1437_v10 = vadd.f32 %v1299_v22, %v1298_v54  ;;  %v4377_v22 = vld [vmem:[%s5296_s4 + $0x10] sm:$0xff]  ;;  %5542 = vst [vmem:[#allocation79_spill] sm:$0xff] %v4389_v30  ;;  %5547 = vst [vmem:[#allocation84_spill] sm:$0xff] %v4411_v50 }
 0x124   : > { %v1237_v29 = vpop.permute.xlu1 %1236  ;;  %v1233_v33 = vpop.permute.xlu0 %1232  ;;  %v792_v54 = vmul.f32 %v4377_v22, %v568_v27  ;;  %v4392_v16 = vadd.f32 %v4389_v30, %v791_v40  ;;  %v4419_v2 = vadd.f32 %v4416_v48, %v794_v12  ;;  %v4426_v27 = vld [vmem:[%s5296_s4 + $0x18] sm:$0xff] }
 0x125   : > { %v1432_v57 = vadd.f32 %v1431_v32, %v1430_v59  ;;  %v1300_v31 = vmul.f32 %v1233_v33, %v4325_v26  ;;  %v1301_v58 = vmul.f32 %v1237_v29, %v4337_v44  ;;  %v569_v59 = vld [vmem:[%s4334_s20 + $0x18] sm:$0xff]  ;;  %v1426_v32 = vrot.slane %v1425_v15, 1  ;;  %5550 = vst [vmem:[#allocation87_spill] sm:$0xff] %v4426_v27  ;;  %v4452_v26 = vld [vmem:[%s3677_s16 + $0x10] sm:$0xf] }
 0x126   : > { %1760 = vbcast.lane.b32.xlu1 %v1754_v18, 264  ;;  %1756 = vbcast.lane.b32.xlu0 %v1754_v18, 256  ;;  %5543 = vst [vmem:[#allocation80_spill] sm:$0xff] %v4392_v16  ;;  %5549 = vst [vmem:[#allocation86_spill] sm:$0xff] %v4419_v2  ;;  %v4440_v12 = vld [vmem:[%s5296_s4 + $0x38] sm:$0xff] }
 0x127   : > { %v1433_v63 = vrot.slane %v1432_v57, 2  ;;  %v1438_v45 = vadd.f32 %v1437_v10, %v1300_v31  ;;  %v4400_v31 = vld [vmem:[%s5297_s5] sm:$0xff]  ;;  %5553 = vst [vmem:[#allocation90_spill] sm:$0xff] %v4440_v12 }
 0x128   : > { %v1495_v14 = vpop.permute.xlu1 %1494  ;;  %v1491_v43 = vpop.permute.xlu0 %1490  ;;  %5544 = vst [vmem:[#allocation81_spill] sm:$0xff] %v4400_v31  ;;  %v4403_v56 = vadd.f32 %v4400_v31, %v790_v8  ;;  %v4432_v8 = vld [vmem:[%s5297_s5 + $0x10] sm:$0xff] }
 0x129   : > { %v1439_v38 = vadd.f32 %v1438_v45, %v1301_v58  ;;  %v1434_v46 = vadd.f32 %v1433_v63, %v1432_v57  ;;  %v573_v57 = vld [vmem:[%s4334_s20 + $0x38] sm:$0xff]  ;;  %v575_v63 = vld [vmem:[%s4334_s20 + $0x48] sm:$0xff]  ;;  %v574_v58 = vld [vmem:[%s4334_s20 + $0x40] sm:$0xff]  ;;  %v1417_v45 = vrot.slane %v1416_v35, 1  ;;  %5551 = vst [vmem:[#allocation88_spill] sm:$0xff] %v4432_v8  ;;  %v4435_v24 = vadd.f32 %v4432_v8, %v792_v54 }
 0x12a   : > { %1768 = vbcast.lane.b32.xlu1 %v1754_v18, 280  ;;  %1764 = vbcast.lane.b32.xlu0 %v1754_v18, 272  ;;  %v796_v18 = vmul.f32 %v4383_v52, %v572_v6  ;;  %5545 = vst [vmem:[#allocation82_spill] sm:$0xff] %v4403_v56  ;;  %v793_v6 = vmul.f32 %v4426_v27, %v569_v59  ;;  %v4446_v59 = vld [vmem:[%s5297_s5 + $0x30] sm:$0xff] }
 0x12b   : > { %v1440_v55 = vrot.slane %v1439_v38, 4  ;;  %v1435_v40 = vrot.slane %v1434_v46, 1  ;;  %5552 = vst [vmem:[#allocation89_spill] sm:$0xff] %v4435_v24  ;;  %5554 = vst [vmem:[#allocation91_spill] sm:$0xff] %v4446_v59  ;;  %v1427_v54 = vadd.f32 %v1426_v32, %v1425_v15  ;;  %v1790_v9 = vmul.f32 %v1495_v14, %v4392_v16  ;;  %v576_v16 = vld [vmem:[%s4334_s20 + $0x50] sm:$0xff] }
 0x12c   : > { %v4394_v29 = vpop.permute.xlu1 %1502  ;;  %v1499_v33 = vpop.permute.xlu0 %1498  ;;  %v4449_v44 = vadd.f32 %v4446_v59, %v796_v18  ;;  %v798_v18 = vmul.f32 %v4464_v34, %v574_v58  ;;  %v1789_v15 = vmul.f32 %v1491_v43, %v4403_v56  ;;  %v1418_v1 = vadd.f32 %v1417_v45, %v1416_v35  ;;  %v578_v56 = vld [vmem:[%s4334_s20 + $0x60] sm:$0xff] }
 0x12d   : > { %v1441_v10 = vadd.f32 %v1440_v55, %v1439_v38  ;;  %v797_v55 = vmul.f32 %v4440_v12, %v573_v57  ;;  %v4458_v57 = vld [vmem:[%s5296_s4 + $0x48] sm:$0xff]  ;;  %v1436_v41 = vadd.f32 %v1435_v40, %v1434_v46  ;;  %v577_v46 = vld [vmem:[%s4334_s20 + $0x58] sm:$0xff] }
 0x12e   : > { %1779 = vbcast.lane.b32.xlu1 %v1773_v20, 264  ;;  %1775 = vbcast.lane.b32.xlu0 %v1773_v20, 256  ;;  %5555 = vst [vmem:[#allocation92_spill] sm:$0xff] %v4449_v44  ;;  %v799_v60 = vmul.f32 %v4458_v57, %v575_v63  ;;  %v2036_v63 = vrot.slane %v4452_v26, %v3680_v11  ;;  %v4495_v40 = vld [vmem:[%s5297_s5 + $0x48] sm:$0xff] }
 0x12f   : > { %v1442_v38 = vrot.slane %v1441_v10, 2 }
 0x130   : > { %v1514_v0 = vpop.permute.xlu1 %1513  ;;  %v1510_v51 = vpop.permute.xlu0 %1509 }
 0x131   : > { %v1443_v47 = vadd.f32 %v1442_v38, %v1441_v10  ;;  %v1794_v14 = vmul.f32 %v1514_v0, %v4411_v50  ;;  %v1793_v32 = vmul.f32 %v1510_v51, %v4419_v2  ;;  %v4476_v10 = vld [vmem:[%s5297_s5 + $0x18] sm:$0xff]  ;;  %v1791_v0 = vmul.f32 %v1499_v33, %v4435_v24  ;;  %v579_v50 = vld [vmem:[%s4334_s20 + $0x68] sm:$0xff] }
 0x132   : > { %1787 = vbcast.lane.b32.xlu1 %v1773_v20, 280  ;;  %1783 = vbcast.lane.b32.xlu0 %v1773_v20, 272  ;;  %v4479_v43 = vadd.f32 %v4476_v10, %v793_v6  ;;  %v4485_v51 = vld [vmem:[%s5297_s5 + $0x38] sm:$0xff]  ;;  %v1474_v20 = vsel %vm1462_vm0, %v1427_v54, %v1418_v1  ;;  %v4498_v33 = vadd.f32 %v4495_v40, %v799_v60  ;;  %v4503_v6 = vld [vmem:[%s5297_s5 + $0x40] sm:$0xff]  ;;  %v4511_v1 = vld [vmem:[%s5296_s4 + $0x50] sm:$0xff] }
 0x133   : > { %v1444_v36 = vrot.slane %v1443_v47, 1  ;;  %v4488_v35 = vadd.f32 %v4485_v51, %v797_v55  ;;  %v4506_v38 = vadd.f32 %v4503_v6, %v798_v18  ;;  %v800_v55 = vmul.f32 %v4511_v1, %v576_v16  ;;  %v4521_v18 = vld [vmem:[%s5296_s4 + $0x58] sm:$0xff] }
 0x134   : > { %5556 = vst [vmem:[#allocation93_spill] sm:$0xff] %v4479_v43  ;;  %v1522_v58 = vpop.permute.xlu1 %1521  ;;  %v1518_v45 = vpop.permute.xlu0 %1517  ;;  %5558 = vst [vmem:[#allocation95_spill] sm:$0xff] %v4498_v33  ;;  %v1853_v24 = vadd.f32 %v1790_v9, %v1789_v15  ;;  %v1862_v60 = vadd.f32 %v1794_v14, %v1793_v32  ;;  %v1475_v61 = vsel %vm1464_vm1, %v1436_v41, %v1474_v20  ;;  %v4530_v41 = vld [vmem:[%s5297_s5 + $0x50] sm:$0xff] }
 0x135   : > { %5557 = vst [vmem:[#allocation94_spill] sm:$0xff] %v4488_v35  ;;  %5559 = vst [vmem:[#allocation96_spill] sm:$0xff] %v4506_v38  ;;  %v1445_v54 = vadd.f32 %v1444_v36, %v1443_v47  ;;  %v1795_v2 = vmul.f32 %v1518_v45, %v4449_v44  ;;  %v801_v39 = vmul.f32 %v4521_v18, %v577_v46 }
 0x136   : > { %2042 = vbcast.lane.b32.xlu1 %v2036_v63, 264  ;;  %2038 = vbcast.lane.b32.xlu0 %v2036_v63, 256  ;;  %v1854_v36 = vadd.f32 %v1853_v24, %v1791_v0  ;;  %v1796_v47 = vmul.f32 %v1522_v58, %v4488_v35  ;;  %v4533_v32 = vadd.f32 %v4530_v41, %v800_v55  ;;  %v580_v55 = vld [vmem:[%s4334_s20 + $0x70] sm:$0xff] }
 0x137   : > { %v1476_v16 = vsel %vm1466_vm2, %v1445_v54, %v1475_v61  ;;  %v1863_v9 = vadd.f32 %v1862_v60, %v1795_v2  ;;  %v4538_v61 = vld [vmem:[%s5296_s4 + $0x68] sm:$0xff]  ;;  %v4544_v2 = vld [vmem:[%s5296_s4 + $0x60] sm:$0xff]  ;;  %v1792_v46 = vmul.f32 %v4394_v29, %v4479_v43 }
 0x138   : > { %1484 = vst [vmem:[%s4068_s14 + $0xc] sm:$0xf] %v1476_v16  ;;  %v1533_v15 = vpop.permute.xlu1 %1532  ;;  %v1529_v14 = vpop.permute.xlu0 %1528  ;;  %5560 = vst [vmem:[#allocation97_spill] sm:$0xff] %v4533_v32  ;;  %v803_v24 = vmul.f32 %v4538_v61, %v579_v50  ;;  %v802_v0 = vmul.f32 %v4544_v2, %v578_v56  ;;  %v2055_v50 = vrot.slane %v4452_v26, %v3683_v13  ;;  %v4557_v56 = vld [vmem:[%s5297_s5 + $0x58] sm:$0xff] }
 0x139   : > { %v1864_v20 = vadd.f32 %v1863_v9, %v1796_v47  ;;  %v1798_v58 = vmul.f32 %v1533_v15, %v4498_v33  ;;  %v1797_v45 = vmul.f32 %v1529_v14, %v4506_v38  ;;  %v1855_v54 = vadd.f32 %v1854_v36, %v1792_v46  ;;  %v4565_v47 = vld [vmem:[%s5297_s5 + $0x68] sm:$0xff]  ;;  %v581_v9 = vld [vmem:[%s4334_s20 + $0x78] sm:$0xff]  ;;  %v4574_v36 = vld [vmem:[%s5296_s4 + $0x70] sm:$0xff] }
 0x13a   : > { %2050 = vbcast.lane.b32.xlu1 %v2036_v63, 280  ;;  %2046 = vbcast.lane.b32.xlu0 %v2036_v63, 272  ;;  %v4560_v60 = vadd.f32 %v4557_v56, %v801_v39  ;;  %v4568_v63 = vadd.f32 %v4565_v47, %v803_v24  ;;  %v804_v15 = vmul.f32 %v4574_v36, %v580_v55  ;;  %v4581_v38 = vld [vmem:[%s5297_s5 + $0x60] sm:$0xff] }
 0x13b   : > { %v1865_v39 = vrot.slane %v1864_v20, 4  ;;  %v1871_v14 = vadd.f32 %v1798_v58, %v1797_v45  ;;  %v4584_v24 = vadd.f32 %v4581_v38, %v802_v0  ;;  %v1856_v33 = vrot.slane %v1855_v54, 4  ;;  %v4590_v58 = vld [vmem:[%s5296_s4 + $0x78] sm:$0xff]  ;;  %v4596_v0 = vld [vmem:[%s5297_s5 + $0x70] sm:$0xff] }
 0x13c   : > { %5561 = vst [vmem:[#allocation98_spill] sm:$0xff] %v4560_v60  ;;  %v1541_v29 = vpop.permute.xlu1 %1540  ;;  %v1537_v16 = vpop.permute.xlu0 %1536  ;;  %5562 = vst [vmem:[#allocation99_spill] sm:$0xff] %v4568_v63  ;;  %v805_v45 = vmul.f32 %v4590_v58, %v581_v9  ;;  %v2074_v9 = vrot.slane %v4452_v26, %v5493_v21 }
 0x13d   : > { %v1799_v46 = vmul.f32 %v1537_v16, %v4533_v32  ;;  %5563 = vst [vmem:[#allocation100_spill] sm:$0xff] %v4584_v24  ;;  %v1800_v43 = vmul.f32 %v1541_v29, %v4560_v60  ;;  %v4599_v32 = vadd.f32 %v4596_v0, %v804_v15  ;;  %v1866_v44 = vadd.f32 %v1865_v39, %v1864_v20  ;;  %v4608_v20 = vld [vmem:[%s5297_s5 + $0x78] sm:$0xff] }
 0x13e   : > { %2061 = vbcast.lane.b32.xlu1 %v2055_v50, 264  ;;  %2057 = vbcast.lane.b32.xlu0 %v2055_v50, 256  ;;  %v1857_v60 = vadd.f32 %v1856_v33, %v1855_v54  ;;  %5565 = vst [vmem:[#allocation102_spill] sm:$0xff] %v4608_v20  ;;  %v582_v33 = vld [vmem:[%s4334_s20 + $0x80] sm:$0xff]  ;;  %v587_v54 = vld [vmem:[%s4334_s20 + $0xa8] sm:$0xff] }
 0x13f   : > { %v1872_v35 = vadd.f32 %v1871_v14, %v1799_v46  ;;  %5564 = vst [vmem:[#allocation101_spill] sm:$0xff] %v4599_v32  ;;  %v1867_v39 = vrot.slane %v1866_v44, 2  ;;  %v811_v19 = vmul.f32 %v4362_v53, %v587_v54 }
 0x140   : > { %v1552_v55 = vpop.permute.xlu1 %1551  ;;  %v1548_v16 = vpop.permute.xlu0 %1547  ;;  %v1858_v37 = vrot.slane %v1857_v60, 2 }
 0x141   : > { %v1873_v29 = vadd.f32 %v1872_v35, %v1800_v43  ;;  %v1802_v14 = vmul.f32 %v1552_v55, %v4568_v63  ;;  %v1801_v46 = vmul.f32 %v1548_v16, %v4584_v24  ;;  %v4611_v43 = vadd.f32 %v4608_v20, %v805_v45  ;;  %v583_v24 = vld [vmem:[%s4334_s20 + $0x88] sm:$0xff]  ;;  %v586_v63 = vld [vmem:[%s4334_s20 + $0xa0] sm:$0xff] }
 0x142   : > { %2069 = vbcast.lane.b32.xlu1 %v2055_v50, 280  ;;  %2065 = vbcast.lane.b32.xlu0 %v2055_v50, 272  ;;  %v807_v28 = vmul.f32 %v4348_v4, %v583_v24  ;;  %v810_v3 = vmul.f32 %v4368_v23, %v586_v63  ;;  %v2093_v24 = vrot.slane %v4452_v26, %v3689_v17  ;;  %v591_v26 = vld [vmem:[%s4334_s20 + $0xc8] sm:$0xff] }
 0x143   : > { %v1874_v25 = vrot.slane %v1873_v29, 4  ;;  %5566 = vst [vmem:[#allocation103_spill] sm:$0xff] %v4611_v43  ;;  %v1880_v55 = vadd.f32 %v1802_v14, %v1801_v46  ;;  %v588_v46 = vld [vmem:[%s4334_s20 + $0xb0] sm:$0xff]  ;;  %v4638_v54 = vadd.f32 %v4408_v7, %v811_v19 }
 0x144   : > { %v1560_v35 = vpop.permute.xlu1 %1559  ;;  %v1556_v15 = vpop.permute.xlu0 %1555 }
 0x145   : > { %v1875_v50 = vadd.f32 %v1874_v25, %v1873_v29  ;;  %v1803_v16 = vmul.f32 %v1556_v15, %v4599_v32  ;;  %v1804_v45 = vmul.f32 %v1560_v35, %v4611_v43  ;;  %v806_v29 = vmul.f32 %v4356_v42, %v582_v33  ;;  %v585_v33 = vld [vmem:[%s4334_s20 + $0x98] sm:$0xff]  ;;  %5569 = vst [vmem:[#allocation106_spill] sm:$0xff] %v4638_v54 }
 0x146   : > { %2080 = vbcast.lane.b32.xlu1 %v2074_v9, 264  ;;  %2076 = vbcast.lane.b32.xlu0 %v2074_v9, 256  ;;  %v1868_v15 = vadd.f32 %v1867_v39, %v1866_v44  ;;  %v808_v35 = vmul.f32 %v4377_v22, %v584_v62  ;;  %v4631_v44 = vadd.f32 %v4389_v30, %v807_v28  ;;  %v589_v39 = vld [vmem:[%s4334_s20 + $0xb8] sm:$0xff] }
 0x147   : > { %v1876_v5 = vrot.slane %v1875_v50, 2  ;;  %v1881_v49 = vadd.f32 %v1880_v55, %v1803_v16  ;;  %v1859_v55 = vadd.f32 %v1858_v37, %v1857_v60  ;;  %v4634_v63 = vadd.f32 %v4400_v31, %v806_v29  ;;  %v590_v60 = vld [vmem:[%s4334_s20 + $0xc0] sm:$0xff] }
 0x148   : > { %v1571_v25 = vpop.permute.xlu1 %1570  ;;  %v1567_v14 = vpop.permute.xlu0 %1566  ;;  %5567 = vst [vmem:[#allocation104_spill] sm:$0xff] %v4631_v44  ;;  %v1869_v62 = vrot.slane %v1868_v15, 1  ;;  %v4641_v37 = vadd.f32 %v4416_v48, %v810_v3  ;;  %v809_v28 = vmul.f32 %v4426_v27, %v585_v33  ;;  %v4647_v29 = vadd.f32 %v4432_v8, %v808_v35  ;;  %v4654_v3 = vld [vmem:[%s3677_s16 + $0x14] sm:$0xf] }
 0x149   : > { %v1882_v32 = vadd.f32 %v1881_v49, %v1804_v45  ;;  %v1877_v20 = vadd.f32 %v1876_v5, %v1875_v50  ;;  %v812_v49 = vmul.f32 %v4383_v52, %v588_v46  ;;  %5568 = vst [vmem:[#allocation105_spill] sm:$0xff] %v4634_v63  ;;  %v1860_v46 = vrot.slane %v1859_v55, 1 }
 0x14a   : > { %2088 = vbcast.lane.b32.xlu1 %v2074_v9, 280  ;;  %2084 = vbcast.lane.b32.xlu0 %v2074_v9, 272  ;;  %5570 = vst [vmem:[#allocation107_spill] sm:$0xff] %v4641_v37  ;;  %5571 = vst [vmem:[#allocation108_spill] sm:$0xff] %v4647_v29  ;;  %v1805_v48 = vmul.f32 %v1567_v14, %v4634_v63  ;;  %v815_v35 = vmul.f32 %v4458_v57, %v591_v26 }
 0x14b   : > { %v1883_v16 = vrot.slane %v1882_v32, 4  ;;  %v1878_v45 = vrot.slane %v1877_v20, 1  ;;  %v4651_v19 = vadd.f32 %v4446_v59, %v812_v49  ;;  %v814_v8 = vmul.f32 %v4464_v34, %v590_v60  ;;  %v592_v49 = vld [vmem:[%s4334_s20 + $0xd0] sm:$0xff] }
 0x14c   : > { %v1579_v5 = vpop.permute.xlu1 %1578  ;;  %v1575_v9 = vpop.permute.xlu0 %1574  ;;  %v1870_v7 = vadd.f32 %v1869_v62, %v1868_v15  ;;  %v1861_v14 = vadd.f32 %v1860_v46, %v1859_v55  ;;  %v4667_v15 = vadd.f32 %v4476_v10, %v809_v28  ;;  %v816_v55 = vmul.f32 %v4511_v1, %v592_v49 }
 0x14d   : > { %v1884_v50 = vadd.f32 %v1883_v16, %v1882_v32  ;;  %v813_v32 = vmul.f32 %v4440_v12, %v589_v39  ;;  %5572 = vst [vmem:[#allocation109_spill] sm:$0xff] %v4651_v19  ;;  %v1806_v16 = vmul.f32 %v1571_v25, %v4631_v44  ;;  %v1879_v59 = vadd.f32 %v1878_v45, %v1877_v20 }
 0x14e   : > { %2099 = vbcast.lane.b32.xlu1 %v2093_v24, 264  ;;  %2095 = vbcast.lane.b32.xlu0 %v2093_v24, 256  ;;  %v1807_v12 = vmul.f32 %v1575_v9, %v4647_v29  ;;  %v2112_v25 = vrot.slane %v4654_v3, %v3680_v11  ;;  %5573 = vst [vmem:[#allocation110_spill] sm:$0xff] %v4667_v15 }
 0x14f   : > { %v1885_v43 = vrot.slane %v1884_v50, 2  ;;  %v4673_v9 = vadd.f32 %v4495_v40, %v815_v35  ;;  %v2013_v60 = vsel %vm1462_vm0, %v1870_v7, %v1861_v14 }
 0x150   : > { %v1590_v33 = vpop.permute.xlu1 %1589  ;;  %v1586_v27 = vpop.permute.xlu0 %1585 }
 0x151   : > { %v1886_v31 = vadd.f32 %v1885_v43, %v1884_v50  ;;  %v1810_v30 = vmul.f32 %v1590_v33, %v4638_v54  ;;  %v1809_v39 = vmul.f32 %v1586_v27, %v4641_v37  ;;  %v4670_v43 = vadd.f32 %v4485_v51, %v813_v32  ;;  %5575 = vst [vmem:[#allocation112_spill] sm:$0xff] %v4673_v9  ;;  %v593_v50 = vld [vmem:[%s4334_s20 + $0xd8] sm:$0xff]  ;;  %v594_v33 = vld [vmem:[%s4334_s20 + $0xe0] sm:$0xff]  ;;  %v5588_v54 = vld [vmem:[#allocation87_spill] sm:$0xff] }
 0x152   : > { %2107 = vbcast.lane.b32.xlu1 %v2093_v24, 280  ;;  %2103 = vbcast.lane.b32.xlu0 %v2093_v24, 272  ;;  %v1889_v27 = vadd.f32 %v1806_v16, %v1805_v48  ;;  %v4676_v24 = vadd.f32 %v4503_v6, %v814_v8  ;;  %v595_v48 = vld [vmem:[%s4334_s20 + $0xe8] sm:$0xff]  ;;  %v2014_v32 = vsel %vm1464_vm1, %v1879_v59, %v2013_v60 }
 0x153   : > { %v1887_v26 = vrot.slane %v1886_v31, 1  ;;  %5574 = vst [vmem:[#allocation111_spill] sm:$0xff] %v4670_v43  ;;  %v1898_v28 = vadd.f32 %v1810_v30, %v1809_v39  ;;  %v817_v49 = vmul.f32 %v4521_v18, %v593_v50  ;;  %v1808_v30 = vmul.f32 %v1579_v5, %v4667_v15 }
 0x154   : > { %v1598_v62 = vpop.permute.xlu1 %1597  ;;  %v1594_v20 = vpop.permute.xlu0 %1593  ;;  %5576 = vst [vmem:[#allocation113_spill] sm:$0xff] %v4676_v24  ;;  %v1890_v16 = vadd.f32 %v1889_v27, %v1807_v12  ;;  %v4694_v12 = vadd.f32 %v4530_v41, %v816_v55  ;;  %v819_v59 = vmul.f32 %v4538_v61, %v595_v48  ;;  %v818_v27 = vmul.f32 %v4544_v2, %v594_v33 }
 0x155   : > { %v1888_v45 = vadd.f32 %v1887_v26, %v1886_v31  ;;  %v1811_v46 = vmul.f32 %v1594_v20, %v4651_v19  ;;  %v1812_v35 = vmul.f32 %v1598_v62, %v4670_v43  ;;  %v2131_v5 = vrot.slane %v4654_v3, %v3683_v13  ;;  %v596_v20 = vld [vmem:[%s4334_s20 + $0xf0] sm:$0xff] }
 0x156   : > { %2118 = vbcast.lane.b32.xlu1 %v2112_v25, 264  ;;  %2114 = vbcast.lane.b32.xlu0 %v2112_v25, 256  ;;  %5577 = vst [vmem:[#allocation114_spill] sm:$0xff] %v4694_v12  ;;  %v1891_v62 = vadd.f32 %v1890_v16, %v1808_v30  ;;  %v4704_v50 = vadd.f32 %v4557_v56, %v817_v49 }
 0x157   : > { %v2015_v8 = vsel %vm1466_vm2, %v1888_v45, %v2014_v32  ;;  %v1899_v37 = vadd.f32 %v1898_v28, %v1811_v46  ;;  %v597_v28 = vld [vmem:[%s4334_s20 + $0xf8] sm:$0xff]  ;;  %v4712_v32 = vadd.f32 %v4581_v38, %v818_v27 }
 0x158   : > { %2029 = vst [vmem:[%s4689_s17] sm:$0xf] %v2015_v8  ;;  %v1609_v31 = vpop.permute.xlu1 %1608  ;;  %v1605_v7 = vpop.permute.xlu0 %1604  ;;  %5578 = vst [vmem:[#allocation115_spill] sm:$0xff] %v4704_v50  ;;  %v1892_v16 = vrot.slane %v1891_v62, 4 }
 0x159   : > { %v1900_v39 = vadd.f32 %v1899_v37, %v1812_v35  ;;  %v1814_v14 = vmul.f32 %v1609_v31, %v4673_v9  ;;  %v1813_v26 = vmul.f32 %v1605_v7, %v4676_v24  ;;  %v4707_v37 = vadd.f32 %v4565_v47, %v819_v59  ;;  %5580 = vst [vmem:[#allocation117_spill] sm:$0xff] %v4712_v32 }
 0x15a   : > { %2126 = vbcast.lane.b32.xlu1 %v2112_v25, 280  ;;  %2122 = vbcast.lane.b32.xlu0 %v2112_v25, 272  ;;  %v820_v25 = vmul.f32 %v4574_v36, %v596_v20  ;;  %v821_v35 = vmul.f32 %v4590_v58, %v597_v28  ;;  %v1893_v27 = vadd.f32 %v1892_v16, %v1891_v62 }
 0x15b   : > { %v1901_v55 = vrot.slane %v1900_v39, 4  ;;  %5579 = vst [vmem:[#allocation116_spill] sm:$0xff] %v4707_v37  ;;  %v1907_v46 = vadd.f32 %v1814_v14, %v1813_v26 }
 0x15c   : > { %v1617_v60 = vpop.permute.xlu1 %1616  ;;  %v1613_v45 = vpop.permute.xlu0 %1612  ;;  %v4720_v26 = vadd.f32 %v4596_v0, %v820_v25  ;;  %v599_v25 = vld [vmem:[%s4334_s20 + $0x108] sm:$0xff]  ;;  %v1894_v16 = vrot.slane %v1893_v27, 2 }
 0x15d   : > { %v1815_v48 = vmul.f32 %v1613_v45, %v4694_v12  ;;  %v1816_v33 = vmul.f32 %v1617_v60, %v4704_v50  ;;  %v1902_v49 = vadd.f32 %v1901_v55, %v1900_v39  ;;  %v2150_v39 = vrot.slane %v4654_v3, %v5493_v21  ;;  %v5582_v55 = vld [vmem:[#allocation102_spill] sm:$0xff] }
 0x15e   : > { %2137 = vbcast.lane.b32.xlu1 %v2131_v5, 264  ;;  %2133 = vbcast.lane.b32.xlu0 %v2131_v5, 256  ;;  %5581 = vst [vmem:[#allocation118_spill] sm:$0xff] %v4720_v26  ;;  %v4725_v60 = vadd.f32 %v5582_v55, %v821_v35  ;;  %v1895_v9 = vadd.f32 %v1894_v16, %v1893_v27  ;;  %v5585_v16 = vld [vmem:[#allocation81_spill] sm:$0xff] }
 0x15f   : > { %v1908_v8 = vadd.f32 %v1907_v46, %v1815_v48  ;;  %v1903_v45 = vrot.slane %v1902_v49, 2 }
 0x160   : > { %v1628_v30 = vpop.permute.xlu1 %1627  ;;  %v1624_v31 = vpop.permute.xlu0 %1623  ;;  %5583 = vst [vmem:[#allocation102_spill] sm:$0xff] %v4725_v60  ;;  %v1896_v19 = vrot.slane %v1895_v9, 1 }
 0x161   : > { %v1909_v7 = vadd.f32 %v1908_v8, %v1816_v33  ;;  %v1818_v59 = vmul.f32 %v1628_v30, %v4707_v37  ;;  %v1817_v14 = vmul.f32 %v1624_v31, %v4712_v32  ;;  %v603_v8 = vld [vmem:[%s4334_s20 + $0x128] sm:$0xff]  ;;  %v602_v30 = vld [vmem:[%s4334_s20 + $0x120] sm:$0xff]  ;;  %v1904_v12 = vadd.f32 %v1903_v45, %v1902_v49 }
 0x162   : > { %2145 = vbcast.lane.b32.xlu1 %v2131_v5, 280  ;;  %2141 = vbcast.lane.b32.xlu0 %v2131_v5, 272  ;;  %v598_v5 = vld [vmem:[%s4334_s20 + $0x100] sm:$0xff]  ;;  %v827_v37 = vmul.f32 %v4362_v53, %v603_v8  ;;  %v826_v24 = vmul.f32 %v4368_v23, %v602_v30  ;;  %v2169_v49 = vrot.slane %v4654_v3, %v3689_v17  ;;  %v5586_v3 = vld [vmem:[#allocation83_spill] sm:$0xff] }
 0x163   : > { %v1910_v20 = vrot.slane %v1909_v7, 4  ;;  %v1916_v33 = vadd.f32 %v1818_v59, %v1817_v14  ;;  %v822_v32 = vmul.f32 %v4356_v42, %v598_v5 }
 0x164   : > { %v1636_v28 = vpop.permute.xlu1 %1635  ;;  %v1632_v46 = vpop.permute.xlu0 %1631 }
 0x165   : > { %v1911_v48 = vadd.f32 %v1910_v20, %v1909_v7  ;;  %v1819_v62 = vmul.f32 %v1632_v46, %v4720_v26  ;;  %v1820_v35 = vmul.f32 %v1636_v28, %v4725_v60  ;;  %v823_v7 = vmul.f32 %v4348_v4, %v599_v25  ;;  %v600_v20 = vld [vmem:[%s4334_s20 + $0x110] sm:$0xff]  ;;  %v601_v28 = vld [vmem:[%s4334_s20 + $0x118] sm:$0xff]  ;;  %v5584_v25 = vld [vmem:[#allocation79_spill] sm:$0xff] }
 0x166   : > { %2156 = vbcast.lane.b32.xlu1 %v2150_v39, 264  ;;  %2152 = vbcast.lane.b32.xlu0 %v2150_v39, 256  ;;  %v604_v46 = vld [vmem:[%s4334_s20 + $0x130] sm:$0xff]  ;;  %v4751_v30 = vadd.f32 %v5585_v16, %v822_v32  ;;  %v606_v60 = vld [vmem:[%s4334_s20 + $0x140] sm:$0xff]  ;;  %v825_v15 = vmul.f32 %v5588_v54, %v601_v28 }
 0x167   : > { %v1912_v31 = vrot.slane %v1911_v48, 2  ;;  %v1917_v50 = vadd.f32 %v1916_v33, %v1819_v62  ;;  %v828_v33 = vmul.f32 %v4383_v52, %v604_v46  ;;  %v1905_v62 = vrot.slane %v1904_v12, 1  ;;  %v607_v46 = vld [vmem:[%s4334_s20 + $0x148] sm:$0xff]  ;;  %v5591_v32 = vld [vmem:[#allocation90_spill] sm:$0xff] }
 0x168   : > { %v1647_v59 = vpop.permute.xlu1 %1646  ;;  %v1643_v14 = vpop.permute.xlu0 %1642  ;;  %v4745_v5 = vadd.f32 %v5584_v25, %v823_v7  ;;  %v831_v28 = vmul.f32 %v4458_v57, %v607_v46  ;;  %v830_v54 = vmul.f32 %v4464_v34, %v606_v60  ;;  %v4782_v60 = vadd.f32 %v4476_v10, %v825_v15  ;;  %v611_v46 = vld [vmem:[%s4334_s20 + $0x168] sm:$0xff] }
 0x169   : > { %v1918_v26 = vadd.f32 %v1917_v50, %v1820_v35  ;;  %v1913_v43 = vadd.f32 %v1912_v31, %v1911_v48  ;;  %v824_v50 = vmul.f32 %v4377_v22, %v600_v20  ;;  %v605_v48 = vld [vmem:[%s4334_s20 + $0x138] sm:$0xff]  ;;  %v4754_v31 = vadd.f32 %v5586_v3, %v827_v37  ;;  %v5592_v37 = vld [vmem:[#allocation91_spill] sm:$0xff] }
 0x16a   : > { %2164 = vbcast.lane.b32.xlu1 %v2150_v39, 280  ;;  %2160 = vbcast.lane.b32.xlu0 %v2150_v39, 272  ;;  %v5587_v35 = vld [vmem:[#allocation85_spill] sm:$0xff]  ;;  %v829_v63 = vmul.f32 %v5591_v32, %v605_v48  ;;  %v4767_v44 = vadd.f32 %v5592_v37, %v828_v33  ;;  %v1822_v3 = vmul.f32 %v1647_v59, %v4745_v5  ;;  %v608_v37 = vld [vmem:[%s4334_s20 + $0x150] sm:$0xff] }
 0x16b   : > { %v1919_v45 = vrot.slane %v1918_v26, 4  ;;  %v4757_v20 = vadd.f32 %v5587_v35, %v826_v24  ;;  %v1914_v7 = vrot.slane %v1913_v43, 1  ;;  %v4770_v24 = vld [vmem:[%s3677_s16 + $0x18] sm:$0xf]  ;;  %v1906_v35 = vadd.f32 %v1905_v62, %v1904_v12  ;;  %5593 = vst [vmem:[#allocation120_spill] sm:$0xff] %v4782_v60 }
 0x16c   : > { %v4747_v8 = vpop.permute.xlu1 %1654  ;;  %v1651_v27 = vpop.permute.xlu0 %1650  ;;  %v1897_v32 = vadd.f32 %v1896_v19, %v1895_v9  ;;  %v2188_v12 = vrot.slane %v4770_v24, %v3680_v11  ;;  %v609_v62 = vld [vmem:[%s4334_s20 + $0x158] sm:$0xff]  ;;  %v832_v15 = vmul.f32 %v4511_v1, %v608_v37 }
 0x16d   : > { %v1920_v39 = vadd.f32 %v1919_v45, %v1918_v26  ;;  %v5589_v26 = vld [vmem:[#allocation88_spill] sm:$0xff] }
 0x16e   : > { %2175 = vbcast.lane.b32.xlu1 %v2169_v49, 264  ;;  %2171 = vbcast.lane.b32.xlu0 %v2169_v49, 256  ;;  %v4763_v45 = vadd.f32 %v5589_v26, %v824_v50  ;;  %v1821_v50 = vmul.f32 %v1643_v14, %v4751_v30  ;;  %v1915_v26 = vadd.f32 %v1914_v7, %v1913_v43  ;;  %v610_v7 = vld [vmem:[%s4334_s20 + $0x160] sm:$0xff] }
 0x16f   : > { %v1921_v29 = vrot.slane %v1920_v39, 2  ;;  %v4786_v14 = vadd.f32 %v4485_v51, %v829_v63  ;;  %v2016_v19 = vsel %vm1462_vm0, %v1906_v35, %v1897_v32  ;;  %v833_v32 = vmul.f32 %v4521_v18, %v609_v62 }
 0x170   : > { %5590 = vst [vmem:[#allocation119_spill] sm:$0xff] %v4763_v45  ;;  %v1666_v16 = vpop.permute.xlu1 %1665  ;;  %v1662_v25 = vpop.permute.xlu0 %1661  ;;  %v2017_v35 = vsel %vm1464_vm1, %v1915_v26, %v2016_v19  ;;  %v835_v26 = vmul.f32 %v4538_v61, %v611_v46  ;;  %v612_v19 = vld [vmem:[%s4334_s20 + $0x170] sm:$0xff] }
 0x171   : > { %v1922_v52 = vadd.f32 %v1921_v29, %v1920_v39  ;;  %v1826_v48 = vmul.f32 %v1666_v16, %v4754_v31  ;;  %v1825_v33 = vmul.f32 %v1662_v25, %v4757_v20  ;;  %v1823_v29 = vmul.f32 %v1651_v27, %v4763_v45  ;;  %5594 = vst [vmem:[#allocation121_spill] sm:$0xff] %v4786_v14 }
 0x172   : > { %2183 = vbcast.lane.b32.xlu1 %v2169_v49, 280  ;;  %2179 = vbcast.lane.b32.xlu0 %v2169_v49, 272  ;;  %v4791_v49 = vadd.f32 %v4495_v40, %v831_v28  ;;  %v4794_v25 = vadd.f32 %v4503_v6, %v830_v54  ;;  %v1925_v16 = vadd.f32 %v1822_v3, %v1821_v50 }
 0x173   : > { %v1923_v59 = vrot.slane %v1922_v52, 1  ;;  %v1934_v27 = vadd.f32 %v1826_v48, %v1825_v33  ;;  %v4806_v50 = vadd.f32 %v4530_v41, %v832_v15  ;;  %v834_v48 = vmul.f32 %v4544_v2, %v610_v7 }
 0x174   : > { %v1674_v43 = vpop.permute.xlu1 %1673  ;;  %v1670_v9 = vpop.permute.xlu0 %1669  ;;  %5595 = vst [vmem:[#allocation122_spill] sm:$0xff] %v4791_v49  ;;  %5596 = vst [vmem:[#allocation123_spill] sm:$0xff] %v4794_v25  ;;  %v1926_v28 = vadd.f32 %v1925_v16, %v1823_v29  ;;  %v1824_v33 = vmul.f32 %v4747_v8, %v4782_v60  ;;  %v4818_v15 = vadd.f32 %v4557_v56, %v833_v32  ;;  %v613_v8 = vld [vmem:[%s4334_s20 + $0x178] sm:$0xff] }
 0x175   : > { %v1924_v39 = vadd.f32 %v1923_v59, %v1922_v52  ;;  %v1827_v63 = vmul.f32 %v1670_v9, %v4767_v44  ;;  %v1828_v45 = vmul.f32 %v1674_v43, %v4786_v14  ;;  %5597 = vst [vmem:[#allocation124_spill] sm:$0xff] %v4806_v50  ;;  %v2207_v43 = vrot.slane %v4770_v24, %v3683_v13 }
 0x176   : > { %2194 = vbcast.lane.b32.xlu1 %v2188_v12, 264  ;;  %2190 = vbcast.lane.b32.xlu0 %v2188_v12, 256  ;;  %v1927_v9 = vadd.f32 %v1926_v28, %v1824_v33  ;;  %5598 = vst [vmem:[#allocation125_spill] sm:$0xff] %v4818_v15  ;;  %v837_v28 = vmul.f32 %v4590_v58, %v613_v8 }
 0x177   : > { %v2018_v54 = vsel %vm1466_vm2, %v1924_v39, %v2017_v35  ;;  %v1935_v37 = vadd.f32 %v1934_v27, %v1827_v63  ;;  %v4821_v27 = vadd.f32 %v4565_v47, %v835_v26 }
 0x178   : > { %2030 = vst [vmem:[%s4689_s17 + $0x4] sm:$0xf] %v2018_v54  ;;  %v1685_v52 = vpop.permute.xlu1 %1684  ;;  %v1681_v3 = vpop.permute.xlu0 %1680  ;;  %v1928_v35 = vrot.slane %v1927_v9, 4 }
 0x179   : > { %v1936_v59 = vadd.f32 %v1935_v37, %v1828_v45  ;;  %v1830_v29 = vmul.f32 %v1685_v52, %v4791_v49  ;;  %v1829_v62 = vmul.f32 %v1681_v3, %v4794_v25  ;;  %5599 = vst [vmem:[#allocation126_spill] sm:$0xff] %v4821_v27  ;;  %v836_v45 = vmul.f32 %v4574_v36, %v612_v19 }
 0x17a   : > { %2202 = vbcast.lane.b32.xlu1 %v2188_v12, 280  ;;  %2198 = vbcast.lane.b32.xlu0 %v2188_v12, 272  ;;  %v4827_v12 = vadd.f32 %v4581_v38, %v834_v48  ;;  %v1929_v19 = vadd.f32 %v1928_v35, %v1927_v9 }
 0x17b   : > { %v1937_v63 = vrot.slane %v1936_v59, 4  ;;  %v1943_v46 = vadd.f32 %v1830_v29, %v1829_v62  ;;  %v4832_v3 = vadd.f32 %v4596_v0, %v836_v45  ;;  %v2226_v62 = vrot.slane %v4770_v24, %v5493_v21 }
 0x17c   : > { %v1693_v39 = vpop.permute.xlu1 %1692  ;;  %v1689_v16 = vpop.permute.xlu0 %1688  ;;  %5600 = vst [vmem:[#allocation127_spill] sm:$0xff] %v4827_v12  ;;  %v1930_v9 = vrot.slane %v1929_v19, 2 }
 0x17d   : > { %v1831_v7 = vmul.f32 %v1689_v16, %v4806_v50  ;;  %v1832_v32 = vmul.f32 %v1693_v39, %v4818_v15  ;;  %5601 = vst [vmem:[#allocation128_spill] sm:$0xff] %v4832_v3  ;;  %v1938_v26 = vadd.f32 %v1937_v63, %v1936_v59  ;;  %v4839_v16 = vadd.f32 %v5582_v55, %v837_v28  ;;  %v616_v15 = vld [vmem:[%s4334_s20 + $0x190] sm:$0xff] }
 0x17e   : > { %2213 = vbcast.lane.b32.xlu1 %v2207_v43, 264  ;;  %2209 = vbcast.lane.b32.xlu0 %v2207_v43, 256 }
 0x17f   : > { %v1944_v54 = vadd.f32 %v1943_v46, %v1831_v7  ;;  %5602 = vst [vmem:[#allocation129_spill] sm:$0xff] %v4839_v16  ;;  %v1939_v45 = vrot.slane %v1938_v26, 2 }
 0x180   : > { %v1704_v37 = vpop.permute.xlu1 %1703  ;;  %v1700_v52 = vpop.permute.xlu0 %1699 }
 0x181   : > { %v1945_v33 = vadd.f32 %v1944_v54, %v1832_v32  ;;  %v1834_v48 = vmul.f32 %v1704_v37, %v4821_v27  ;;  %v1833_v29 = vmul.f32 %v1700_v52, %v4827_v12  ;;  %v615_v32 = vld [vmem:[%s4334_s20 + $0x188] sm:$0xff]  ;;  %v618_v37 = vld [vmem:[%s4334_s20 + $0x1a0] sm:$0xff] }
 0x182   : > { %2221 = vbcast.lane.b32.xlu1 %v2207_v43, 280  ;;  %2217 = vbcast.lane.b32.xlu0 %v2207_v43, 272  ;;  %v614_v43 = vld [vmem:[%s4334_s20 + $0x180] sm:$0xff]  ;;  %v619_v54 = vld [vmem:[%s4334_s20 + $0x1a8] sm:$0xff]  ;;  %v839_v50 = vmul.f32 %v4348_v4, %v615_v32  ;;  %v842_v27 = vmul.f32 %v4368_v23, %v618_v37  ;;  %v2245_v4 = vrot.slane %v4770_v24, %v3689_v17  ;;  %v5607_v24 = vld [vmem:[#allocation85_spill] sm:$0xff] }
 0x183   : > { %v1946_v39 = vrot.slane %v1945_v33, 4  ;;  %v1952_v46 = vadd.f32 %v1834_v48, %v1833_v29  ;;  %v838_v48 = vmul.f32 %v4356_v42, %v614_v43  ;;  %v843_v12 = vmul.f32 %v4362_v53, %v619_v54  ;;  %v5604_v32 = vld [vmem:[#allocation79_spill] sm:$0xff]  ;;  %v5605_v53 = vld [vmem:[#allocation81_spill] sm:$0xff] }
 0x184   : > { %v1712_v59 = vpop.permute.xlu1 %1711  ;;  %v1708_v8 = vpop.permute.xlu0 %1707  ;;  %v1931_v42 = vadd.f32 %v1930_v9, %v1929_v19  ;;  %v4859_v43 = vadd.f32 %v5604_v32, %v839_v50  ;;  %v621_v54 = vld [vmem:[%s4334_s20 + $0x1b8] sm:$0xff]  ;;  %v5606_v37 = vld [vmem:[#allocation83_spill] sm:$0xff]  ;;  %v4869_v19 = vadd.f32 %v5607_v24, %v842_v27 }
 0x185   : > { %v1947_v63 = vadd.f32 %v1946_v39, %v1945_v33  ;;  %v1835_v7 = vmul.f32 %v1708_v8, %v4832_v3  ;;  %v1836_v28 = vmul.f32 %v1712_v59, %v4839_v16  ;;  %v620_v39 = vld [vmem:[%s4334_s20 + $0x1b0] sm:$0xff]  ;;  %v1940_v8 = vadd.f32 %v1939_v45, %v1938_v26  ;;  %v5603_v26 = vld [vmem:[#allocation78_spill] sm:$0xff]  ;;  %v623_v9 = vld [vmem:[%s4334_s20 + $0x1c8] sm:$0xff] }
 0x186   : > { %2232 = vbcast.lane.b32.xlu1 %v2226_v62, 264  ;;  %2228 = vbcast.lane.b32.xlu0 %v2226_v62, 256  ;;  %v840_v59 = vmul.f32 %v4377_v22, %v616_v15  ;;  %v844_v45 = vmul.f32 %v5603_v26, %v620_v39  ;;  %v4862_v23 = vadd.f32 %v5605_v53, %v838_v48  ;;  %v5608_v50 = vld [vmem:[#allocation87_spill] sm:$0xff]  ;;  %v5609_v26 = vld [vmem:[#allocation88_spill] sm:$0xff]  ;;  %v1932_v32 = vrot.slane %v1931_v42, 1 }
 0x187   : > { %v1948_v35 = vrot.slane %v1947_v63, 2  ;;  %v1953_v52 = vadd.f32 %v1952_v46, %v1835_v7  ;;  %v617_v7 = vld [vmem:[%s4334_s20 + $0x198] sm:$0xff]  ;;  %v1941_v22 = vrot.slane %v1940_v8, 1 }
 0x188   : > { %v1723_v33 = vpop.permute.xlu1 %1722  ;;  %v1719_v29 = vpop.permute.xlu0 %1718  ;;  %v841_v39 = vmul.f32 %v5608_v50, %v617_v7  ;;  %v4875_v48 = vadd.f32 %v5609_v26, %v840_v59  ;;  %v4882_v27 = vld [vmem:[%s3677_s16 + $0x1c] sm:$0xf]  ;;  %v847_v59 = vmul.f32 %v4458_v57, %v623_v9  ;;  %v1933_v57 = vadd.f32 %v1932_v32, %v1931_v42  ;;  %s3137_s16 = scalar_lea.sflag [#allocation7], %s3671_s11 }
 0x189   : > { %v1954_v3 = vadd.f32 %v1953_v52, %v1836_v28  ;;  %v1949_v25 = vadd.f32 %v1948_v35, %v1947_v63  ;;  %v4866_v35 = vadd.f32 %v5606_v37, %v843_v12  ;;  %v622_v28 = vld [vmem:[%s4334_s20 + $0x1c0] sm:$0xff]  ;;  %v5611_v12 = vld [vmem:[#allocation91_spill] sm:$0xff]  ;;  %v1838_v24 = vmul.f32 %v1723_v33, %v4859_v43  ;;  %v625_v9 = vld [vmem:[%s4334_s20 + $0x1d8] sm:$0xff] }
 0x18a   : > { %2240 = vbcast.lane.b32.xlu1 %v2226_v62, 280  ;;  %2236 = vbcast.lane.b32.xlu0 %v2226_v62, 272  ;;  %v4879_v37 = vadd.f32 %v5611_v12, %v844_v45  ;;  %v1837_v16 = vmul.f32 %v1719_v29, %v4862_v23  ;;  %v846_v26 = vmul.f32 %v4464_v34, %v622_v28  ;;  %v624_v45 = vld [vmem:[%s4334_s20 + $0x1d0] sm:$0xff] }
 0x18b   : > { %v1955_v46 = vrot.slane %v1954_v3, 4  ;;  %v1950_v52 = vrot.slane %v1949_v25, 1  ;;  %v1942_v49 = vadd.f32 %v1941_v22, %v1940_v8  ;;  %v2264_v33 = vrot.slane %v4882_v27, %v3680_v11 }
 0x18c   : > { %v1731_v63 = vpop.permute.xlu1 %1730  ;;  %v1727_v62 = vpop.permute.xlu0 %1726  ;;  %v4895_v34 = vadd.f32 %v4476_v10, %v841_v39  ;;  %v1961_v22 = vadd.f32 %v1838_v24, %v1837_v16  ;;  %v848_v42 = vmul.f32 %v4511_v1, %v624_v45  ;;  %v627_v16 = vld [vmem:[%s4334_s20 + $0x1e8] sm:$0xff]  ;;  %v849_v1 = vmul.f32 %v4521_v18, %v625_v9 }
 0x18d   : > { %v1956_v15 = vadd.f32 %v1955_v46, %v1954_v3  ;;  %v5610_v3 = vld [vmem:[#allocation90_spill] sm:$0xff]  ;;  %v1839_v12 = vmul.f32 %v1727_v62, %v4875_v48  ;;  %v4901_v62 = vadd.f32 %v4495_v40, %v847_v59  ;;  %v2019_v10 = vsel %vm1462_vm0, %v1942_v49, %v1933_v57 }
 0x18e   : > { %2251 = vbcast.lane.b32.xlu1 %v2245_v4, 264  ;;  %2247 = vbcast.lane.b32.xlu0 %v2245_v4, 256  ;;  %v845_v46 = vmul.f32 %v5610_v3, %v621_v54  ;;  %v1951_v3 = vadd.f32 %v1950_v52, %v1949_v25  ;;  %v626_v40 = vld [vmem:[%s4334_s20 + $0x1e0] sm:$0xff]  ;;  %v4919_v24 = vadd.f32 %v4530_v41, %v848_v42 }
 0x18f   : > { %v1957_v53 = vrot.slane %v1956_v15, 2  ;;  %v1962_v32 = vadd.f32 %v1961_v22, %v1839_v12  ;;  %v2283_v18 = vrot.slane %v4882_v27, %v3683_v13  ;;  %v4929_v41 = vadd.f32 %v4557_v56, %v849_v1 }
 0x190   : > { %v1742_v7 = vpop.permute.xlu1 %1741  ;;  %v1738_v50 = vpop.permute.xlu0 %1737  ;;  %v4898_v8 = vadd.f32 %v4485_v51, %v845_v46  ;;  %v2020_v39 = vsel %vm1464_vm1, %v1951_v3, %v2019_v10 }
 0x191   : > { %v1958_v60 = vadd.f32 %v1957_v53, %v1956_v15  ;;  %v1842_v14 = vmul.f32 %v1742_v7, %v4866_v35  ;;  %v1841_v54 = vmul.f32 %v1738_v50, %v4869_v19  ;;  %v851_v7 = vmul.f32 %v4538_v61, %v627_v16 }
 0x192   : > { %2259 = vbcast.lane.b32.xlu1 %v2245_v4, 280  ;;  %2255 = vbcast.lane.b32.xlu0 %v2245_v4, 272  ;;  %v4904_v4 = vadd.f32 %v4503_v6, %v846_v26 }
 0x193   : > { %v1959_v29 = vrot.slane %v1958_v60, 1  ;;  %v1970_v52 = vadd.f32 %v1842_v14, %v1841_v54  ;;  %v850_v54 = vmul.f32 %v4544_v2, %v626_v40  ;;  %v4932_v57 = vadd.f32 %v4565_v47, %v851_v7 }
 0x194   : > { %v1750_v15 = vpop.permute.xlu1 %1749  ;;  %v1746_v25 = vpop.permute.xlu0 %1745 }
 0x195   : > { %v1960_v28 = vadd.f32 %v1959_v29, %v1958_v60  ;;  %v1843_v51 = vmul.f32 %v1746_v25, %v4879_v37  ;;  %v1844_v53 = vmul.f32 %v1750_v15, %v4898_v8  ;;  %v1840_v60 = vmul.f32 %v1731_v63, %v4895_v34  ;;  %v628_v63 = vld [vmem:[%s4334_s20 + $0x1f0] sm:$0xff]  ;;  %v629_v29 = vld [vmem:[%s4334_s20 + $0x1f8] sm:$0xff] }
 0x196   : > { %2270 = vbcast.lane.b32.xlu1 %v2264_v33, 264  ;;  %2266 = vbcast.lane.b32.xlu0 %v2264_v33, 256  ;;  %v4937_v15 = vadd.f32 %v4581_v38, %v850_v54  ;;  %v853_v42 = vmul.f32 %v4590_v58, %v629_v29 }
 0x197   : > { %v2021_v6 = vsel %vm1466_vm2, %v1960_v28, %v2020_v39  ;;  %v1971_v46 = vadd.f32 %v1970_v52, %v1843_v51  ;;  %v1963_v45 = vadd.f32 %v1962_v32, %v1840_v60  ;;  %v2302_v39 = vrot.slane %v4882_v27, %v5493_v21 }
 0x198   : > { %2031 = vst [vmem:[%s4689_s17 + $0x8] sm:$0xf] %v2021_v6  ;;  %v1761_v14 = vpop.permute.xlu1 %1760  ;;  %v1757_v49 = vpop.permute.xlu0 %1756  ;;  %v4950_v58 = vadd.f32 %v5582_v55, %v853_v42 }
 0x199   : > { %v1972_v50 = vadd.f32 %v1971_v46, %v1844_v53  ;;  %v1846_v59 = vmul.f32 %v1761_v14, %v4901_v62  ;;  %v1845_v26 = vmul.f32 %v1757_v49, %v4904_v4  ;;  %v1964_v25 = vrot.slane %v1963_v45, 4 }
 0x19a   : > { %2278 = vbcast.lane.b32.xlu1 %v2264_v33, 280  ;;  %2274 = vbcast.lane.b32.xlu0 %v2264_v33, 272  ;;  %v852_v33 = vmul.f32 %v4574_v36, %v628_v63 }
 0x19b   : > { %v1973_v3 = vrot.slane %v1972_v50, 4  ;;  %v1979_v22 = vadd.f32 %v1846_v59, %v1845_v26  ;;  %v1965_v36 = vadd.f32 %v1964_v25, %v1963_v45  ;;  %v4957_v25 = vld [vmem:[%s3833_s22 + $0x10] sm:$0xf] }
 0x19c   : > { %v1769_v12 = vpop.permute.xlu1 %1768  ;;  %v1765_v61 = vpop.permute.xlu0 %1764  ;;  %v4945_v38 = vadd.f32 %v4596_v0, %v852_v33 }
 0x19d   : > { %v1847_v2 = vmul.f32 %v1765_v61, %v4919_v24  ;;  %v1848_v56 = vmul.f32 %v1769_v12, %v4929_v41  ;;  %v1974_v10 = vadd.f32 %v1973_v3, %v1972_v50  ;;  %v1966_v14 = vrot.slane %v1965_v36, 2 }
 0x19e   : > { %2289 = vbcast.lane.b32.xlu1 %v2283_v18, 264  ;;  %2285 = vbcast.lane.b32.xlu0 %v2283_v18, 256 }
 0x19f   : > { %v1980_v9 = vadd.f32 %v1979_v22, %v1847_v2  ;;  %v1975_v40 = vrot.slane %v1974_v10, 2  ;;  %v1967_v55 = vadd.f32 %v1966_v14, %v1965_v36  ;;  %v5615_v36 = vld [vmem:[#allocation25_spill] sm:$0xff] }
 0x1a0   : > { %v1780_v47 = vpop.permute.xlu1 %1779  ;;  %v1776_v28 = vpop.permute.xlu0 %1775 }
 0x1a1   : > { %v1981_v52 = vadd.f32 %v1980_v9, %v1848_v56  ;;  %v1850_v51 = vmul.f32 %v1780_v47, %v4932_v57  ;;  %v1849_v16 = vmul.f32 %v1776_v28, %v4937_v15  ;;  %v1976_v50 = vadd.f32 %v1975_v40, %v1974_v10  ;;  %v5612_v9 = vld [vmem:[#allocation21_spill] sm:$0xff] }
 0x1a2   : > { %2297 = vbcast.lane.b32.xlu1 %v2283_v18, 280  ;;  %2293 = vbcast.lane.b32.xlu0 %v2283_v18, 272  ;;  %v2321_v18 = vrot.slane %v4882_v27, %v3689_v17  ;;  %v1968_v22 = vrot.slane %v1967_v55, 1 }
 0x1a3   : > { %v1982_v32 = vrot.slane %v1981_v52, 4  ;;  %v1988_v1 = vadd.f32 %v1850_v51, %v1849_v16  ;;  %v1977_v3 = vrot.slane %v1976_v50, 1  ;;  %v5614_v51 = vld [vmem:[#allocation24_spill] sm:$0xff] }
 0x1a4   : > { %v1788_v6 = vpop.permute.xlu1 %1787  ;;  %v1784_v53 = vpop.permute.xlu0 %1783 }
 0x1a5   : > { %v1983_v46 = vadd.f32 %v1982_v32, %v1981_v52  ;;  %v1851_v60 = vmul.f32 %v1784_v53, %v4945_v38  ;;  %v1852_v49 = vmul.f32 %v1788_v6, %v4950_v58  ;;  %v1978_v56 = vadd.f32 %v1977_v3, %v1976_v50  ;;  %v5613_v52 = vld [vmem:[#allocation23_spill] sm:$0xff] }
 0x1a6   : > { %2308 = vbcast.lane.b32.xlu1 %v2302_v39, 264  ;;  %2304 = vbcast.lane.b32.xlu0 %v2302_v39, 256  ;;  %v1969_v32 = vadd.f32 %v1968_v22, %v1967_v55  ;;  %v2585_v6 = vrot.slane %v4957_v25, %v3680_v11  ;;  %v5619_v22 = vld [vmem:[#allocation31_spill] sm:$0xff] }
 0x1a7   : > { %v1984_v0 = vrot.slane %v1983_v46, 2  ;;  %v1989_v7 = vadd.f32 %v1988_v1, %v1851_v60 }
 0x1a8   : > { %v2043_v59 = vpop.permute.xlu1 %2042  ;;  %v2039_v26 = vpop.permute.xlu0 %2038  ;;  %v2022_v60 = vsel %vm1462_vm0, %v1978_v56, %v1969_v32  ;;  %v5620_v56 = vld [vmem:[#allocation32_spill] sm:$0xff]  ;;  %v5623_v32 = vld [vmem:[#allocation35_spill] sm:$0xff] }
 0x1a9   : > { %v1990_v54 = vadd.f32 %v1989_v7, %v1852_v49  ;;  %v1985_v45 = vadd.f32 %v1984_v0, %v1983_v46  ;;  %v2338_v42 = vmul.f32 %v2043_v59, %v5612_v9  ;;  %v2337_v27 = vmul.f32 %v2039_v26, %v5613_v52  ;;  %v5616_v46 = vld [vmem:[#allocation27_spill] sm:$0xff]  ;;  %v5617_v59 = vld [vmem:[#allocation29_spill] sm:$0xff] }
 0x1aa   : > { %2316 = vbcast.lane.b32.xlu1 %v2302_v39, 280  ;;  %2312 = vbcast.lane.b32.xlu0 %v2302_v39, 272 }
 0x1ab   : > { %v1991_v63 = vrot.slane %v1990_v54, 4  ;;  %v1986_v2 = vrot.slane %v1985_v45, 1  ;;  %v2401_v7 = vadd.f32 %v2338_v42, %v2337_v27  ;;  %v5621_v42 = vld [vmem:[#allocation33_spill] sm:$0xff] }
 0x1ac   : > { %v2051_v12 = vpop.permute.xlu1 %2050  ;;  %v2047_v61 = vpop.permute.xlu0 %2046 }
 0x1ad   : > { %v1992_v29 = vadd.f32 %v1991_v63, %v1990_v54  ;;  %v1987_v40 = vadd.f32 %v1986_v2, %v1985_v45  ;;  %v2339_v1 = vmul.f32 %v2047_v61, %v5616_v46  ;;  %v2340_v2 = vmul.f32 %v2051_v12, %v5619_v22 }
 0x1ae   : > { %2327 = vbcast.lane.b32.xlu1 %v2321_v18, 264  ;;  %2323 = vbcast.lane.b32.xlu0 %v2321_v18, 256 }
 0x1af   : > { %v1993_v33 = vrot.slane %v1992_v29, 2  ;;  %v2023_v54 = vsel %vm1464_vm1, %v1987_v40, %v2022_v60  ;;  %v2402_v45 = vadd.f32 %v2401_v7, %v2339_v1 }
 0x1b0   : > { %v2062_v10 = vpop.permute.xlu1 %2061  ;;  %v2058_v47 = vpop.permute.xlu0 %2057 }
 0x1b1   : > { %v1994_v28 = vadd.f32 %v1993_v33, %v1992_v29  ;;  %v2342_v16 = vmul.f32 %v2062_v10, %v5614_v51  ;;  %v2341_v39 = vmul.f32 %v2058_v47, %v5615_v36  ;;  %v2604_v47 = vrot.slane %v4957_v25, %v3683_v13  ;;  %v5622_v36 = vld [vmem:[#allocation34_spill] sm:$0xff] }
 0x1b2   : > { %2335 = vbcast.lane.b32.xlu1 %v2321_v18, 280  ;;  %2331 = vbcast.lane.b32.xlu0 %v2321_v18, 272  ;;  %v5618_v18 = vld [vmem:[#allocation30_spill] sm:$0xff] }
 0x1b3   : > { %v1995_v53 = vrot.slane %v1994_v28, 1  ;;  %v2410_v50 = vadd.f32 %v2342_v16, %v2341_v39 }
 0x1b4   : > { %v2070_v14 = vpop.permute.xlu1 %2069  ;;  %v2066_v0 = vpop.permute.xlu0 %2065 }
 0x1b5   : > { %v1996_v49 = vadd.f32 %v1995_v53, %v1994_v28  ;;  %v2343_v26 = vmul.f32 %v2066_v0, %v5617_v59  ;;  %v2344_v63 = vmul.f32 %v2070_v14, %v5618_v18  ;;  %v2403_v28 = vadd.f32 %v2402_v45, %v2340_v2  ;;  %v5624_v14 = vld [vmem:[#allocation36_spill] sm:$0xff]  ;;  %v5627_v2 = vld [vmem:[#allocation41_spill] sm:$0xff] }
 0x1b6   : > { %2591 = vbcast.lane.b32.xlu1 %v2585_v6, 264  ;;  %2587 = vbcast.lane.b32.xlu0 %v2585_v6, 256 }
 0x1b7   : > { %v2024_v55 = vsel %vm1466_vm2, %v1996_v49, %v2023_v54  ;;  %v2411_v3 = vadd.f32 %v2410_v50, %v2343_v26  ;;  %v2404_v12 = vrot.slane %v2403_v28, 4  ;;  %v5625_v49 = vld [vmem:[#allocation37_spill] sm:$0xff]  ;;  %v2623_v50 = vrot.slane %v4957_v25, %v5493_v21 }
 0x1b8   : > { %2032 = vst [vmem:[%s4689_s17 + $0xc] sm:$0xf] %v2024_v55  ;;  %v2081_v61 = vpop.permute.xlu1 %2080  ;;  %v2077_v29 = vpop.permute.xlu0 %2076 }
 0x1b9   : > { %v2412_v33 = vadd.f32 %v2411_v3, %v2344_v63  ;;  %v2346_v9 = vmul.f32 %v2081_v61, %v5620_v56  ;;  %v2345_v10 = vmul.f32 %v2077_v29, %v5621_v42  ;;  %v2405_v59 = vadd.f32 %v2404_v12, %v2403_v28  ;;  %v5626_v3 = vld [vmem:[#allocation40_spill] sm:$0xff] }
 0x1ba   : > { %2599 = vbcast.lane.b32.xlu1 %v2585_v6, 280  ;;  %2595 = vbcast.lane.b32.xlu0 %v2585_v6, 272 }
 0x1bb   : > { %v2413_v51 = vrot.slane %v2412_v33, 4  ;;  %v2419_v16 = vadd.f32 %v2346_v9, %v2345_v10  ;;  %v2406_v29 = vrot.slane %v2405_v59, 2 }
 0x1bc   : > { %v2089_v52 = vpop.permute.xlu1 %2088  ;;  %v2085_v27 = vpop.permute.xlu0 %2084 }
 0x1bd   : > { %v2347_v39 = vmul.f32 %v2085_v27, %v5622_v36  ;;  %v2348_v40 = vmul.f32 %v2089_v52, %v5623_v32  ;;  %v2414_v60 = vadd.f32 %v2413_v51, %v2412_v33  ;;  %v2642_v52 = vrot.slane %v4957_v25, %v3689_v17 }
 0x1be   : > { %2610 = vbcast.lane.b32.xlu1 %v2604_v47, 264  ;;  %2606 = vbcast.lane.b32.xlu0 %v2604_v47, 256  ;;  %v2407_v27 = vadd.f32 %v2406_v29, %v2405_v59 }
 0x1bf   : > { %v2420_v53 = vadd.f32 %v2419_v16, %v2347_v39  ;;  %v2415_v45 = vrot.slane %v2414_v60, 2 }
 0x1c0   : > { %v2100_v46 = vpop.permute.xlu1 %2099  ;;  %v2096_v1 = vpop.permute.xlu0 %2095 }
 0x1c1   : > { %v2421_v6 = vadd.f32 %v2420_v53, %v2348_v40  ;;  %v2350_v0 = vmul.f32 %v2100_v46, %v5624_v14  ;;  %v2349_v7 = vmul.f32 %v2096_v1, %v5625_v49  ;;  %v2416_v10 = vadd.f32 %v2415_v45, %v2414_v60  ;;  %v4988_v46 = vld [vmem:[%s3833_s22 + $0x14] sm:$0xf]  ;;  %v5628_v1 = vld [vmem:[#allocation42_spill] sm:$0xff]  ;;  %v5632_v45 = vld [vmem:[#allocation47_spill] sm:$0xff] }
 0x1c2   : > { %2618 = vbcast.lane.b32.xlu1 %v2604_v47, 280  ;;  %2614 = vbcast.lane.b32.xlu0 %v2604_v47, 272  ;;  %v2408_v40 = vrot.slane %v2407_v27, 1 }
 0x1c3   : > { %v2422_v26 = vrot.slane %v2421_v6, 4  ;;  %v2428_v63 = vadd.f32 %v2350_v0, %v2349_v7  ;;  %v2417_v39 = vrot.slane %v2416_v10, 1 }
 0x1c4   : > { %v2108_v54 = vpop.permute.xlu1 %2107  ;;  %v2104_v55 = vpop.permute.xlu0 %2103 }
 0x1c5   : > { %v2423_v18 = vadd.f32 %v2422_v26, %v2421_v6  ;;  %v2351_v61 = vmul.f32 %v2104_v55, %v5626_v3  ;;  %v2352_v33 = vmul.f32 %v2108_v54, %v5627_v2  ;;  %v5629_v6 = vld [vmem:[#allocation43_spill] sm:$0xff]  ;;  %v2418_v25 = vadd.f32 %v2417_v39, %v2416_v10  ;;  %v5631_v26 = vld [vmem:[#allocation45_spill] sm:$0xff]  ;;  %v5635_v39 = vld [vmem:[#allocation46_spill] sm:$0xff] }
 0x1c6   : > { %2629 = vbcast.lane.b32.xlu1 %v2623_v50, 264  ;;  %2625 = vbcast.lane.b32.xlu0 %v2623_v50, 256  ;;  %v2409_v3 = vadd.f32 %v2408_v40, %v2407_v27 }
 0x1c7   : > { %v2424_v22 = vrot.slane %v2423_v18, 2  ;;  %v2429_v56 = vadd.f32 %v2428_v63, %v2351_v61  ;;  %v2661_v63 = vrot.slane %v4988_v46, %v3680_v11 }
 0x1c8   : > { %v2119_v9 = vpop.permute.xlu1 %2118  ;;  %v2115_v42 = vpop.permute.xlu0 %2114 }
 0x1c9   : > { %v2430_v47 = vadd.f32 %v2429_v56, %v2352_v33  ;;  %v2425_v28 = vadd.f32 %v2424_v22, %v2423_v18  ;;  %v2354_v60 = vmul.f32 %v2119_v9, %v5628_v1  ;;  %v2353_v14 = vmul.f32 %v2115_v42, %v5629_v6  ;;  %v5633_v42 = vld [vmem:[#allocation48_spill] sm:$0xff]  ;;  %v5636_v1 = vld [vmem:[#allocation50_spill] sm:$0xff]  ;;  %v5637_v6 = vld [vmem:[#allocation51_spill] sm:$0xff] }
 0x1ca   : > { %2637 = vbcast.lane.b32.xlu1 %v2623_v50, 280  ;;  %2633 = vbcast.lane.b32.xlu0 %v2623_v50, 272  ;;  %v5630_v50 = vld [vmem:[#allocation44_spill] sm:$0xff]  ;;  %v2561_v33 = vsel %vm1462_vm0, %v2418_v25, %v2409_v3  ;;  %v5011_v3 = vld [vmem:[%s3833_s22 + $0x18] sm:$0xf] }
 0x1cb   : > { %v2431_v51 = vrot.slane %v2430_v47, 4  ;;  %v2426_v32 = vrot.slane %v2425_v28, 1  ;;  %v2437_v29 = vadd.f32 %v2354_v60, %v2353_v14 }
 0x1cc   : > { %v2127_v16 = vpop.permute.xlu1 %2126  ;;  %v2123_v36 = vpop.permute.xlu0 %2122 }
 0x1cd   : > { %v2432_v12 = vadd.f32 %v2431_v51, %v2430_v47  ;;  %v2427_v55 = vadd.f32 %v2426_v32, %v2425_v28  ;;  %v2355_v18 = vmul.f32 %v2123_v36, %v5632_v45  ;;  %v5634_v51 = vld [vmem:[#allocation49_spill] sm:$0xff] }
 0x1ce   : > { %2648 = vbcast.lane.b32.xlu1 %v2642_v52, 264  ;;  %2644 = vbcast.lane.b32.xlu0 %v2642_v52, 256 }
 0x1cf   : > { %v2433_v53 = vrot.slane %v2432_v12, 2  ;;  %v2562_v47 = vsel %vm1464_vm1, %v2427_v55, %v2561_v33  ;;  %v2438_v28 = vadd.f32 %v2437_v29, %v2355_v18  ;;  %v5639_v55 = vld [vmem:[#allocation53_spill] sm:$0xff] }
 0x1d0   : > { %v2138_v0 = vpop.permute.xlu1 %2137  ;;  %v2134_v49 = vpop.permute.xlu0 %2133 }
 0x1d1   : > { %v2434_v7 = vadd.f32 %v2433_v53, %v2432_v12  ;;  %v2358_v59 = vmul.f32 %v2138_v0, %v5630_v50  ;;  %v2357_v54 = vmul.f32 %v2134_v49, %v5631_v26  ;;  %v2356_v12 = vmul.f32 %v2127_v16, %v5635_v39  ;;  %v5638_v26 = vld [vmem:[#allocation52_spill] sm:$0xff]  ;;  %v5642_v39 = vld [vmem:[#allocation38_spill] sm:$0xff] }
 0x1d2   : > { %2656 = vbcast.lane.b32.xlu1 %v2642_v52, 280  ;;  %2652 = vbcast.lane.b32.xlu0 %v2642_v52, 272  ;;  %v2680_v49 = vrot.slane %v4988_v46, %v3683_v13 }
 0x1d3   : > { %v2435_v61 = vrot.slane %v2434_v7, 1  ;;  %v2446_v9 = vadd.f32 %v2358_v59, %v2357_v54  ;;  %v2439_v0 = vadd.f32 %v2438_v28, %v2356_v12 }
 0x1d4   : > { %v2146_v22 = vpop.permute.xlu1 %2145  ;;  %v2142_v2 = vpop.permute.xlu0 %2141 }
 0x1d5   : > { %v2436_v56 = vadd.f32 %v2435_v61, %v2434_v7  ;;  %v2359_v10 = vmul.f32 %v2142_v2, %v5633_v42  ;;  %v2360_v27 = vmul.f32 %v2146_v22, %v5634_v51  ;;  %v2440_v54 = vrot.slane %v2439_v0, 4  ;;  %v5640_v2 = vld [vmem:[#allocation54_spill] sm:$0xff] }
 0x1d6   : > { %2667 = vbcast.lane.b32.xlu1 %v2661_v63, 264  ;;  %2663 = vbcast.lane.b32.xlu0 %v2661_v63, 256 }
 0x1d7   : > { %v2563_v52 = vsel %vm1466_vm2, %v2436_v56, %v2562_v47  ;;  %v2447_v36 = vadd.f32 %v2446_v9, %v2359_v10  ;;  %v5641_v56 = vld [vmem:[#allocation55_spill] sm:$0xff]  ;;  %v2441_v42 = vadd.f32 %v2440_v54, %v2439_v0  ;;  %v5017_v10 = vrot.slane %v5011_v3, %v3680_v11 }
 0x1d8   : > { %3386 = vst [vmem:[%s4068_s14 + $0x10] sm:$0xf] %v2563_v52  ;;  %v2157_v32 = vpop.permute.xlu1 %2156  ;;  %v2153_v40 = vpop.permute.xlu0 %2152 }
 0x1d9   : > { %v2448_v53 = vadd.f32 %v2447_v36, %v2360_v27  ;;  %v2362_v60 = vmul.f32 %v2157_v32, %v5636_v1  ;;  %v2361_v14 = vmul.f32 %v2153_v40, %v5637_v6  ;;  %v2442_v32 = vrot.slane %v2441_v42, 2  ;;  %v5643_v1 = vld [vmem:[#allocation14_spill] sm:$0xff] }
 0x1da   : > { %2675 = vbcast.lane.b32.xlu1 %v2661_v63, 280  ;;  %2671 = vbcast.lane.b32.xlu0 %v2661_v63, 272  ;;  %v5024_v40 = vrot.slane %v5011_v3, %v3683_v13 }
 0x1db   : > { %v2449_v25 = vrot.slane %v2448_v53, 4  ;;  %v2455_v59 = vadd.f32 %v2362_v60, %v2361_v14  ;;  %v5028_v14 = vld [vmem:[%s3833_s22 + $0x1c] sm:$0xf] }
 0x1dc   : > { %v2165_v7 = vpop.permute.xlu1 %2164  ;;  %v2161_v50 = vpop.permute.xlu0 %2160 }
 0x1dd   : > { %v2363_v16 = vmul.f32 %v2161_v50, %v5638_v26  ;;  %v2364_v45 = vmul.f32 %v2165_v7, %v5639_v55  ;;  %v2450_v61 = vadd.f32 %v2449_v25, %v2448_v53  ;;  %v2443_v50 = vadd.f32 %v2442_v32, %v2441_v42 }
 0x1de   : > { %2686 = vbcast.lane.b32.xlu1 %v2680_v49, 264  ;;  %2682 = vbcast.lane.b32.xlu0 %v2680_v49, 256  ;;  %v5034_v26 = vrot.slane %v5028_v14, %v3680_v11 }
 0x1df   : > { %v2456_v18 = vadd.f32 %v2455_v59, %v2363_v16  ;;  %v2451_v28 = vrot.slane %v2450_v61, 2 }
 0x1e0   : > { %v2176_v29 = vpop.permute.xlu1 %2175  ;;  %v2172_v63 = vpop.permute.xlu0 %2171 }
 0x1e1   : > { %v2457_v22 = vadd.f32 %v2456_v18, %v2364_v45  ;;  %v2366_v33 = vmul.f32 %v2176_v29, %v5640_v2  ;;  %v2365_v9 = vmul.f32 %v2172_v63, %v5641_v56  ;;  %v2452_v0 = vadd.f32 %v2451_v28, %v2450_v61 }
 0x1e2   : > { %2694 = vbcast.lane.b32.xlu1 %v2680_v49, 280  ;;  %2690 = vbcast.lane.b32.xlu0 %v2680_v49, 272  ;;  %v2444_v29 = vrot.slane %v2443_v50, 1  ;;  %v5040_v63 = vrot.slane %v5028_v14, %v3683_v13  ;;  %v5050_v13 = vrot.slane %v4988_v46, %v5493_v21 }
 0x1e3   : > { %v2458_v47 = vrot.slane %v2457_v22, 4  ;;  %v2464_v36 = vadd.f32 %v2366_v33, %v2365_v9  ;;  %v2453_v54 = vrot.slane %v2452_v0, 1  ;;  %v5644_v33 = vld [vmem:[#allocation39_spill] sm:$0xff] }
 0x1e4   : > { %v2184_v52 = vpop.permute.xlu1 %2183  ;;  %v2180_v51 = vpop.permute.xlu0 %2179 }
 0x1e5   : > { %v2459_v27 = vadd.f32 %v2458_v47, %v2457_v22  ;;  %v2367_v12 = vmul.f32 %v2180_v51, %v5642_v39  ;;  %v2368_v60 = vmul.f32 %v2184_v52, %v5643_v1  ;;  %v2454_v2 = vadd.f32 %v2453_v54, %v2452_v0  ;;  %v5645_v47 = vld [vmem:[#allocation56_spill] sm:$0xff]  ;;  %v5646_v52 = vld [vmem:[#allocation57_spill] sm:$0xff] }
 0x1e6   : > { %2743 = vbcast.lane.b32.xlu1 %v5017_v10, 264  ;;  %2739 = vbcast.lane.b32.xlu0 %v5017_v10, 256  ;;  %v2445_v39 = vadd.f32 %v2444_v29, %v2443_v50  ;;  %v5649_v50 = vld [vmem:[#allocation60_spill] sm:$0xff]  ;;  %v5060_v54 = vrot.slane %v5011_v3, %v5493_v21  ;;  %v5650_v29 = vld [vmem:[#allocation61_spill] sm:$0xff] }
 0x1e7   : > { %v2460_v53 = vrot.slane %v2459_v27, 2  ;;  %v2465_v6 = vadd.f32 %v2464_v36, %v2367_v12 }
 0x1e8   : > { %v2195_v49 = vpop.permute.xlu1 %2194  ;;  %v2191_v25 = vpop.permute.xlu0 %2190 }
 0x1e9   : > { %v2466_v7 = vadd.f32 %v2465_v6, %v2368_v60  ;;  %v2461_v59 = vadd.f32 %v2460_v53, %v2459_v27  ;;  %v2370_v11 = vmul.f32 %v2195_v49, %v5644_v33  ;;  %v2369_v28 = vmul.f32 %v2191_v25, %v5645_v47  ;;  %v5647_v27 = vld [vmem:[#allocation58_spill] sm:$0xff]  ;;  %v5648_v53 = vld [vmem:[#allocation59_spill] sm:$0xff] }
 0x1ea   : > { %2762 = vbcast.lane.b32.xlu1 %v5024_v40, 264  ;;  %2758 = vbcast.lane.b32.xlu0 %v5024_v40, 256  ;;  %v2564_v60 = vsel %vm1462_vm0, %v2454_v2, %v2445_v39 }
 0x1eb   : > { %v2467_v16 = vrot.slane %v2466_v7, 4  ;;  %v2462_v61 = vrot.slane %v2461_v59, 1  ;;  %v2473_v25 = vadd.f32 %v2370_v11, %v2369_v28  ;;  %v5651_v11 = vld [vmem:[#allocation28_spill] sm:$0xff]  ;;  %v5653_v28 = vld [vmem:[#allocation63_spill] sm:$0xff] }
 0x1ec   : > { %v2203_v55 = vpop.permute.xlu1 %2202  ;;  %v2199_v45 = vpop.permute.xlu0 %2198 }
 0x1ed   : > { %v2468_v18 = vadd.f32 %v2467_v16, %v2466_v7  ;;  %v2463_v12 = vadd.f32 %v2462_v61, %v2461_v59  ;;  %v2371_v1 = vmul.f32 %v2199_v45, %v5648_v53  ;;  %v5654_v53 = vld [vmem:[#allocation64_spill] sm:$0xff] }
 0x1ee   : > { %2819 = vbcast.lane.b32.xlu1 %v5034_v26, 264  ;;  %2815 = vbcast.lane.b32.xlu0 %v5034_v26, 256 }
 0x1ef   : > { %v2469_v22 = vrot.slane %v2468_v18, 2  ;;  %v2565_v16 = vsel %vm1464_vm1, %v2463_v12, %v2564_v60 }
 0x1f0   : > { %v2214_v56 = vpop.permute.xlu1 %2213  ;;  %v2210_v9 = vpop.permute.xlu0 %2209 }
 0x1f1   : > { %v2470_v42 = vadd.f32 %v2469_v22, %v2468_v18  ;;  %v2374_v51 = vmul.f32 %v2214_v56, %v5646_v52  ;;  %v2373_v36 = vmul.f32 %v2210_v9, %v5647_v27  ;;  %v2474_v18 = vadd.f32 %v2473_v25, %v2371_v1 }
 0x1f2   : > { %2838 = vbcast.lane.b32.xlu1 %v5040_v63, 264  ;;  %2834 = vbcast.lane.b32.xlu0 %v5040_v63, 256  ;;  %v2372_v56 = vmul.f32 %v2203_v55, %v5651_v11  ;;  %v5079_v1 = vrot.slane %v4988_v46, %v3689_v17 }
 0x1f3   : > { %v2471_v32 = vrot.slane %v2470_v42, 1  ;;  %v2482_v7 = vadd.f32 %v2374_v51, %v2373_v36  ;;  %v5072_v51 = vrot.slane %v5028_v14, %v5493_v21 }
 0x1f4   : > { %v2222_v6 = vpop.permute.xlu1 %2221  ;;  %v2218_v0 = vpop.permute.xlu0 %2217  ;;  %v2475_v27 = vadd.f32 %v2474_v18, %v2372_v56  ;;  %v5658_v56 = vld [vmem:[#allocation68_spill] sm:$0xff] }
 0x1f5   : > { %v2472_v49 = vadd.f32 %v2471_v32, %v2470_v42  ;;  %v2375_v59 = vmul.f32 %v2218_v0, %v5649_v50  ;;  %v2376_v61 = vmul.f32 %v2222_v6, %v5650_v29  ;;  %v5652_v42 = vld [vmem:[#allocation62_spill] sm:$0xff]  ;;  %v5655_v6 = vld [vmem:[#allocation65_spill] sm:$0xff] }
 0x1f6   : > { %2705 = vbcast.lane.b32.xlu1 %v5050_v13, 264  ;;  %2701 = vbcast.lane.b32.xlu0 %v5050_v13, 256  ;;  %v2476_v60 = vrot.slane %v2475_v27, 4 }
 0x1f7   : > { %v2566_v45 = vsel %vm1466_vm2, %v2472_v49, %v2565_v16  ;;  %v2483_v22 = vadd.f32 %v2482_v7, %v2375_v59  ;;  %v5656_v59 = vld [vmem:[#allocation66_spill] sm:$0xff] }
 0x1f8   : > { %3387 = vst [vmem:[%s4068_s14 + $0x14] sm:$0xf] %v2566_v45  ;;  %v2233_v2 = vpop.permute.xlu1 %2232  ;;  %v2229_v33 = vpop.permute.xlu0 %2228  ;;  %v5657_v45 = vld [vmem:[#allocation67_spill] sm:$0xff]  ;;  %v2477_v29 = vadd.f32 %v2476_v60, %v2475_v27 }
 0x1f9   : > { %v2484_v9 = vadd.f32 %v2483_v22, %v2376_v61  ;;  %v2378_v47 = vmul.f32 %v2233_v2, %v5652_v42  ;;  %v2377_v52 = vmul.f32 %v2229_v33, %v5653_v28 }
 0x1fa   : > { %2781 = vbcast.lane.b32.xlu1 %v5060_v54, 264  ;;  %2777 = vbcast.lane.b32.xlu0 %v5060_v54, 256 }
 0x1fb   : > { %v2485_v12 = vrot.slane %v2484_v9, 4  ;;  %v2491_v32 = vadd.f32 %v2378_v47, %v2377_v52  ;;  %v2478_v47 = vrot.slane %v2477_v29, 2  ;;  %v5659_v52 = vld [vmem:[#allocation69_spill] sm:$0xff] }
 0x1fc   : > { %v2241_v36 = vpop.permute.xlu1 %2240  ;;  %v2237_v39 = vpop.permute.xlu0 %2236 }
 0x1fd   : > { %v2379_v55 = vmul.f32 %v2237_v39, %v5654_v53  ;;  %v2380_v0 = vmul.f32 %v2241_v36, %v5655_v6  ;;  %v2486_v7 = vadd.f32 %v2485_v12, %v2484_v9  ;;  %v5091_v9 = vrot.slane %v5011_v3, %v3689_v17 }
 0x1fe   : > { %2857 = vbcast.lane.b32.xlu1 %v5072_v51, 264  ;;  %2853 = vbcast.lane.b32.xlu0 %v5072_v51, 256  ;;  %v2479_v60 = vadd.f32 %v2478_v47, %v2477_v29 }
 0x1ff   : > { %v2492_v21 = vadd.f32 %v2491_v32, %v2379_v55  ;;  %v2487_v2 = vrot.slane %v2486_v7, 2 }
 0x200   : > { %v2252_v49 = vpop.permute.xlu1 %2251  ;;  %v2248_v25 = vpop.permute.xlu0 %2247 }
 0x201   : > { %v2493_v50 = vadd.f32 %v2492_v21, %v2380_v0  ;;  %v2382_v16 = vmul.f32 %v2252_v49, %v5656_v59  ;;  %v2381_v18 = vmul.f32 %v2248_v25, %v5657_v45  ;;  %v2488_v32 = vadd.f32 %v2487_v2, %v2486_v7 }
 0x202   : > { %2724 = vbcast.lane.b32.xlu1 %v5079_v1, 264  ;;  %2720 = vbcast.lane.b32.xlu0 %v5079_v1, 256  ;;  %v5100_v7 = vrot.slane %v5028_v14, %v3689_v17 }
 0x203   : > { %v2494_v61 = vrot.slane %v2493_v50, 4  ;;  %v2500_v11 = vadd.f32 %v2382_v16, %v2381_v18  ;;  %v2489_v3 = vrot.slane %v2488_v32, 1  ;;  %v5660_v16 = vld [vmem:[#allocation15_spill] sm:$0xff]  ;;  %v5661_v18 = vld [vmem:[#allocation16_spill] sm:$0xff] }
 0x204   : > { %v2260_v46 = vpop.permute.xlu1 %2259  ;;  %v2256_v22 = vpop.permute.xlu0 %2255 }
 0x205   : > { %v2495_v33 = vadd.f32 %v2494_v61, %v2493_v50  ;;  %v2383_v42 = vmul.f32 %v2256_v22, %v5658_v56  ;;  %v2384_v27 = vmul.f32 %v2260_v46, %v5659_v52  ;;  %v2480_v50 = vrot.slane %v2479_v60, 1  ;;  %v5663_v56 = vld [vmem:[#allocation18_spill] sm:$0xff] }
 0x206   : > { %2766 = vbcast.lane.b32.xlu1 %v5024_v40, 272  ;;  %2747 = vbcast.lane.b32.xlu0 %v5017_v10, 272  ;;  %v2490_v22 = vadd.f32 %v2489_v3, %v2488_v32 }
 0x207   : > { %v2496_v28 = vrot.slane %v2495_v33, 2  ;;  %v2501_v36 = vadd.f32 %v2500_v11, %v2383_v42  ;;  %v2481_v17 = vadd.f32 %v2480_v50, %v2479_v60 }
 0x208   : > { %v2271_v39 = vpop.permute.xlu1 %2270  ;;  %v2267_v12 = vpop.permute.xlu0 %2266 }
 0x209   : > { %v2502_v53 = vadd.f32 %v2501_v36, %v2384_v27  ;;  %v2497_v55 = vadd.f32 %v2496_v28, %v2495_v33  ;;  %v2386_v45 = vmul.f32 %v2271_v39, %v5660_v16  ;;  %v2385_v29 = vmul.f32 %v2267_v12, %v5661_v18  ;;  %v5662_v33 = vld [vmem:[#allocation17_spill] sm:$0xff]  ;;  %v5664_v28 = vld [vmem:[#allocation20_spill] sm:$0xff] }
 0x20a   : > { %2800 = vbcast.lane.b32.xlu1 %v5091_v9, 264  ;;  %2796 = vbcast.lane.b32.xlu0 %v5091_v9, 256  ;;  %v2567_v12 = vsel %vm1462_vm0, %v2490_v22, %v2481_v17  ;;  %v5669_v22 = vld [vmem:[#allocation71_spill] sm:$0xff] }
 0x20b   : > { %v2503_v6 = vrot.slane %v2502_v53, 4  ;;  %v2498_v25 = vrot.slane %v2497_v55, 1  ;;  %v2509_v27 = vadd.f32 %v2386_v45, %v2385_v29 }
 0x20c   : > { %v2279_v0 = vpop.permute.xlu1 %2278  ;;  %v2275_v21 = vpop.permute.xlu0 %2274 }
 0x20d   : > { %v2504_v49 = vadd.f32 %v2503_v6, %v2502_v53  ;;  %v2499_v47 = vadd.f32 %v2498_v25, %v2497_v55  ;;  %v2387_v52 = vmul.f32 %v2275_v21, %v5664_v28  ;;  %v5665_v6 = vld [vmem:[#allocation19_spill] sm:$0xff]  ;;  %v5666_v21 = vld [vmem:[#allocation26_spill] sm:$0xff]  ;;  %v5670_v28 = vld [vmem:[#allocation72_spill] sm:$0xff] }
 0x20e   : > { %2842 = vbcast.lane.b32.xlu1 %v5040_v63, 272  ;;  %2823 = vbcast.lane.b32.xlu0 %v5034_v26, 272 }
 0x20f   : > { %v2505_v59 = vrot.slane %v2504_v49, 2  ;;  %v2568_v55 = vsel %vm1464_vm1, %v2499_v47, %v2567_v12 }
 0x210   : > { %v2290_v61 = vpop.permute.xlu1 %2289  ;;  %v2286_v46 = vpop.permute.xlu0 %2285 }
 0x211   : > { %v2506_v2 = vadd.f32 %v2505_v59, %v2504_v49  ;;  %v2390_v11 = vmul.f32 %v2290_v61, %v5662_v33  ;;  %v2389_v42 = vmul.f32 %v2286_v46, %v5663_v56  ;;  %v2510_v49 = vadd.f32 %v2509_v27, %v2387_v52  ;;  %v5667_v59 = vld [vmem:[#allocation22_spill] sm:$0xff] }
 0x212   : > { %2876 = vbcast.lane.b32.xlu1 %v5100_v7, 264  ;;  %2872 = vbcast.lane.b32.xlu0 %v5100_v7, 256  ;;  %v2388_v16 = vmul.f32 %v2279_v0, %v5667_v59  ;;  %v5668_v61 = vld [vmem:[#allocation70_spill] sm:$0xff]  ;;  %v5671_v0 = vld [vmem:[#allocation73_spill] sm:$0xff]  ;;  %v5674_v59 = vld [vmem:[#allocation76_spill] sm:$0xff] }
 0x213   : > { %v2507_v14 = vrot.slane %v2506_v2, 1  ;;  %v2518_v53 = vadd.f32 %v2390_v11, %v2389_v42 }
 0x214   : > { %v2298_v36 = vpop.permute.xlu1 %2297  ;;  %v2294_v39 = vpop.permute.xlu0 %2293  ;;  %v2511_v33 = vadd.f32 %v2510_v49, %v2388_v16 }
 0x215   : > { %v2508_v32 = vadd.f32 %v2507_v14, %v2506_v2  ;;  %v2391_v3 = vmul.f32 %v2294_v39, %v5665_v6  ;;  %v2392_v25 = vmul.f32 %v2298_v36, %v5666_v21 }
 0x216   : > { %2785 = vbcast.lane.b32.xlu1 %v5060_v54, 272  ;;  %2709 = vbcast.lane.b32.xlu0 %v5050_v13, 272  ;;  %v2512_v17 = vrot.slane %v2511_v33, 4 }
 0x217   : > { %v2569_v60 = vsel %vm1466_vm2, %v2508_v32, %v2568_v55  ;;  %v2519_v50 = vadd.f32 %v2518_v53, %v2391_v3  ;;  %v5672_v53 = vld [vmem:[#allocation74_spill] sm:$0xff]  ;;  %v5673_v3 = vld [vmem:[#allocation75_spill] sm:$0xff] }
 0x218   : > { %3388 = vst [vmem:[%s4068_s14 + $0x18] sm:$0xf] %v2569_v60  ;;  %v2309_v45 = vpop.permute.xlu1 %2308  ;;  %v2305_v18 = vpop.permute.xlu0 %2304  ;;  %v2513_v49 = vadd.f32 %v2512_v17, %v2511_v33 }
 0x219   : > { %v2520_v29 = vadd.f32 %v2519_v50, %v2392_v25  ;;  %v2394_v46 = vmul.f32 %v2309_v45, %v5668_v61  ;;  %v2393_v2 = vmul.f32 %v2305_v18, %v5669_v22 }
 0x21a   : > { %2728 = vbcast.lane.b32.xlu1 %v5079_v1, 272  ;;  %2861 = vbcast.lane.b32.xlu0 %v5072_v51, 272  ;;  %v2514_v45 = vrot.slane %v2513_v49, 2 }
 0x21b   : > { %v2521_v11 = vrot.slane %v2520_v29, 4  ;;  %v2527_v47 = vadd.f32 %v2394_v46, %v2393_v2 }
 0x21c   : > { %v2317_v56 = vpop.permute.xlu1 %2316  ;;  %v2313_v42 = vpop.permute.xlu0 %2312 }
 0x21d   : > { %v2395_v52 = vmul.f32 %v2313_v42, %v5670_v28  ;;  %v2396_v14 = vmul.f32 %v2317_v56, %v5671_v0  ;;  %v2522_v36 = vadd.f32 %v2521_v11, %v2520_v29  ;;  %v5675_v29 = vld [vmem:[#allocation77_spill] sm:$0xff]  ;;  %v2515_v11 = vadd.f32 %v2514_v45, %v2513_v49 }
 0x21e   : > { %2770 = vbcast.lane.b32.xlu1 %v5024_v40, 280  ;;  %2751 = vbcast.lane.b32.xlu0 %v5017_v10, 280 }
 0x21f   : > { %v2528_v27 = vadd.f32 %v2527_v47, %v2395_v52  ;;  %v2523_v40 = vrot.slane %v2522_v36, 2 }
 0x220   : > { %v2328_v39 = vpop.permute.xlu1 %2327  ;;  %v2324_v12 = vpop.permute.xlu0 %2323 }
 0x221   : > { %v2529_v32 = vadd.f32 %v2528_v27, %v2396_v14  ;;  %v2398_v6 = vmul.f32 %v2328_v39, %v5672_v53  ;;  %v2397_v55 = vmul.f32 %v2324_v12, %v5673_v3  ;;  %v5677_v53 = vld [vmem:[#allocation82_spill] sm:$0xff] }
 0x222   : > { %2827 = vbcast.lane.b32.xlu1 %v5034_v26, 280  ;;  %2804 = vbcast.lane.b32.xlu0 %v5091_v9, 272  ;;  %v2524_v26 = vadd.f32 %v2523_v40, %v2522_v36  ;;  %v5676_v36 = vld [vmem:[#allocation80_spill] sm:$0xff] }
 0x223   : > { %v2530_v60 = vrot.slane %v2529_v32, 4  ;;  %v2536_v50 = vadd.f32 %v2398_v6, %v2397_v55  ;;  %v5678_v6 = vld [vmem:[#allocation84_spill] sm:$0xff]  ;;  %v5679_v55 = vld [vmem:[#allocation86_spill] sm:$0xff] }
 0x224   : > { %v2336_v21 = vpop.permute.xlu1 %2335  ;;  %v2332_v10 = vpop.permute.xlu0 %2331  ;;  %v2525_v47 = vrot.slane %v2524_v26, 1 }
 0x225   : > { %v2531_v25 = vadd.f32 %v2530_v60, %v2529_v32  ;;  %v2399_v16 = vmul.f32 %v2332_v10, %v5674_v59  ;;  %v2400_v61 = vmul.f32 %v2336_v21, %v5675_v29 }
 0x226   : > { %2880 = vbcast.lane.b32.xlu1 %v5100_v7, 272  ;;  %2846 = vbcast.lane.b32.xlu0 %v5040_v63, 280  ;;  %v2516_v63 = vrot.slane %v2515_v11, 1  ;;  %v2526_v27 = vadd.f32 %v2525_v47, %v2524_v26  ;;  %v5682_v26 = vld [vmem:[#allocation94_spill] sm:$0xff]  ;;  %v5684_v47 = vld [vmem:[#allocation95_spill] sm:$0xff] }
 0x227   : > { %v2532_v18 = vrot.slane %v2531_v25, 2  ;;  %v2537_v46 = vadd.f32 %v2536_v50, %v2399_v16 }
 0x228   : > { %v2592_v22 = vpop.permute.xlu1 %2591  ;;  %v2588_v2 = vpop.permute.xlu0 %2587  ;;  %v2517_v60 = vadd.f32 %v2516_v63, %v2515_v11  ;;  %v5683_v11 = vld [vmem:[#allocation93_spill] sm:$0xff] }
 0x229   : > { %v2538_v33 = vadd.f32 %v2537_v46, %v2400_v61  ;;  %v2533_v56 = vadd.f32 %v2532_v18, %v2531_v25  ;;  %v2887_v39 = vmul.f32 %v2592_v22, %v5676_v36  ;;  %v5681_v18 = vld [vmem:[#allocation92_spill] sm:$0xff] }
 0x22a   : > { %2789 = vbcast.lane.b32.xlu1 %v5060_v54, 280  ;;  %2713 = vbcast.lane.b32.xlu0 %v5050_v13, 280  ;;  %v2886_v13 = vmul.f32 %v2588_v2, %v5677_v53  ;;  %v2570_v10 = vsel %vm1462_vm0, %v2526_v27, %v2517_v60  ;;  %v5687_v53 = vld [vmem:[#allocation98_spill] sm:$0xff]  ;;  %v5688_v60 = vld [vmem:[#allocation99_spill] sm:$0xff] }
 0x22b   : > { %v2539_v42 = vrot.slane %v2538_v33, 4  ;;  %v2534_v0 = vrot.slane %v2533_v56, 1 }
 0x22c   : > { %v2600_v28 = vpop.permute.xlu1 %2599  ;;  %v2596_v52 = vpop.permute.xlu0 %2595  ;;  %v2950_v16 = vadd.f32 %v2887_v39, %v2886_v13 }
 0x22d   : > { %v2540_v17 = vadd.f32 %v2539_v42, %v2538_v33  ;;  %v2535_v40 = vadd.f32 %v2534_v0, %v2533_v56  ;;  %v2889_v56 = vmul.f32 %v2600_v28, %v5683_v11 }
 0x22e   : > { %2732 = vbcast.lane.b32.xlu1 %v5079_v1, 280  ;;  %2865 = vbcast.lane.b32.xlu0 %v5072_v51, 280  ;;  %v5680_v1 = vld [vmem:[#allocation89_spill] sm:$0xff] }
 0x22f   : > { %v2541_v14 = vrot.slane %v2540_v17, 2  ;;  %v2888_v21 = vmul.f32 %v2596_v52, %v5680_v1  ;;  %v2571_v61 = vsel %vm1464_vm1, %v2535_v40, %v2570_v10 }
 0x230   : > { %v2611_v12 = vpop.permute.xlu1 %2610  ;;  %v2607_v32 = vpop.permute.xlu0 %2606 }
 0x231   : > { %v2542_v54 = vadd.f32 %v2541_v14, %v2540_v17  ;;  %v2891_v3 = vmul.f32 %v2611_v12, %v5678_v6  ;;  %v2890_v49 = vmul.f32 %v2607_v32, %v5679_v55  ;;  %v5685_v17 = vld [vmem:[#allocation96_spill] sm:$0xff]  ;;  %v5686_v12 = vld [vmem:[#allocation97_spill] sm:$0xff] }
 0x232   : > { %2884 = vbcast.lane.b32.xlu1 %v5100_v7, 280  ;;  %2808 = vbcast.lane.b32.xlu0 %v5091_v9, 280  ;;  %v2951_v7 = vadd.f32 %v2950_v16, %v2888_v21 }
 0x233   : > { %v2543_v51 = vrot.slane %v2542_v54, 1  ;;  %v2959_v45 = vadd.f32 %v2891_v3, %v2890_v49 }
 0x234   : > { %v2619_v25 = vpop.permute.xlu1 %2618  ;;  %v2615_v50 = vpop.permute.xlu0 %2614  ;;  %v2952_v0 = vadd.f32 %v2951_v7, %v2889_v56  ;;  %v5691_v7 = vld [vmem:[#allocation103_spill] sm:$0xff]  ;;  %v5692_v56 = vld [vmem:[#allocation104_spill] sm:$0xff] }
 0x235   : > { %v2544_v59 = vadd.f32 %v2543_v51, %v2542_v54  ;;  %v2892_v29 = vmul.f32 %v2615_v50, %v5681_v18  ;;  %v2893_v22 = vmul.f32 %v2619_v25, %v5682_v26  ;;  %v5689_v51 = vld [vmem:[#allocation100_spill] sm:$0xff]  ;;  %v5690_v18 = vld [vmem:[#allocation101_spill] sm:$0xff] }
 0x236   : > { %v2953_v54 = vrot.slane %v2952_v0, 4 }
 0x237   : > { %v2572_v46 = vsel %vm1466_vm2, %v2544_v59, %v2571_v61  ;;  %v2960_v9 = vadd.f32 %v2959_v45, %v2892_v29 }
 0x238   : > { %3389 = vst [vmem:[%s4068_s14 + $0x1c] sm:$0xf] %v2572_v46  ;;  %v2630_v2 = vpop.permute.xlu1 %2629  ;;  %v2626_v33 = vpop.permute.xlu0 %2625  ;;  %v2954_v21 = vadd.f32 %v2953_v54, %v2952_v0 }
 0x239   : > { %v2961_v42 = vadd.f32 %v2960_v9, %v2893_v22  ;;  %v2895_v52 = vmul.f32 %v2630_v2, %v5684_v47  ;;  %v2894_v63 = vmul.f32 %v2626_v33, %v5685_v17  ;;  %v5693_v47 = vld [vmem:[#allocation105_spill] sm:$0xff] }
 0x23a   : > { %v2955_v61 = vrot.slane %v2954_v21, 2 }
 0x23b   : > { %v2962_v14 = vrot.slane %v2961_v42, 4  ;;  %v2968_v39 = vadd.f32 %v2895_v52, %v2894_v63 }
 0x23c   : > { %v2638_v27 = vpop.permute.xlu1 %2637  ;;  %v2634_v36 = vpop.permute.xlu0 %2633  ;;  %v2956_v63 = vadd.f32 %v2955_v61, %v2954_v21  ;;  %v5696_v21 = vld [vmem:[#allocation106_spill] sm:$0xff] }
 0x23d   : > { %v2896_v32 = vmul.f32 %v2634_v36, %v5686_v12  ;;  %v2897_v13 = vmul.f32 %v2638_v27, %v5687_v53  ;;  %v2963_v3 = vadd.f32 %v2962_v14, %v2961_v42 }
 0x23f   : > { %v2969_v6 = vadd.f32 %v2968_v39, %v2896_v32  ;;  %v2964_v25 = vrot.slane %v2963_v3, 2  ;;  %v5694_v32 = vld [vmem:[#allocation108_spill] sm:$0xff] }
 0x240   : > { %v2649_v55 = vpop.permute.xlu1 %2648  ;;  %v2645_v49 = vpop.permute.xlu0 %2644 }
 0x241   : > { %v2970_v28 = vadd.f32 %v2969_v6, %v2897_v13  ;;  %v2899_v40 = vmul.f32 %v2649_v55, %v5688_v60  ;;  %v2898_v1 = vmul.f32 %v2645_v49, %v5689_v51  ;;  %v2965_v9 = vadd.f32 %v2964_v25, %v2963_v3  ;;  %v5695_v3 = vld [vmem:[#allocation110_spill] sm:$0xff]  ;;  %v5697_v25 = vld [vmem:[#allocation107_spill] sm:$0xff] }
 0x242   : > { %v2957_v13 = vrot.slane %v2956_v63, 1 }
 0x243   : > { %v2971_v10 = vrot.slane %v2970_v28, 4  ;;  %v2977_v45 = vadd.f32 %v2899_v40, %v2898_v1  ;;  %v2966_v27 = vrot.slane %v2965_v9, 1 }
 0x244   : > { %v2657_v50 = vpop.permute.xlu1 %2656  ;;  %v2653_v59 = vpop.permute.xlu0 %2652 }
 0x245   : > { %v2972_v16 = vadd.f32 %v2971_v10, %v2970_v28  ;;  %v2900_v29 = vmul.f32 %v2653_v59, %v5690_v18  ;;  %v2901_v26 = vmul.f32 %v2657_v50, %v5691_v7  ;;  %v2967_v28 = vadd.f32 %v2966_v27, %v2965_v9  ;;  %v5698_v9 = vld [vmem:[#allocation109_spill] sm:$0xff] }
 0x247   : > { %v2973_v46 = vrot.slane %v2972_v16, 2  ;;  %v2978_v22 = vadd.f32 %v2977_v45, %v2900_v29 }
 0x248   : > { %v2668_v2 = vpop.permute.xlu1 %2667  ;;  %v2664_v33 = vpop.permute.xlu0 %2663 }
 0x249   : > { %v2979_v11 = vadd.f32 %v2978_v22, %v2901_v26  ;;  %v2903_v42 = vmul.f32 %v2668_v2, %v5692_v56  ;;  %v2902_v52 = vmul.f32 %v2664_v33, %v5693_v47  ;;  %v2974_v17 = vadd.f32 %v2973_v46, %v2972_v16  ;;  %v5699_v56 = vld [vmem:[#allocation111_spill] sm:$0xff] }
 0x24a   : > { %v2958_v16 = vadd.f32 %v2957_v13, %v2956_v63 }
 0x24b   : > { %v2980_v0 = vrot.slane %v2979_v11, 4  ;;  %v2986_v14 = vadd.f32 %v2903_v42, %v2902_v52  ;;  %v2975_v53 = vrot.slane %v2974_v17, 1 }
 0x24c   : > { %v2676_v36 = vpop.permute.xlu1 %2675  ;;  %v2672_v39 = vpop.permute.xlu0 %2671  ;;  %v3110_v7 = vsel %vm1462_vm0, %v2967_v28, %v2958_v16 }
 0x24d   : > { %v2981_v12 = vadd.f32 %v2980_v0, %v2979_v11  ;;  %v2904_v54 = vmul.f32 %v2672_v39, %v5694_v32  ;;  %v2905_v55 = vmul.f32 %v2676_v36, %v5695_v3  ;;  %v2976_v59 = vadd.f32 %v2975_v53, %v2974_v17 }
 0x24f   : > { %v2982_v6 = vrot.slane %v2981_v12, 2  ;;  %v2987_v49 = vadd.f32 %v2986_v14, %v2904_v54  ;;  %v3111_v33 = vsel %vm1464_vm1, %v2976_v59, %v3110_v7 }
 0x250   : > { %v2687_v60 = vpop.permute.xlu1 %2686  ;;  %v2683_v40 = vpop.permute.xlu0 %2682 }
 0x251   : > { %v2983_v51 = vadd.f32 %v2982_v6, %v2981_v12  ;;  %v2988_v1 = vadd.f32 %v2987_v49, %v2905_v55  ;;  %v2907_v10 = vmul.f32 %v2687_v60, %v5696_v21  ;;  %v2906_v50 = vmul.f32 %v2683_v40, %v5697_v25 }
 0x253   : > { %v2984_v45 = vrot.slane %v2983_v51, 1  ;;  %v2989_v18 = vrot.slane %v2988_v1, 4  ;;  %v2995_v29 = vadd.f32 %v2907_v10, %v2906_v50 }
 0x254   : > { %v2695_v61 = vpop.permute.xlu1 %2694  ;;  %v2691_v46 = vpop.permute.xlu0 %2690 }
 0x255   : > { %v2985_v26 = vadd.f32 %v2984_v45, %v2983_v51  ;;  %v2990_v22 = vadd.f32 %v2989_v18, %v2988_v1  ;;  %v2908_v2 = vmul.f32 %v2691_v46, %v5698_v9  ;;  %v2909_v42 = vmul.f32 %v2695_v61, %v5699_v56 }
 0x257   : > { %v3112_v11 = vsel %vm1466_vm2, %v2985_v26, %v3111_v33  ;;  %v2996_v47 = vadd.f32 %v2995_v29, %v2908_v2  ;;  %v2991_v63 = vrot.slane %v2990_v22, 2 }
 0x258   : > { %3390 = vst [vmem:[%s4689_s17 + $0x10] sm:$0xf] %v3112_v11  ;;  %v2744_v52 = vpop.permute.xlu1 %2743  ;;  %v2740_v17 = vpop.permute.xlu0 %2739 }
 0x259   : > { %v2997_v0 = vadd.f32 %v2996_v47, %v2909_v42  ;;  %v2919_v14 = vmul.f32 %v2744_v52, %v4745_v5  ;;  %v2918_v27 = vmul.f32 %v2740_v17, %v4751_v30  ;;  %v2992_v54 = vadd.f32 %v2991_v63, %v2990_v22  ;;  %v5700_v52 = vld [vmem:[#allocation119_spill] sm:$0xff] }
 0x25b   : > { %v2998_v36 = vrot.slane %v2997_v0, 4  ;;  %v3022_v39 = vadd.f32 %v2919_v14, %v2918_v27  ;;  %v2993_v60 = vrot.slane %v2992_v54, 1 }
 0x25c   : > { %v2763_v12 = vpop.permute.xlu1 %2762  ;;  %v2759_v32 = vpop.permute.xlu0 %2758 }
 0x25d   : > { %v2999_v53 = vadd.f32 %v2998_v36, %v2997_v0  ;;  %v2923_v13 = vmul.f32 %v2763_v12, %v4754_v31  ;;  %v2922_v6 = vmul.f32 %v2759_v32, %v4757_v20  ;;  %v2994_v30 = vadd.f32 %v2993_v60, %v2992_v54  ;;  %v5701_v32 = vld [vmem:[#allocation121_spill] sm:$0xff] }
 0x25f   : > { %v3000_v3 = vrot.slane %v2999_v53, 2  ;;  %v3031_v55 = vadd.f32 %v2923_v13, %v2922_v6 }
 0x260   : > { %v2820_v49 = vpop.permute.xlu1 %2819  ;;  %v2816_v28 = vpop.permute.xlu0 %2815 }
 0x261   : > { %v3001_v40 = vadd.f32 %v3000_v3, %v2999_v53  ;;  %v2935_v63 = vmul.f32 %v2820_v49, %v4859_v43  ;;  %v2934_v0 = vmul.f32 %v2816_v28, %v4862_v23  ;;  %v5702_v53 = vld [vmem:[#allocation120_spill] sm:$0xff]  ;;  %v5704_v23 = vld [vmem:[#allocation113_spill] sm:$0xff] }
 0x263   : > { %v3002_v51 = vrot.slane %v3001_v40, 1  ;;  %v3058_v6 = vadd.f32 %v2935_v63, %v2934_v0 }
 0x264   : > { %v2839_v5 = vpop.permute.xlu1 %2838  ;;  %v2835_v1 = vpop.permute.xlu0 %2834 }
 0x265   : > { %v3003_v21 = vadd.f32 %v3002_v51, %v3001_v40  ;;  %v2939_v3 = vmul.f32 %v2839_v5, %v4866_v35  ;;  %v5703_v40 = vld [vmem:[#allocation112_spill] sm:$0xff] }
 0x267   : > { %v5177_v10 = vsel %vm1462_vm0, %v3003_v21, %v2994_v30  ;;  %v5705_v30 = vld [vmem:[#allocation122_spill] sm:$0xff] }
 0x268   : > { %v2706_v25 = vpop.permute.xlu1 %2705  ;;  %v2702_v50 = vpop.permute.xlu0 %2701 }
 0x269   : > { %v2911_v51 = vmul.f32 %v2706_v25, %v5703_v40  ;;  %v2910_v28 = vmul.f32 %v2702_v50, %v5704_v23  ;;  %v5713_v23 = vld [vmem:[#allocation118_spill] sm:$0xff] }
 0x26c   : > { %v2782_v59 = vpop.permute.xlu1 %2781  ;;  %v2778_v31 = vpop.permute.xlu0 %2777 }
 0x270   : > { %v2858_v16 = vpop.permute.xlu1 %2857  ;;  %v2854_v20 = vpop.permute.xlu0 %2853 }
 0x271   : > { %v2942_v35 = vmul.f32 %v2854_v20, %v4904_v4  ;;  %v5711_v4 = vld [vmem:[#allocation124_spill] sm:$0xff] }
 0x274   : > { %v2725_v45 = vpop.permute.xlu1 %2724  ;;  %v2721_v18 = vpop.permute.xlu0 %2720 }
 0x278   : > { %v2767_v29 = vpop.permute.xlu1 %2766  ;;  %v2748_v61 = vpop.permute.xlu0 %2747 }
 0x279   : > { %v2924_v47 = vmul.f32 %v2767_v29, %v4767_v44  ;;  %v2920_v17 = vmul.f32 %v2748_v61, %v5700_v52  ;;  %v2938_v44 = vmul.f32 %v2835_v1, %v4869_v19  ;;  %v2943_v29 = vmul.f32 %v2858_v16, %v4901_v62  ;;  %v5707_v1 = vld [vmem:[#allocation116_spill] sm:$0xff] }
 0x27a   : > { %v2915_v25 = vmul.f32 %v2725_v45, %v5707_v1 }
 0x27b   : > { %v3032_v36 = vadd.f32 %v3031_v55, %v2924_v47  ;;  %v3023_v12 = vadd.f32 %v3022_v39, %v2920_v17  ;;  %v2927_v55 = vmul.f32 %v2782_v59, %v5705_v30  ;;  %v5706_v39 = vld [vmem:[#allocation123_spill] sm:$0xff]  ;;  %v5709_v59 = vld [vmem:[#allocation126_spill] sm:$0xff]  ;;  %v3076_v45 = vadd.f32 %v2943_v29, %v2942_v35 }
 0x27c   : > { %v2801_v46 = vpop.permute.xlu1 %2800  ;;  %v2797_v7 = vpop.permute.xlu0 %2796  ;;  %v2926_v21 = vmul.f32 %v2778_v31, %v5706_v39  ;;  %v5710_v31 = vld [vmem:[#allocation127_spill] sm:$0xff]  ;;  %v5714_v39 = vld [vmem:[#allocation125_spill] sm:$0xff] }
 0x27d   : > { %v2931_v63 = vmul.f32 %v2801_v46, %v5709_v59  ;;  %v2930_v0 = vmul.f32 %v2797_v7, %v5710_v31 }
 0x27f   : > { %v3049_v7 = vadd.f32 %v2931_v63, %v2930_v0 }
 0x280   : > { %v2843_v26 = vpop.permute.xlu1 %2842  ;;  %v2824_v22 = vpop.permute.xlu0 %2823 }
 0x281   : > { %v2936_v60 = vmul.f32 %v2824_v22, %v4875_v48  ;;  %v5708_v22 = vld [vmem:[#allocation117_spill] sm:$0xff]  ;;  %v2940_v50 = vmul.f32 %v2843_v26, %v4879_v37  ;;  %v5712_v26 = vld [vmem:[#allocation114_spill] sm:$0xff] }
 0x282   : > { %v2914_v52 = vmul.f32 %v2721_v18, %v5708_v22 }
 0x283   : > { %v3059_v17 = vadd.f32 %v3058_v6, %v2936_v60 }
 0x284   : > { %v2877_v9 = vpop.permute.xlu1 %2876  ;;  %v2873_v2 = vpop.permute.xlu0 %2872 }
 0x285   : > { %v2947_v6 = vmul.f32 %v2877_v9, %v4932_v57  ;;  %v5715_v9 = vld [vmem:[#allocation115_spill] sm:$0xff] }
 0x288   : > { %v2786_v33 = vpop.permute.xlu1 %2785  ;;  %v2710_v11 = vpop.permute.xlu0 %2709 }
 0x289   : > { %v2928_v20 = vmul.f32 %v2786_v33, %v5711_v4  ;;  %v2946_v33 = vmul.f32 %v2873_v2, %v4937_v15  ;;  %v5716_v2 = vld [vmem:[#allocation128_spill] sm:$0xff] }
 0x28b   : > { %v3085_v59 = vadd.f32 %v2947_v6, %v2946_v33 }
 0x28c   : > { %v2729_v56 = vpop.permute.xlu1 %2728  ;;  %v5179_v42 = vpop.permute.xlu0 %2861 }
 0x290   : > { %v2771_v14 = vpop.permute.xlu1 %2770  ;;  %v2752_v27 = vpop.permute.xlu0 %2751 }
 0x291   : > { %v2925_v54 = vmul.f32 %v2771_v14, %v5701_v32  ;;  %v2921_v13 = vmul.f32 %v2752_v27, %v5702_v53  ;;  %v3067_v14 = vadd.f32 %v2939_v3, %v2938_v44  ;;  %v3004_v27 = vadd.f32 %v2911_v51, %v2910_v28 }
 0x292   : > { %v3040_v32 = vadd.f32 %v2927_v55, %v2926_v21  ;;  %v3013_v53 = vadd.f32 %v2915_v25, %v2914_v52  ;;  %v2916_v28 = vmul.f32 %v2729_v56, %v5713_v23 }
 0x293   : > { %v3033_v43 = vadd.f32 %v3032_v36, %v2925_v54  ;;  %v3024_v49 = vadd.f32 %v3023_v12, %v2921_v13  ;;  %v3068_v37 = vadd.f32 %v3067_v14, %v2940_v50  ;;  %v2912_v13 = vmul.f32 %v2710_v11, %v5712_v26 }
 0x294   : > { %v2828_v61 = vpop.permute.xlu1 %2827  ;;  %v2805_v47 = vpop.permute.xlu0 %2804  ;;  %v3041_v44 = vadd.f32 %v3040_v32, %v2928_v20  ;;  %v3014_v52 = vadd.f32 %v3013_v53, %v2916_v28 }
 0x295   : > { %v3034_v5 = vrot.slane %v3033_v43, 4  ;;  %v3025_v48 = vrot.slane %v3024_v49, 4  ;;  %v2937_v19 = vmul.f32 %v2828_v61, %v4895_v34  ;;  %v3005_v21 = vadd.f32 %v3004_v27, %v2912_v13 }
 0x296   : > { %v2932_v35 = vmul.f32 %v2805_v47, %v5716_v2 }
 0x297   : > { %v3035_v62 = vadd.f32 %v3034_v5, %v3033_v43  ;;  %v3026_v16 = vadd.f32 %v3025_v48, %v3024_v49  ;;  %v3060_v36 = vadd.f32 %v3059_v17, %v2937_v19 }
 0x298   : > { %v2881_v12 = vpop.permute.xlu1 %2880  ;;  %v2847_v34 = vpop.permute.xlu0 %2846  ;;  %v3050_v0 = vadd.f32 %v3049_v7, %v2932_v35 }
 0x299   : > { %v3036_v54 = vrot.slane %v3035_v62, 2  ;;  %v3027_v18 = vrot.slane %v3026_v16, 2  ;;  %v2941_v46 = vmul.f32 %v2847_v34, %v4898_v8  ;;  %v3061_v40 = vrot.slane %v3060_v36, 4 }
 0x29a   : > { %v2944_v8 = vmul.f32 %v5179_v42, %v4919_v24  ;;  %v2948_v19 = vmul.f32 %v2881_v12, %v4945_v38  ;;  %v5717_v42 = vld [vmem:[#allocation102_spill] sm:$0xff] }
 0x29b   : > { %v3037_v3 = vadd.f32 %v3036_v54, %v3035_v62  ;;  %v3028_v60 = vadd.f32 %v3027_v18, %v3026_v16  ;;  %v3069_v51 = vadd.f32 %v3068_v37, %v2941_v46  ;;  %v3062_v48 = vadd.f32 %v3061_v40, %v3060_v36  ;;  %v5718_v18 = vld [vmem:[#allocation129_spill] sm:$0xff] }
 0x29c   : > { %v2790_v43 = vpop.permute.xlu1 %2789  ;;  %v2714_v49 = vpop.permute.xlu0 %2713  ;;  %v3077_v63 = vadd.f32 %v3076_v45, %v2944_v8  ;;  %v3086_v27 = vadd.f32 %v3085_v59, %v2948_v19 }
 0x29d   : > { %v3038_v30 = vrot.slane %v3037_v3, 1  ;;  %v3029_v55 = vrot.slane %v3028_v60, 1  ;;  %v2929_v11 = vmul.f32 %v2790_v43, %v5714_v39  ;;  %v3070_v57 = vrot.slane %v3069_v51, 4 }
 0x29e   : > { %v2913_v29 = vmul.f32 %v2714_v49, %v5715_v9  ;;  %v3063_v14 = vrot.slane %v3062_v48, 2 }
 0x29f   : > { %v3039_v61 = vadd.f32 %v3038_v30, %v3037_v3  ;;  %v3030_v15 = vadd.f32 %v3029_v55, %v3028_v60  ;;  %v3042_v5 = vadd.f32 %v3041_v44, %v2929_v11  ;;  %v3071_v56 = vadd.f32 %v3070_v57, %v3069_v51 }
 0x2a0   : > { %v3006_v1 = vadd.f32 %v3005_v21, %v2913_v29  ;;  %v2733_v25 = vpop.permute.xlu1 %2732  ;;  %v2866_v22 = vpop.permute.xlu0 %2865  ;;  %v3064_v60 = vadd.f32 %v3063_v14, %v3062_v48 }
 0x2a1   : > { %v5215_v50 = vsel %vm1462_vm0, %v3039_v61, %v3030_v15  ;;  %v3043_v24 = vrot.slane %v3042_v5, 4  ;;  %v2917_v17 = vmul.f32 %v2733_v25, %v5717_v42  ;;  %v2945_v47 = vmul.f32 %v2866_v22, %v4929_v41 }
 0x2a2   : > { %v3007_v31 = vrot.slane %v3006_v1, 4  ;;  %v3072_v62 = vrot.slane %v3071_v56, 2  ;;  %v3065_v11 = vrot.slane %v3064_v60, 1 }
 0x2a3   : > { %v3044_v16 = vadd.f32 %v3043_v24, %v3042_v5  ;;  %v3015_v38 = vadd.f32 %v3014_v52, %v2917_v17  ;;  %v3078_v20 = vadd.f32 %v3077_v63, %v2945_v47 }
 0x2a4   : > { %v3008_v4 = vadd.f32 %v3007_v31, %v3006_v1  ;;  %v2885_v36 = vpop.permute.xlu1 %2884  ;;  %v2809_v12 = vpop.permute.xlu0 %2808  ;;  %v3073_v26 = vadd.f32 %v3072_v62, %v3071_v56  ;;  %v3066_v19 = vadd.f32 %v3065_v11, %v3064_v60 }
 0x2a5   : > { %v3045_v34 = vrot.slane %v3044_v16, 2  ;;  %v3016_v32 = vrot.slane %v3015_v38, 4  ;;  %v2949_v54 = vmul.f32 %v2885_v36, %v4950_v58  ;;  %v2933_v53 = vmul.f32 %v2809_v12, %v5718_v18 }
 0x2a6   : > { %v3009_v45 = vrot.slane %v3008_v4, 2  ;;  %v3079_v37 = vrot.slane %v3078_v20, 4  ;;  %v3074_v49 = vrot.slane %v3073_v26, 1 }
 0x2a7   : > { %v3017_v41 = vadd.f32 %v3016_v32, %v3015_v38  ;;  %v3087_v13 = vadd.f32 %v3086_v27, %v2949_v54  ;;  %v3051_v46 = vadd.f32 %v3050_v0, %v2933_v53  ;;  %v3046_v7 = vadd.f32 %v3045_v34, %v3044_v16 }
 0x2a8   : > { %v3010_v6 = vadd.f32 %v3009_v45, %v3008_v4  ;;  %v3080_v3 = vadd.f32 %v3079_v37, %v3078_v20  ;;  %v3075_v29 = vadd.f32 %v3074_v49, %v3073_v26 }
 0x2a9   : > { %v3018_v33 = vrot.slane %v3017_v41, 2  ;;  %v3088_v44 = vrot.slane %v3087_v13, 4  ;;  %v3052_v40 = vrot.slane %v3051_v46, 4  ;;  %v3047_v30 = vrot.slane %v3046_v7, 1 }
 0x2aa   : > { %v3011_v51 = vrot.slane %v3010_v6, 1  ;;  %v3081_v43 = vrot.slane %v3080_v3, 2  ;;  %v3119_v22 = vsel %vm1462_vm0, %v3075_v29, %v3066_v19 }
 0x2ab   : > { %v3019_v23 = vadd.f32 %v3018_v33, %v3017_v41  ;;  %v3089_v58 = vadd.f32 %v3088_v44, %v3087_v13  ;;  %v3053_v28 = vadd.f32 %v3052_v40, %v3051_v46  ;;  %v3048_v35 = vadd.f32 %v3047_v30, %v3046_v7 }
 0x2ac   : > { %v3012_v55 = vadd.f32 %v3011_v51, %v3010_v6  ;;  %v3082_v39 = vadd.f32 %v3081_v43, %v3080_v3 }
 0x2ad   : > { %v3020_v21 = vrot.slane %v3019_v23, 1  ;;  %v3090_v8 = vrot.slane %v3089_v58, 2  ;;  %v3054_v57 = vrot.slane %v3053_v28, 2  ;;  %v3117_v42 = vsel %vm1464_vm1, %v3048_v35, %v5215_v50 }
 0x2ae   : > { %v3083_v9 = vrot.slane %v3082_v39, 1  ;;  %v3114_v5 = vsel %vm1464_vm1, %v3012_v55, %v5177_v10 }
 0x2af   : > { %v3021_v61 = vadd.f32 %v3020_v21, %v3019_v23  ;;  %v3091_v15 = vadd.f32 %v3090_v8, %v3089_v58  ;;  %v3055_v2 = vadd.f32 %v3054_v57, %v3053_v28 }
 0x2b0   : > { %v3084_v48 = vadd.f32 %v3083_v9, %v3082_v39 }
 0x2b1   : > { %v3115_v56 = vsel %vm1466_vm2, %v3021_v61, %v3114_v5  ;;  %v3092_v1 = vrot.slane %v3091_v15, 1  ;;  %v3056_v25 = vrot.slane %v3055_v2, 1 }
 0x2b2   : > { %3391 = vst [vmem:[%s4689_s17 + $0x14] sm:$0xf] %v3115_v56  ;;  %v3120_v17 = vsel %vm1464_vm1, %v3084_v48, %v3119_v22 }
 0x2b3   : > { %v3093_v52 = vadd.f32 %v3092_v1, %v3091_v15  ;;  %v3057_v24 = vadd.f32 %v3056_v25, %v3055_v2 }
 0x2b5   : > { %v3121_v10 = vsel %vm1466_vm2, %v3093_v52, %v3120_v17  ;;  %v3118_v59 = vsel %vm1466_vm2, %v3057_v24, %v3117_v42 }
 0x2b6   : > { %3393 = vst [vmem:[%s4689_s17 + $0x1c] sm:$0xf] %v3121_v10  ;;  %3392 = vst [vmem:[%s4689_s17 + $0x18] sm:$0xf] %v3118_v59 }
 0x2b7   : > { %s3406_s22 = sshll.u32 %s3621_s28, 8  ;;  %s3166_s20 = sshll.u32 %s4068_s14, 4  ;;  %s3167_s20 = int_to_ptr.vmem [resolvable:$true] %s3166_s20 }
 0x2b8   : > { %s3149_s29 = scalar_lea.hbm %s5298_s6, %s3406_s22  ;;  %s3548_s8 = smov 256  }
 0x2b9   : > { %3408 = sst [smem:[#allocation9]] (%p3643_p6), %s3548_s8  ;;  %s3549_s9 = smov 512  }
 0x2ba   : > { %3409 = sst [smem:[#allocation9 + $0x1]] (%p3643_p6), %s3549_s9  ;;  %s3550_s21 = smov 4  }
 0x2bb   : > { %3410 = sst [smem:[#allocation9 + $0x2]] (%p3643_p6), %s3550_s21  ;;  %s3551_s19 = smov 64  }
 0x2bc   : > { %3411 = sst [smem:[#allocation9 + $0x3]] (%p3643_p6), %s3551_s19  ;;  %s3552_s28 = smov [#allocation8]  }
 0x2bd   : > { %3412 = sst [smem:[#allocation9 + $0x4]] (%p3643_p6), %s3551_s19  ;;  %s3553_s14 = smov 0  }
 0x2be   : > { %3413 = sst [smem:[#allocation9 + $0x5]] (%p3643_p6), %s3550_s21 }
 0x2bf   : > { %3414 = dma.general (%p3643_p6), %s3167_s20, 512, %s3149_s29, %s3132_s15, %s3552_s28, [#allocation9], %s3553_s14, 0  }
 0x2c0   : > { %s3194_s8 = scalar_lea.hbm %s5299_s7, %s3406_s22  ;;  %s3211_s9 = sshll.u32 %s4689_s17, 4  ;;  %s3212_s9 = int_to_ptr.vmem [resolvable:$true] %s3211_s9 }
 0x2c1   : > { %s3554_s21 = smov 256   ;;  %s3555_s19 = smov 512  }
 0x2c2   : > { %3415 = sst [smem:[#allocation11]] (%p3643_p6), %s3554_s21  ;;  %s3556_s15 = smov 4  }
 0x2c3   : > { %3416 = sst [smem:[#allocation11 + $0x1]] (%p3643_p6), %s3555_s19  ;;  %s3557_s20 = smov 64  }
 0x2c4   : > { %3417 = sst [smem:[#allocation11 + $0x2]] (%p3643_p6), %s3556_s15  ;;  %s3558_s29 = smov [#allocation10]  }
 0x2c5   : > { %3418 = sst [smem:[#allocation11 + $0x3]] (%p3643_p6), %s3557_s20  ;;  %s3559_s22 = smov 0  }
 0x2c6   : > { %3419 = sst [smem:[#allocation11 + $0x4]] (%p3643_p6), %s3557_s20 }
 0x2c7   : > { %3420 = sst [smem:[#allocation11 + $0x5]] (%p3643_p6), %s3556_s15 }
 0x2c8   : > { %3421 = dma.general (%p3643_p6), %s3212_s9, 512, %s3194_s8, %s3137_s16, %s3558_s29, [#allocation11], %s3559_s22, 0  }
 0x2c9 PF: > { %s3239_s17 = sand.u32 1, %s3534_s24   ;;  %p3425_p0 = pnand %p3368_p9, %p3647_p8 }
 0x2ca   : > { %s3240_s28 = scalar_lea.sflag [#allocation5], %s3239_s17 }
 0x2cb   : > { %3525 = dma.done.wait (!%p3425_p0), %s3240_s28, 512  }
 0x2cc   : > { %3527 = vsyncadd (!%p3425_p0), %s3240_s28, 4294966784  ;;  %s3249_s14 = scalar_lea.sflag [#allocation7], %s3239_s17 }
 0x2cd   : > { %3529 = dma.done.wait (!%p3425_p0), %s3249_s14, 512  }
 0x2ce   : > { %3531 = vsyncadd (!%p3425_p0), %s3249_s14, 4294966784  ;;  %p21_p1 = scmp.ge.s32.totalorder %s3625_s30, 4   ;;  %s5719_s24 = smov %s3538_s25 }
 0x2cf   : > { %s5720_s25 = smov %s3542_s26  ;;  %s5721_s26 = smov %s3637_s10 }
 0x2d0   : > { %s5722_s27 = smov %s3625_s30  ;;  %23 = sbr.rel (!%p21_p1) target bundleno = 5 (0x5), region = 209 }
 0x2d7   :  { %3254 = vsyncpa [#allocation5], 1 }
 0x2d8   :  { %3256 = vsyncpa [#allocation5 + $0x1], 1 }
 0x2d9   :  { %3257 = vsyncpa [#allocation7], 1 }
 0x2da   :  { %3259 = vsyncpa [#allocation7 + $0x1], 1 }

</bundles_post_ra>
